<compile_context>
chip_gen: v7x
topology: tpu7x:2x2x1
jax: 0.10.0
libtpu: 0.0.40
codegen_flags: <defaults>
</compile_context>

<pallas_src>
import jax
import jax.numpy as jnp
from jax.experimental import pallas as pl
from jax.experimental.pallas import tpu as pltpu


def _round_up(x, m):
    return (x + m - 1) // m * m


# ----------------------------------------------------------------------------
# Pallas kernel: one tile of `tb` state rows -> tb * n_agents mixer outputs.
# ----------------------------------------------------------------------------
def indqmix_kernel(
    aq_ref,      # (tb, A*A)    agent Q rows (agent-major, then q-index)
    s_ref,       # (tb, S)      raw env state rows (no one-hot id)
    w_ref,       # (S, A*E+3E)  fused state weights [w1 | b1 | w_final | V0]
    abias_ref,   # (A, A*E+3E)  per-agent bias = layer bias + one-hot weight row
    wv2_ref,     # (1, E)       V[2] weight as a row
    bv2_ref,     # (1, 1)       V[2] bias
    out_ref,     # (A, tb)      q_tot, lane-dense over the row-tile axis
):
    A = out_ref.shape[0]
    E = wv2_ref.shape[1]
    AE = A * E

    s = s_ref[...]
    aq = aq_ref[...]
    wv2_row = wv2_ref[...]

    # One fused MXU pass for all four state->feature linears: (tb, A*E + 3E).
    z0 = jnp.dot(s, w_ref[...], preferred_element_type=jnp.float32)

    ys = []
    for i in range(A):                                   # static: A is tiny (4)
        z = z0 + abias_ref[i:i + 1, :]                   # fold one-hot id + biases

        w1 = jnp.abs(z[:, :AE])                          # |hyper_w_1(x)|   (tb, A*E)
        b1 = z[:, AE:AE + E]                             # hyper_b_1(x)     (tb, E)
        wf = jnp.abs(z[:, AE + E:AE + 2 * E])            # |hyper_w_final(x)|
        vh = jnp.maximum(z[:, AE + 2 * E:AE + 3 * E], 0.0)   # relu(V[0](x))

        # hidden = elu(bmm(agent_qs, w1) + b1), expanded over the static agent axis
        h = b1
        for a in range(A):
            c = i * A + a
            h = h + aq[:, c:c + 1] * w1[:, a * E:(a + 1) * E]
        hidden = jnp.where(h > 0, h, jnp.exp(jnp.minimum(h, 0.0)) - 1.0)  # ELU(1)

        # y = bmm(hidden, w_final) + V(x); V's (E,1) head folded into the reduce.
        r = hidden * wf + vh * wv2_row
        ys.append(jnp.sum(r, axis=-1, keepdims=True))    # (tb, 1)

    ycat = jnp.concatenate(ys, axis=1)                   # (tb, A)
    # Pad the agent axis to a sublane multiple so the transpose is tile-aligned.
    apad = _round_up(A, 8)
    if apad != A:
        ycat = jnp.concatenate(
            [ycat, jnp.zeros((ycat.shape[0], apad - A), ycat.dtype)], axis=1)
    yt = jnp.transpose(ycat)                             # (apad, tb), lane-dense
    out_ref[...] = yt[:A, :] + bv2_ref[...]


# ----------------------------------------------------------------------------
# Wrapper
# ----------------------------------------------------------------------------
def indqmix_forward(agent_qs, states_batch, params, *, n_agents, embed_dim, tb=1024):
    """
    agent_qs     : (bs, ts, n_agents, n_agents) f32 -- row i uses agent_qs[b,t,i,:]
    states_batch : (bs, ts, state_dim) f32
    returns q_tot: (bs, ts, n_agents) f32
    """
    bs, ts, A2, A = agent_qs.shape
    assert A == n_agents and A2 == n_agents
    S = states_batch.shape[-1]
    E = embed_dim
    N = A * E + 3 * E

    (ww1, bw1, wb1, bb1, wwf, bwf, wv1, bv1, wv2, bv2) = params

    # Each weight has shape (S + A, out): split into state rows + one-hot rows and
    # fold the one-hot rows plus the layer biases into per-agent bias vectors.
    w_state = jnp.concatenate([ww1[:S], wb1[:S], wwf[:S], wv1[:S]], axis=1)   # (S, N)
    w_agent = jnp.concatenate([ww1[S:], wb1[S:], wwf[S:], wv1[S:]], axis=1)   # (A, N)
    b_cat = jnp.concatenate([bw1, bb1, bwf, bv1], axis=1)                     # (1, N)
    agent_bias = (w_agent + b_cat).astype(jnp.float32)                        # (A, N)
    wv2_row = wv2.reshape(1, E).astype(jnp.float32)
    bv2_s = bv2.reshape(1, 1).astype(jnp.float32)
    w_state = w_state.astype(jnp.float32)

    Brows = bs * ts
    # Row tile: big enough to amortize per-step pipeline overhead, multiple of 128
    # so the lane-dense output blocks are unmasked full-lane stores.  Clamp for
    # tiny inputs; keep it well under the v7x 64 MiB VMEM budget (<< 8 MiB here).
    tb_eff = max(128, min(_round_up(tb, 128), _round_up(Brows, 128)))
    Bpad = _round_up(Brows, tb_eff)

    states2 = states_batch.reshape(Brows, S).astype(jnp.float32)
    aq2 = agent_qs.reshape(Brows, A * A).astype(jnp.float32)
    if Bpad != Brows:
        states2 = jnp.pad(states2, ((0, Bpad - Brows), (0, 0)))
        aq2 = jnp.pad(aq2, ((0, Bpad - Brows), (0, 0)))

    full = lambda shape: pl.BlockSpec(shape, lambda i: (0, 0))

    out = pl.pallas_call(
        indqmix_kernel,
        out_shape=jax.ShapeDtypeStruct((A, Bpad), jnp.float32),
        grid=(Bpad // tb_eff,),
        in_specs=[
            pl.BlockSpec((tb_eff, A * A), lambda i: (i, 0)),
            pl.BlockSpec((tb_eff, S), lambda i: (i, 0)),
            full((S, N)),
            full((A, N)),
            full((1, E)),
            full((1, 1)),
        ],
        out_specs=pl.BlockSpec((A, tb_eff), lambda i: (0, i)),
        compiler_params=pltpu.CompilerParams(dimension_semantics=("parallel",)),
    )(aq2, states2, w_state, agent_bias, wv2_row, bv2_s)

    # out[a, b*ts+t] -> q_tot[b, t, a]
    return out[:, :Brows].T.reshape(bs, ts, A)


# ----------------------------------------------------------------------------
# Pure-JAX reference (mirrors the PyTorch forward) for a correctness check.
# ----------------------------------------------------------------------------
def indqmix_reference(agent_qs, states_batch, params, *, n_agents, embed_dim):
    bs, ts, _, A = agent_qs.shape
    S = states_batch.shape[-1]
    st = jnp.repeat(states_batch[:, :, None, :], n_agents, axis=2)
    agent_id = jnp.broadcast_to(
        jnp.eye(n_agents, dtype=states_batch.dtype)[None, None],
        (bs, ts, n_agents, n_agents),
    )
    states = jnp.concatenate([st, agent_id], axis=-1).reshape(-1, S + n_agents)
    aq = agent_qs.reshape(-1, 1, n_agents)

    (ww1, bw1, wb1, bb1, wwf, bwf, wv1, bv1, wv2, bv2) = params
    w1 = jnp.abs(states @ ww1 + bw1).reshape(-1, n_agents, embed_dim)
    b1 = (states @ wb1 + bb1).reshape(-1, 1, embed_dim)
    hidden = jax.nn.elu(jnp.einsum("bij,bjk->bik", aq, w1) + b1)
    wf = jnp.abs(states @ wwf + bwf).reshape(-1, embed_dim, 1)
    v = (jnp.maximum(states @ wv1 + bv1, 0.0) @ wv2 + bv2).reshape(-1, 1, 1)
    y = jnp.einsum("bij,bjk->bik", hidden, wf) + v
    return y.reshape(bs, -1, n_agents)


# ----------------------------------------------------------------------------
# Main
# ----------------------------------------------------------------------------
if __name__ == "__main__":
    # args: n_agents=4, state_dim=12, mixing_embed_dim=32, hypernet_layers=1,
    #       mixer_win_price=False, mixer_actions=False, mixer_agent_id=True
    bs, ts = 2, 4
    n_agents = 4
    state_dim = 12
    embed_dim = 32
    input_dim = state_dim + n_agents

    key = jax.random.PRNGKey(0)
    ks = jax.random.split(key, 12)

    scale = 0.1
    ww1 = scale * jax.random.normal(ks[0], (input_dim, embed_dim * n_agents), jnp.float32)
    bw1 = scale * jax.random.normal(ks[1], (1, embed_dim * n_agents), jnp.float32)
    wb1 = scale * jax.random.normal(ks[2], (input_dim, embed_dim), jnp.float32)
    bb1 = scale * jax.random.normal(ks[3], (1, embed_dim), jnp.float32)
    wwf = scale * jax.random.normal(ks[4], (input_dim, embed_dim), jnp.float32)
    bwf = scale * jax.random.normal(ks[5], (1, embed_dim), jnp.float32)
    wv1 = scale * jax.random.normal(ks[6], (input_dim, embed_dim), jnp.float32)
    bv1 = scale * jax.random.normal(ks[7], (1, embed_dim), jnp.float32)
    wv2 = scale * jax.random.normal(ks[8], (embed_dim, 1), jnp.float32)
    bv2 = scale * jax.random.normal(ks[9], (1, 1), jnp.float32)
    params = (ww1, bw1, wb1, bb1, wwf, bwf, wv1, bv1, wv2, bv2)

    agent_qs = jax.random.normal(ks[10], (bs, ts, n_agents, n_agents), jnp.float32)
    states = jax.random.normal(ks[11], (bs, ts, state_dim), jnp.float32)

    q_tot = indqmix_forward(
        agent_qs, states, params, n_agents=n_agents, embed_dim=embed_dim, tb=1024
    )
    q_tot = jax.block_until_ready(q_tot)

    q_ref = indqmix_reference(
        agent_qs, states, params, n_agents=n_agents, embed_dim=embed_dim
    )
    assert q_tot.shape == (bs, ts, n_agents)
    assert jnp.allclose(q_tot, q_ref, atol=5e-4, rtol=5e-4)

    print("KERNEL_OK")
</pallas_src>

<mosaic_0001>
module attributes {stable_mosaic.version = 11 : i64} {
  func.func @indqmix_kernel(%arg0: i32, %arg1: memref<128x16xf32, #tpu.memory_space<vmem>>, %arg2: memref<128x12xf32, #tpu.memory_space<vmem>>, %arg3: memref<12x224xf32, #tpu.memory_space<vmem>>, %arg4: memref<4x224xf32, #tpu.memory_space<vmem>>, %arg5: memref<1x32xf32, #tpu.memory_space<vmem>>, %arg6: memref<1x1xf32, #tpu.memory_space<vmem>>, %arg7: memref<4x128xf32, #tpu.memory_space<vmem>>) attributes {dimension_semantics = [#tpu.dimension_semantics<parallel>], iteration_bounds = array<i64: 1>, scalar_prefetch = 0 : i64, scratch_operands = 0 : i64, tpu.core_type = #tpu.core_type<tc>, window_params = [{transform_indices = @transform_0, window_bounds = array<i64: 128, 16>}, {transform_indices = @transform_1, window_bounds = array<i64: 128, 12>}, {pipeline_mode = #tpu.pipeline_mode<synchronous>, transform_indices = @transform_2, window_bounds = array<i64: 12, 224>}, {pipeline_mode = #tpu.pipeline_mode<synchronous>, transform_indices = @transform_3, window_bounds = array<i64: 4, 224>}, {pipeline_mode = #tpu.pipeline_mode<synchronous>, transform_indices = @transform_4, window_bounds = array<i64: 1, 32>}, {pipeline_mode = #tpu.pipeline_mode<synchronous>, transform_indices = @transform_5, window_bounds = array<i64: 1, 1>}, {transform_indices = @transform_6, window_bounds = array<i64: 4, 128>}]} {
    %c0 = arith.constant 0 : index
    %c0_0 = arith.constant 0 : index
    %0 = vector.load %arg2[%c0, %c0_0] : memref<128x12xf32, #tpu.memory_space<vmem>>, vector<128x12xf32>
    %c0_1 = arith.constant 0 : index
    %c0_2 = arith.constant 0 : index
    %1 = vector.load %arg1[%c0_1, %c0_2] : memref<128x16xf32, #tpu.memory_space<vmem>>, vector<128x16xf32>
    %c0_3 = arith.constant 0 : index
    %c0_4 = arith.constant 0 : index
    %2 = vector.load %arg5[%c0_3, %c0_4] : memref<1x32xf32, #tpu.memory_space<vmem>>, vector<1x32xf32>
    %c0_5 = arith.constant 0 : index
    %c0_6 = arith.constant 0 : index
    %3 = vector.load %arg3[%c0_5, %c0_6] : memref<12x224xf32, #tpu.memory_space<vmem>>, vector<12x224xf32>
    %cst = arith.constant dense<0.000000e+00> : vector<128x224xf32>
    %4 = tpu.matmul %0, %3, %cst {dimension_numbers = #tpu.dot_dimension_numbers<[1], [0], [0], [1], [0, 0, 1, 1], [], []>} : vector<128x12xf32>, vector<12x224xf32>, vector<128x224xf32> -> vector<128x224xf32>
    %c0_7 = arith.constant 0 : index
    %c0_8 = arith.constant 0 : index
    %5 = vector.load %arg4[%c0_7, %c0_8] : memref<4x224xf32, #tpu.memory_space<vmem>>, vector<1x224xf32>
    %6 = vector.broadcast %5 : vector<1x224xf32> to vector<128x224xf32>
    %7 = arith.addf %4, %6 : vector<128x224xf32>
    %8 = vector.extract_strided_slice %7 {offsets = [0, 0], sizes = [128, 128], strides = [1, 1]} : vector<128x224xf32> to vector<128x128xf32>
    %9 = math.absf %8 : vector<128x128xf32>
    %10 = vector.extract_strided_slice %7 {offsets = [0, 128], sizes = [128, 32], strides = [1, 1]} : vector<128x224xf32> to vector<128x32xf32>
    %11 = vector.extract_strided_slice %7 {offsets = [0, 160], sizes = [128, 32], strides = [1, 1]} : vector<128x224xf32> to vector<128x32xf32>
    %12 = math.absf %11 : vector<128x32xf32>
    %13 = vector.extract_strided_slice %7 {offsets = [0, 192], sizes = [128, 32], strides = [1, 1]} : vector<128x224xf32> to vector<128x32xf32>
    %cst_9 = arith.constant 0.000000e+00 : f32
    %14 = vector.broadcast %cst_9 : f32 to vector<128x32xf32>
    %15 = arith.maximumf %13, %14 : vector<128x32xf32>
    %16 = vector.extract_strided_slice %1 {offsets = [0, 0], sizes = [128, 1], strides = [1, 1]} : vector<128x16xf32> to vector<128x1xf32>
    %17 = vector.extract_strided_slice %9 {offsets = [0, 0], sizes = [128, 32], strides = [1, 1]} : vector<128x128xf32> to vector<128x32xf32>
    %18 = vector.broadcast %16 : vector<128x1xf32> to vector<128x32xf32>
    %19 = arith.mulf %18, %17 : vector<128x32xf32>
    %20 = arith.addf %10, %19 : vector<128x32xf32>
    %21 = vector.extract_strided_slice %1 {offsets = [0, 1], sizes = [128, 1], strides = [1, 1]} : vector<128x16xf32> to vector<128x1xf32>
    %22 = vector.extract_strided_slice %9 {offsets = [0, 32], sizes = [128, 32], strides = [1, 1]} : vector<128x128xf32> to vector<128x32xf32>
    %23 = vector.broadcast %21 : vector<128x1xf32> to vector<128x32xf32>
    %24 = arith.mulf %23, %22 : vector<128x32xf32>
    %25 = arith.addf %20, %24 : vector<128x32xf32>
    %26 = vector.extract_strided_slice %1 {offsets = [0, 2], sizes = [128, 1], strides = [1, 1]} : vector<128x16xf32> to vector<128x1xf32>
    %27 = vector.extract_strided_slice %9 {offsets = [0, 64], sizes = [128, 32], strides = [1, 1]} : vector<128x128xf32> to vector<128x32xf32>
    %28 = vector.broadcast %26 : vector<128x1xf32> to vector<128x32xf32>
    %29 = arith.mulf %28, %27 : vector<128x32xf32>
    %30 = arith.addf %25, %29 : vector<128x32xf32>
    %31 = vector.extract_strided_slice %1 {offsets = [0, 3], sizes = [128, 1], strides = [1, 1]} : vector<128x16xf32> to vector<128x1xf32>
    %32 = vector.extract_strided_slice %9 {offsets = [0, 96], sizes = [128, 32], strides = [1, 1]} : vector<128x128xf32> to vector<128x32xf32>
    %33 = vector.broadcast %31 : vector<128x1xf32> to vector<128x32xf32>
    %34 = arith.mulf %33, %32 : vector<128x32xf32>
    %35 = arith.addf %30, %34 : vector<128x32xf32>
    %cst_10 = arith.constant 0.000000e+00 : f32
    %36 = vector.broadcast %cst_10 : f32 to vector<128x32xf32>
    %37 = arith.cmpf ogt, %35, %36 : vector<128x32xf32>
    %cst_11 = arith.constant 0.000000e+00 : f32
    %38 = vector.broadcast %cst_11 : f32 to vector<128x32xf32>
    %39 = arith.minimumf %35, %38 : vector<128x32xf32>
    %40 = math.exp %39 : vector<128x32xf32>
    %cst_12 = arith.constant 1.000000e+00 : f32
    %41 = vector.broadcast %cst_12 : f32 to vector<128x32xf32>
    %42 = arith.subf %40, %41 : vector<128x32xf32>
    %43 = arith.select %37, %35, %42 : vector<128x32xi1>, vector<128x32xf32>
    %44 = arith.mulf %43, %12 : vector<128x32xf32>
    %45 = vector.broadcast %2 : vector<1x32xf32> to vector<128x32xf32>
    %46 = arith.mulf %15, %45 : vector<128x32xf32>
    %47 = arith.addf %44, %46 : vector<128x32xf32>
    %cst_13 = arith.constant dense<0.000000e+00> : vector<128xf32>
    %48 = vector.multi_reduction <add>, %47, %cst_13 [1] : vector<128x32xf32> to vector<128xf32>
    %49 = vector.shape_cast %48 : vector<128xf32> to vector<128x1xf32>
    %c1 = arith.constant 1 : index
    %c0_14 = arith.constant 0 : index
    %50 = vector.load %arg4[%c1, %c0_14] : memref<4x224xf32, #tpu.memory_space<vmem>>, vector<1x224xf32>
    %51 = vector.broadcast %50 : vector<1x224xf32> to vector<128x224xf32>
    %52 = arith.addf %4, %51 : vector<128x224xf32>
    %53 = vector.extract_strided_slice %52 {offsets = [0, 0], sizes = [128, 128], strides = [1, 1]} : vector<128x224xf32> to vector<128x128xf32>
    %54 = math.absf %53 : vector<128x128xf32>
    %55 = vector.extract_strided_slice %52 {offsets = [0, 128], sizes = [128, 32], strides = [1, 1]} : vector<128x224xf32> to vector<128x32xf32>
    %56 = vector.extract_strided_slice %52 {offsets = [0, 160], sizes = [128, 32], strides = [1, 1]} : vector<128x224xf32> to vector<128x32xf32>
    %57 = math.absf %56 : vector<128x32xf32>
    %58 = vector.extract_strided_slice %52 {offsets = [0, 192], sizes = [128, 32], strides = [1, 1]} : vector<128x224xf32> to vector<128x32xf32>
    %cst_15 = arith.constant 0.000000e+00 : f32
    %59 = vector.broadcast %cst_15 : f32 to vector<128x32xf32>
    %60 = arith.maximumf %58, %59 : vector<128x32xf32>
    %61 = vector.extract_strided_slice %1 {offsets = [0, 4], sizes = [128, 1], strides = [1, 1]} : vector<128x16xf32> to vector<128x1xf32>
    %62 = vector.extract_strided_slice %54 {offsets = [0, 0], sizes = [128, 32], strides = [1, 1]} : vector<128x128xf32> to vector<128x32xf32>
    %63 = vector.broadcast %61 : vector<128x1xf32> to vector<128x32xf32>
    %64 = arith.mulf %63, %62 : vector<128x32xf32>
    %65 = arith.addf %55, %64 : vector<128x32xf32>
    %66 = vector.extract_strided_slice %1 {offsets = [0, 5], sizes = [128, 1], strides = [1, 1]} : vector<128x16xf32> to vector<128x1xf32>
    %67 = vector.extract_strided_slice %54 {offsets = [0, 32], sizes = [128, 32], strides = [1, 1]} : vector<128x128xf32> to vector<128x32xf32>
    %68 = vector.broadcast %66 : vector<128x1xf32> to vector<128x32xf32>
    %69 = arith.mulf %68, %67 : vector<128x32xf32>
    %70 = arith.addf %65, %69 : vector<128x32xf32>
    %71 = vector.extract_strided_slice %1 {offsets = [0, 6], sizes = [128, 1], strides = [1, 1]} : vector<128x16xf32> to vector<128x1xf32>
    %72 = vector.extract_strided_slice %54 {offsets = [0, 64], sizes = [128, 32], strides = [1, 1]} : vector<128x128xf32> to vector<128x32xf32>
    %73 = vector.broadcast %71 : vector<128x1xf32> to vector<128x32xf32>
    %74 = arith.mulf %73, %72 : vector<128x32xf32>
    %75 = arith.addf %70, %74 : vector<128x32xf32>
    %76 = vector.extract_strided_slice %1 {offsets = [0, 7], sizes = [128, 1], strides = [1, 1]} : vector<128x16xf32> to vector<128x1xf32>
    %77 = vector.extract_strided_slice %54 {offsets = [0, 96], sizes = [128, 32], strides = [1, 1]} : vector<128x128xf32> to vector<128x32xf32>
    %78 = vector.broadcast %76 : vector<128x1xf32> to vector<128x32xf32>
    %79 = arith.mulf %78, %77 : vector<128x32xf32>
    %80 = arith.addf %75, %79 : vector<128x32xf32>
    %cst_16 = arith.constant 0.000000e+00 : f32
    %81 = vector.broadcast %cst_16 : f32 to vector<128x32xf32>
    %82 = arith.cmpf ogt, %80, %81 : vector<128x32xf32>
    %cst_17 = arith.constant 0.000000e+00 : f32
    %83 = vector.broadcast %cst_17 : f32 to vector<128x32xf32>
    %84 = arith.minimumf %80, %83 : vector<128x32xf32>
    %85 = math.exp %84 : vector<128x32xf32>
    %cst_18 = arith.constant 1.000000e+00 : f32
    %86 = vector.broadcast %cst_18 : f32 to vector<128x32xf32>
    %87 = arith.subf %85, %86 : vector<128x32xf32>
    %88 = arith.select %82, %80, %87 : vector<128x32xi1>, vector<128x32xf32>
    %89 = arith.mulf %88, %57 : vector<128x32xf32>
    %90 = vector.broadcast %2 : vector<1x32xf32> to vector<128x32xf32>
    %91 = arith.mulf %60, %90 : vector<128x32xf32>
    %92 = arith.addf %89, %91 : vector<128x32xf32>
    %cst_19 = arith.constant dense<0.000000e+00> : vector<128xf32>
    %93 = vector.multi_reduction <add>, %92, %cst_19 [1] : vector<128x32xf32> to vector<128xf32>
    %94 = vector.shape_cast %93 : vector<128xf32> to vector<128x1xf32>
    %c2 = arith.constant 2 : index
    %c0_20 = arith.constant 0 : index
    %95 = vector.load %arg4[%c2, %c0_20] : memref<4x224xf32, #tpu.memory_space<vmem>>, vector<1x224xf32>
    %96 = vector.broadcast %95 : vector<1x224xf32> to vector<128x224xf32>
    %97 = arith.addf %4, %96 : vector<128x224xf32>
    %98 = vector.extract_strided_slice %97 {offsets = [0, 0], sizes = [128, 128], strides = [1, 1]} : vector<128x224xf32> to vector<128x128xf32>
    %99 = math.absf %98 : vector<128x128xf32>
    %100 = vector.extract_strided_slice %97 {offsets = [0, 128], sizes = [128, 32], strides = [1, 1]} : vector<128x224xf32> to vector<128x32xf32>
    %101 = vector.extract_strided_slice %97 {offsets = [0, 160], sizes = [128, 32], strides = [1, 1]} : vector<128x224xf32> to vector<128x32xf32>
    %102 = math.absf %101 : vector<128x32xf32>
    %103 = vector.extract_strided_slice %97 {offsets = [0, 192], sizes = [128, 32], strides = [1, 1]} : vector<128x224xf32> to vector<128x32xf32>
    %cst_21 = arith.constant 0.000000e+00 : f32
    %104 = vector.broadcast %cst_21 : f32 to vector<128x32xf32>
    %105 = arith.maximumf %103, %104 : vector<128x32xf32>
    %106 = vector.extract_strided_slice %1 {offsets = [0, 8], sizes = [128, 1], strides = [1, 1]} : vector<128x16xf32> to vector<128x1xf32>
    %107 = vector.extract_strided_slice %99 {offsets = [0, 0], sizes = [128, 32], strides = [1, 1]} : vector<128x128xf32> to vector<128x32xf32>
    %108 = vector.broadcast %106 : vector<128x1xf32> to vector<128x32xf32>
    %109 = arith.mulf %108, %107 : vector<128x32xf32>
    %110 = arith.addf %100, %109 : vector<128x32xf32>
    %111 = vector.extract_strided_slice %1 {offsets = [0, 9], sizes = [128, 1], strides = [1, 1]} : vector<128x16xf32> to vector<128x1xf32>
    %112 = vector.extract_strided_slice %99 {offsets = [0, 32], sizes = [128, 32], strides = [1, 1]} : vector<128x128xf32> to vector<128x32xf32>
    %113 = vector.broadcast %111 : vector<128x1xf32> to vector<128x32xf32>
    %114 = arith.mulf %113, %112 : vector<128x32xf32>
    %115 = arith.addf %110, %114 : vector<128x32xf32>
    %116 = vector.extract_strided_slice %1 {offsets = [0, 10], sizes = [128, 1], strides = [1, 1]} : vector<128x16xf32> to vector<128x1xf32>
    %117 = vector.extract_strided_slice %99 {offsets = [0, 64], sizes = [128, 32], strides = [1, 1]} : vector<128x128xf32> to vector<128x32xf32>
    %118 = vector.broadcast %116 : vector<128x1xf32> to vector<128x32xf32>
    %119 = arith.mulf %118, %117 : vector<128x32xf32>
    %120 = arith.addf %115, %119 : vector<128x32xf32>
    %121 = vector.extract_strided_slice %1 {offsets = [0, 11], sizes = [128, 1], strides = [1, 1]} : vector<128x16xf32> to vector<128x1xf32>
    %122 = vector.extract_strided_slice %99 {offsets = [0, 96], sizes = [128, 32], strides = [1, 1]} : vector<128x128xf32> to vector<128x32xf32>
    %123 = vector.broadcast %121 : vector<128x1xf32> to vector<128x32xf32>
    %124 = arith.mulf %123, %122 : vector<128x32xf32>
    %125 = arith.addf %120, %124 : vector<128x32xf32>
    %cst_22 = arith.constant 0.000000e+00 : f32
    %126 = vector.broadcast %cst_22 : f32 to vector<128x32xf32>
    %127 = arith.cmpf ogt, %125, %126 : vector<128x32xf32>
    %cst_23 = arith.constant 0.000000e+00 : f32
    %128 = vector.broadcast %cst_23 : f32 to vector<128x32xf32>
    %129 = arith.minimumf %125, %128 : vector<128x32xf32>
    %130 = math.exp %129 : vector<128x32xf32>
    %cst_24 = arith.constant 1.000000e+00 : f32
    %131 = vector.broadcast %cst_24 : f32 to vector<128x32xf32>
    %132 = arith.subf %130, %131 : vector<128x32xf32>
    %133 = arith.select %127, %125, %132 : vector<128x32xi1>, vector<128x32xf32>
    %134 = arith.mulf %133, %102 : vector<128x32xf32>
    %135 = vector.broadcast %2 : vector<1x32xf32> to vector<128x32xf32>
    %136 = arith.mulf %105, %135 : vector<128x32xf32>
    %137 = arith.addf %134, %136 : vector<128x32xf32>
    %cst_25 = arith.constant dense<0.000000e+00> : vector<128xf32>
    %138 = vector.multi_reduction <add>, %137, %cst_25 [1] : vector<128x32xf32> to vector<128xf32>
    %139 = vector.shape_cast %138 : vector<128xf32> to vector<128x1xf32>
    %c3 = arith.constant 3 : index
    %c0_26 = arith.constant 0 : index
    %140 = vector.load %arg4[%c3, %c0_26] : memref<4x224xf32, #tpu.memory_space<vmem>>, vector<1x224xf32>
    %141 = vector.broadcast %140 : vector<1x224xf32> to vector<128x224xf32>
    %142 = arith.addf %4, %141 : vector<128x224xf32>
    %143 = vector.extract_strided_slice %142 {offsets = [0, 0], sizes = [128, 128], strides = [1, 1]} : vector<128x224xf32> to vector<128x128xf32>
    %144 = math.absf %143 : vector<128x128xf32>
    %145 = vector.extract_strided_slice %142 {offsets = [0, 128], sizes = [128, 32], strides = [1, 1]} : vector<128x224xf32> to vector<128x32xf32>
    %146 = vector.extract_strided_slice %142 {offsets = [0, 160], sizes = [128, 32], strides = [1, 1]} : vector<128x224xf32> to vector<128x32xf32>
    %147 = math.absf %146 : vector<128x32xf32>
    %148 = vector.extract_strided_slice %142 {offsets = [0, 192], sizes = [128, 32], strides = [1, 1]} : vector<128x224xf32> to vector<128x32xf32>
    %cst_27 = arith.constant 0.000000e+00 : f32
    %149 = vector.broadcast %cst_27 : f32 to vector<128x32xf32>
    %150 = arith.maximumf %148, %149 : vector<128x32xf32>
    %151 = vector.extract_strided_slice %1 {offsets = [0, 12], sizes = [128, 1], strides = [1, 1]} : vector<128x16xf32> to vector<128x1xf32>
    %152 = vector.extract_strided_slice %144 {offsets = [0, 0], sizes = [128, 32], strides = [1, 1]} : vector<128x128xf32> to vector<128x32xf32>
    %153 = vector.broadcast %151 : vector<128x1xf32> to vector<128x32xf32>
    %154 = arith.mulf %153, %152 : vector<128x32xf32>
    %155 = arith.addf %145, %154 : vector<128x32xf32>
    %156 = vector.extract_strided_slice %1 {offsets = [0, 13], sizes = [128, 1], strides = [1, 1]} : vector<128x16xf32> to vector<128x1xf32>
    %157 = vector.extract_strided_slice %144 {offsets = [0, 32], sizes = [128, 32], strides = [1, 1]} : vector<128x128xf32> to vector<128x32xf32>
    %158 = vector.broadcast %156 : vector<128x1xf32> to vector<128x32xf32>
    %159 = arith.mulf %158, %157 : vector<128x32xf32>
    %160 = arith.addf %155, %159 : vector<128x32xf32>
    %161 = vector.extract_strided_slice %1 {offsets = [0, 14], sizes = [128, 1], strides = [1, 1]} : vector<128x16xf32> to vector<128x1xf32>
    %162 = vector.extract_strided_slice %144 {offsets = [0, 64], sizes = [128, 32], strides = [1, 1]} : vector<128x128xf32> to vector<128x32xf32>
    %163 = vector.broadcast %161 : vector<128x1xf32> to vector<128x32xf32>
    %164 = arith.mulf %163, %162 : vector<128x32xf32>
    %165 = arith.addf %160, %164 : vector<128x32xf32>
    %166 = vector.extract_strided_slice %1 {offsets = [0, 15], sizes = [128, 1], strides = [1, 1]} : vector<128x16xf32> to vector<128x1xf32>
    %167 = vector.extract_strided_slice %144 {offsets = [0, 96], sizes = [128, 32], strides = [1, 1]} : vector<128x128xf32> to vector<128x32xf32>
    %168 = vector.broadcast %166 : vector<128x1xf32> to vector<128x32xf32>
    %169 = arith.mulf %168, %167 : vector<128x32xf32>
    %170 = arith.addf %165, %169 : vector<128x32xf32>
    %cst_28 = arith.constant 0.000000e+00 : f32
    %171 = vector.broadcast %cst_28 : f32 to vector<128x32xf32>
    %172 = arith.cmpf ogt, %170, %171 : vector<128x32xf32>
    %cst_29 = arith.constant 0.000000e+00 : f32
    %173 = vector.broadcast %cst_29 : f32 to vector<128x32xf32>
    %174 = arith.minimumf %170, %173 : vector<128x32xf32>
    %175 = math.exp %174 : vector<128x32xf32>
    %cst_30 = arith.constant 1.000000e+00 : f32
    %176 = vector.broadcast %cst_30 : f32 to vector<128x32xf32>
    %177 = arith.subf %175, %176 : vector<128x32xf32>
    %178 = arith.select %172, %170, %177 : vector<128x32xi1>, vector<128x32xf32>
    %179 = arith.mulf %178, %147 : vector<128x32xf32>
    %180 = vector.broadcast %2 : vector<1x32xf32> to vector<128x32xf32>
    %181 = arith.mulf %150, %180 : vector<128x32xf32>
    %182 = arith.addf %179, %181 : vector<128x32xf32>
    %cst_31 = arith.constant dense<0.000000e+00> : vector<128xf32>
    %183 = vector.multi_reduction <add>, %182, %cst_31 [1] : vector<128x32xf32> to vector<128xf32>
    %184 = vector.shape_cast %183 : vector<128xf32> to vector<128x1xf32>
    %185 = tpu.concatenate %49, %94, %139, %184 in 1 : vector<128x1xf32>, vector<128x1xf32>, vector<128x1xf32>, vector<128x1xf32> -> vector<128x4xf32>
    %cst_32 = arith.constant 0.000000e+00 : f32
    %186 = vector.broadcast %cst_32 : f32 to vector<128x4xf32>
    %187 = tpu.concatenate %185, %186 in 1 : vector<128x4xf32>, vector<128x4xf32> -> vector<128x8xf32>
    %188 = tpu.transpose %187, [1, 0] : vector<128x8xf32> -> vector<8x128xf32>
    %189 = vector.extract_strided_slice %188 {offsets = [0, 0], sizes = [4, 128], strides = [1, 1]} : vector<8x128xf32> to vector<4x128xf32>
    %c0_33 = arith.constant 0 : index
    %c0_34 = arith.constant 0 : index
    %190 = vector.load %arg6[%c0_33, %c0_34] : memref<1x1xf32, #tpu.memory_space<vmem>>, vector<1x1xf32>
    %191 = vector.broadcast %190 : vector<1x1xf32> to vector<4x128xf32>
    %192 = arith.addf %189, %191 : vector<4x128xf32>
    %c0_35 = arith.constant 0 : index
    %c0_36 = arith.constant 0 : index
    %193 = vector.load %arg7[%c0_35, %c0_36] : memref<4x128xf32, #tpu.memory_space<vmem>>, vector<4x128xf32>
    tpu.vector_store %arg7[%c0_35, %c0_36], %192 {strides = array<i32>} : memref<4x128xf32, #tpu.memory_space<vmem>>, vector<4x128xf32>,
    return
  }
  func.func @transform_0(%arg0: i32) -> (i32, i32) {
    %c0_i32 = arith.constant 0 : i32
    %c0_i32_0 = arith.constant 0 : i32
    return %arg0, %c0_i32 : i32, i32
  }
  func.func @transform_1(%arg0: i32) -> (i32, i32) {
    %c0_i32 = arith.constant 0 : i32
    %c0_i32_0 = arith.constant 0 : i32
    return %arg0, %c0_i32 : i32, i32
  }
  func.func @transform_2(%arg0: i32) -> (i32, i32) {
    %c0_i32 = arith.constant 0 : i32
    %c0_i32_0 = arith.constant 0 : i32
    %c0_i32_1 = arith.constant 0 : i32
    return %c0_i32, %c0_i32_0 : i32, i32
  }
  func.func @transform_3(%arg0: i32) -> (i32, i32) {
    %c0_i32 = arith.constant 0 : i32
    %c0_i32_0 = arith.constant 0 : i32
    %c0_i32_1 = arith.constant 0 : i32
    return %c0_i32, %c0_i32_0 : i32, i32
  }
  func.func @transform_4(%arg0: i32) -> (i32, i32) {
    %c0_i32 = arith.constant 0 : i32
    %c0_i32_0 = arith.constant 0 : i32
    %c0_i32_1 = arith.constant 0 : i32
    return %c0_i32, %c0_i32_0 : i32, i32
  }
  func.func @transform_5(%arg0: i32) -> (i32, i32) {
    %c0_i32 = arith.constant 0 : i32
    %c0_i32_0 = arith.constant 0 : i32
    %c0_i32_1 = arith.constant 0 : i32
    return %c0_i32, %c0_i32_0 : i32, i32
  }
  func.func @transform_6(%arg0: i32) -> (i32, i32) {
    %c0_i32 = arith.constant 0 : i32
    %c0_i32_0 = arith.constant 0 : i32
    return %c0_i32, %arg0 : i32, i32
  }
}

</mosaic_0001>

<bundles_post_ra>
// kernel: tpu_custom_call.1
= control target key start
LH: loop header
LB: loop body
LE: loop exit
PB: predicated region body
PF: predicated region fallthrough
CT: control target
= control target key end

     0   :  { %s8650_s0 = inlined_call_operand.vmem [shape: f32[128,16], index: 0, kind: input, shape index: {}]   ;;  %s8651_s1 = inlined_call_operand.vmem [shape: f32[128,12], index: 1, kind: input, shape index: {}]   ;;  %s8652_s2 = inlined_call_operand.vmem [shape: f32[12,224], index: 2, kind: input, shape index: {}]   ;;  %s8653_s3 = inlined_call_operand.vmem [shape: f32[4,224], index: 3, kind: input, shape index: {}]   ;;  %s8654_s4 = inlined_call_operand.vmem [shape: f32[1,32], index: 4, kind: input, shape index: {}]   ;;  %s8655_s5 = inlined_call_operand.<no memory space> [shape: f32[1,1], index: 5, kind: input, shape index: {}]   ;;  %s8656_s6 = inlined_call_operand.hbm [shape: f32[4,128], index: 6, kind: output, shape index: {}]  }
   0x1   :  { %v11_v0 = vstv %s8655_s5 }
   0x2   :  { %12 = vst [vmem:[#allocation2] sm:$0x1] %v11_v0 }
   0x3   :  { %v4799_v1 = vld [vmem:[%s8650_s0 + $0x10] sm:$0xff]  ;;  %v4804_v2 = vld [vmem:[%s8650_s0] sm:$0xff]  ;;  %v60_v3 = vld [vmem:[%s8652_s2 + $0x8] sm:$0xff]  ;;  %vm112_vm0 = vcmask 1043456   ;;  %v8657_v4 = vmov 0   ;;  %vm4737_vm1 = vmmov 1  }
   0x4   :  { %4504 = vset.pattern.permute.xlu1 %v8657_v4  ;;  %4503 = vset.pattern.permute.xlu0 %v8657_v4  ;;  %v62_v5 = vld [vmem:[%s8652_s2 + $0x18] sm:$0xf]  ;;  %vm4474_vm2 = vmpackc.low %vm112_vm0, %vm4737_vm1  ;;  %v59_v6 = vld [vmem:[%s8652_s2] sm:$0xff]  ;;  %v4738_v10 = vmov 0.0   ;;  %vm63_vm3 = vcmask 97280  }
   0x5   :  { %384 = vperm.xlu1 %4504, %v4799_v1   ;;  %374 = vperm.xlu0 %4503, %v4804_v2   ;;  %v4473_v7 = vpack.c.bf16 %v62_v5, %v60_v3  ;;  %v61_v8 = vld [vmem:[%s8652_s2 + $0x10] sm:$0xf]  ;;  %v4827_v11 = vld [vmem:[%s8650_s0 + $0x18] sm:$0xff]  ;;  %v4832_v12 = vld [vmem:[%s8650_s0 + $0x8] sm:$0xff] }
   0x6   :  { %v4476_v9 = vpack.c.bf16 %v61_v8, %v59_v6  ;;  %183 = vmatprep.mubr.f32.mxu0 %v4738_v10  ;;  %231 = vmatprep.mubr.f32.mxu1 %v4738_v10  ;;  %v26_v13 = vld [vmem:[%s8651_s1] sm:$0xff]  ;;  %v4845_v15 = vld [vmem:[%s8650_s0 + $0x28] sm:$0xff]  ;;  %v4867_v19 = vld [vmem:[%s8650_s0 + $0x38] sm:$0xff] }
   0x7   :  { %4475 = vmatprep.subr.msk.bf16.mxu0 %vm4474_vm2, %v4473_v7  ;;  %4479 = vmatprep.subr.msk.bf16.mxu1 %vm4474_vm2, %v4473_v7  ;;  %v34_v14 = vld [vmem:[%s8651_s1 + $0x40] sm:$0xff]  ;;  %v27_v17 = vld [vmem:[%s8651_s1 + $0x8] sm:$0xff]  ;;  %v4872_v20 = vld [vmem:[%s8650_s0 + $0x30] sm:$0xff] }
   0x8   :  { %4478 = vmatpush1.bf16.msk.msra.mxu0 %vm4474_vm2, %v4476_v9  ;;  %4480 = vmatpush1.bf16.msk.msra.mxu1 %vm4474_vm2, %v4476_v9  ;;  %v4850_v16 = vld [vmem:[%s8650_s0 + $0x20] sm:$0xff]  ;;  %v35_v18 = vld [vmem:[%s8651_s1 + $0x48] sm:$0xff] }
   0x9   :  { %389 = vperm.xlu1 %4504, %v4827_v11   ;;  %379 = vperm.xlu0 %4503, %v4832_v12  }
   0xb   :  { %4388 = vmatmul.mubr.msk.f32.vlgmr.msra.gmra.mrb[0].mxu0 %vm63_vm3, %v26_v13  ;;  %4396 = vmatmul.mubr.msk.f32.vlgmr.msra.gmra.mrb[0].mxu1 %vm63_vm3, %v34_v14 }
   0xc   :  { %189 = vmatprep.mubr.f32.mxu0 %v4738_v10  ;;  %237 = vmatprep.mubr.f32.mxu1 %v4738_v10 }
   0xd   :  { %399 = vperm.xlu1 %4504, %v4845_v15   ;;  %394 = vperm.xlu0 %4503, %v4850_v16  }
   0xf   :  { %4389 = vmatmul.mubr.msk.f32.gmra.mrb[2].mxu0 %vm63_vm3, %v27_v17  ;;  %4397 = vmatmul.mubr.msk.f32.gmra.mrb[2].mxu1 %vm63_vm3, %v35_v18 }
  0x10   :  { %13 = vsyncpa [#allocation4], 0  ;;  %195 = vmatprep.mubr.f32.mxu0 %v4738_v10  ;;  %243 = vmatprep.mubr.f32.mxu1 %v4738_v10  ;;  %v28_v21 = vld [vmem:[%s8651_s1 + $0x10] sm:$0xff]  ;;  %v4889_v23 = vld [vmem:[%s8650_s0 + $0x48] sm:$0xff]  ;;  %v4739_v41 = vmov 1   ;;  %v4740_v42 = vmov 2   ;;  %v282_v43 = vlaneseq }
  0x11   :  { %v36_v22 = vld [vmem:[%s8651_s1 + $0x50] sm:$0xff]  ;;  %409 = vperm.xlu1 %4504, %v4867_v19   ;;  %404 = vperm.xlu0 %4503, %v4872_v20   ;;  %v4894_v24 = vld [vmem:[%s8650_s0 + $0x40] sm:$0xff]  ;;  %v29_v25 = vld [vmem:[%s8651_s1 + $0x18] sm:$0xff]  ;;  %v4741_v49 = vmov 3   ;;  %s4743_s24 = smov 64   ;;  %s4744_s25 = smov 32  }
  0x12   :  { %v37_v26 = vld [vmem:[%s8651_s1 + $0x58] sm:$0xff]  ;;  %v4916_v28 = vld [vmem:[%s8650_s0 + $0x50] sm:$0xff]  ;;  %v30_v29 = vld [vmem:[%s8651_s1 + $0x20] sm:$0xff]  ;;  %v5014_v44 = vshrl.u32 %v282_v43, 7  ;;  %vm1244_vm5 = vcmask 261120  }
  0x13   :  { %4390 = vmatmul.mubr.msk.f32.gmra.mrb[4].mxu0 %vm63_vm3, %v28_v21  ;;  %4398 = vmatmul.mubr.msk.f32.gmra.mrb[4].mxu1 %vm63_vm3, %v36_v22  ;;  %v4911_v27 = vld [vmem:[%s8650_s0 + $0x58] sm:$0xff]  ;;  %v38_v30 = vld [vmem:[%s8651_s1 + $0x60] sm:$0xff]  ;;  %v4933_v31 = vld [vmem:[%s8650_s0 + $0x68] sm:$0xff] }
  0x14   :  { %201 = vmatprep.mubr.f32.mxu0 %v4738_v10  ;;  %249 = vmatprep.mubr.f32.mxu1 %v4738_v10  ;;  %v4938_v32 = vld [vmem:[%s8650_s0 + $0x60] sm:$0xff]  ;;  %v31_v33 = vld [vmem:[%s8651_s1 + $0x28] sm:$0xff]  ;;  %v4955_v35 = vld [vmem:[%s8650_s0 + $0x78] sm:$0xff]  ;;  %v5019_v45 = vsub.s32 1, %v5014_v44 }
  0x15   :  { %419 = vperm.xlu1 %4504, %v4889_v23   ;;  %414 = vperm.xlu0 %4503, %v4894_v24   ;;  %v39_v34 = vld [vmem:[%s8651_s1 + $0x68] sm:$0xff]  ;;  %v4960_v36 = vld [vmem:[%s8650_s0 + $0x70] sm:$0xff]  ;;  %v33_v39 = vld [vmem:[%s8651_s1 + $0x38] sm:$0xff] }
  0x16   :  { %v32_v37 = vld [vmem:[%s8651_s1 + $0x30] sm:$0xff]  ;;  %v41_v40 = vld [vmem:[%s8651_s1 + $0x78] sm:$0xff]  ;;  %v5024_v46 = vld [vmem:[%s8653_s3 + $0x1] ss:$4 sm:$0x3] }
  0x17   :  { %4391 = vmatmul.mubr.msk.f32.gmra.mrb[6].mxu0 %vm63_vm3, %v29_v25  ;;  %4399 = vmatmul.mubr.msk.f32.gmra.mrb[6].mxu1 %vm63_vm3, %v37_v26  ;;  %v40_v38 = vld [vmem:[%s8651_s1 + $0x70] sm:$0xff]  ;;  %v5029_v47 = vld [vmem:[%s8653_s3 + $0x2] ss:$4 sm:$0x3]  ;;  %v5039_v50 = vrot.slane %v5024_v46, %v5019_v45 }
  0x18   :  { %207 = vmatprep.mubr.f32.mxu0 %v4738_v10  ;;  %255 = vmatprep.mubr.f32.mxu1 %v4738_v10  ;;  %v5034_v48 = vld [vmem:[%s8653_s3 + $0x3] ss:$4 sm:$0x3]  ;;  %v5043_v51 = vrot.slane %v5029_v47, %v5019_v45 }
  0x19   :  { %429 = vperm.xlu1 %4504, %v4911_v27   ;;  %424 = vperm.xlu0 %4503, %v4916_v28   ;;  %v5048_v52 = vrot.slane %v5034_v48, %v5019_v45 }
  0x1b   :  { %4392 = vmatmul.mubr.msk.f32.gmra.mrb[8].mxu0 %vm63_vm3, %v30_v29  ;;  %4400 = vmatmul.mubr.msk.f32.gmra.mrb[8].mxu1 %vm63_vm3, %v38_v30  ;;  %v284_v29 = vsub.s32 0, %v5014_v44  ;;  %v280_v30 = vld [vmem:[%s8653_s3] ss:$4 sm:$0x3]  ;;  %s4742_s3 = smov 96  }
  0x1c   :  { %213 = vmatprep.mubr.f32.mxu0 %v4738_v10  ;;  %261 = vmatprep.mubr.f32.mxu1 %v4738_v10 }
  0x1d   :  { %439 = vperm.xlu1 %4504, %v4933_v31   ;;  %434 = vperm.xlu0 %4503, %v4938_v32  }
  0x1f   :  { %4393 = vmatmul.mubr.msk.f32.gmra.mrb[10].mxu0 %vm63_vm3, %v31_v33  ;;  %4401 = vmatmul.mubr.msk.f32.gmra.mrb[10].mxu1 %vm63_vm3, %v39_v34  ;;  %v5153_v33 = vrot.slane %v5034_v48, %v284_v29  ;;  %v5180_v48 = vrot.slane %v280_v30, %v5019_v45 }
  0x20   :  { %219 = vmatprep.mubr.f32.mxu0 %v4738_v10  ;;  %267 = vmatprep.mubr.f32.mxu1 %v4738_v10 }
  0x21   :  { %449 = vperm.xlu1 %4504, %v4955_v35   ;;  %444 = vperm.xlu0 %4503, %v4960_v36  }
  0x23   :  { %4394 = vmatmul.mubr.msk.f32.gmra.mrb[12].mxu0 %vm63_vm3, %v32_v37  ;;  %4402 = vmatmul.mubr.msk.f32.gmra.mrb[12].mxu1 %vm63_vm3, %v40_v38  ;;  %v5159_v37 = vrot.slane %v280_v30, %v284_v29 }
  0x24   :  { %225 = vmatprep.mubr.f32.mxu0 %v4738_v10  ;;  %273 = vmatprep.mubr.f32.mxu1 %v4738_v10 }
  0x25   :  { %4506 = vset.pattern.permute.xlu1 %v4739_v41  ;;  %4505 = vset.pattern.permute.xlu0 %v4739_v41 }
  0x26   :  { %489 = vperm.xlu1 %4506, %v4832_v12   ;;  %485 = vperm.xlu0 %4505, %v4804_v2  }
  0x27   :  { %4395 = vmatmul.mubr.msk.f32.gmra.mrb[14].mxu0 %vm63_vm3, %v33_v39  ;;  %4403 = vmatmul.mubr.msk.f32.gmra.mrb[14].mxu1 %vm63_vm3, %v41_v40 }
  0x2a   :  { %493 = vperm.xlu1 %4506, %v4799_v1   ;;  %497 = vperm.xlu0 %4505, %v4827_v11  }
  0x2e   :  { %501 = vperm.xlu1 %4506, %v4850_v16   ;;  %505 = vperm.xlu0 %4505, %v4845_v15  }
  0x32   :  { %509 = vperm.xlu1 %4506, %v4872_v20   ;;  %513 = vperm.xlu0 %4505, %v4867_v19  }
  0x36   :  { %517 = vperm.xlu1 %4506, %v4894_v24   ;;  %521 = vperm.xlu0 %4505, %v4889_v23  }
  0x3a   :  { %525 = vperm.xlu1 %4506, %v4916_v28   ;;  %529 = vperm.xlu0 %4505, %v4911_v27  }
  0x3e   :  { %533 = vperm.xlu1 %4506, %v4938_v32   ;;  %537 = vperm.xlu0 %4505, %v4933_v31  }
  0x42   :  { %541 = vperm.xlu1 %4506, %v4960_v36   ;;  %545 = vperm.xlu0 %4505, %v4955_v35  }
  0x46   :  { %4507 = vset.pattern.permute.xlu1 %v4740_v42  ;;  %4508 = vset.pattern.permute.xlu0 %v4740_v42 }
  0x47   :  { %645 = vperm.xlu1 %4507, %v4804_v2   ;;  %649 = vperm.xlu0 %4508, %v4832_v12  }
  0x4b   :  { %653 = vperm.xlu1 %4507, %v4799_v1   ;;  %661 = vperm.xlu0 %4508, %v4850_v16  }
  0x4f   :  { %657 = vperm.xlu1 %4507, %v4827_v11   ;;  %669 = vperm.xlu0 %4508, %v4872_v20  }
  0x53   :  { %665 = vperm.xlu1 %4507, %v4845_v15   ;;  %677 = vperm.xlu0 %4508, %v4894_v24  }
  0x57   :  { %673 = vperm.xlu1 %4507, %v4867_v19   ;;  %685 = vperm.xlu0 %4508, %v4916_v28  }
  0x5b   :  { %681 = vperm.xlu1 %4507, %v4889_v23   ;;  %693 = vperm.xlu0 %4508, %v4938_v32  }
  0x5f   :  { %689 = vperm.xlu1 %4507, %v4911_v27   ;;  %701 = vperm.xlu0 %4508, %v4960_v36  }
  0x63   :  { %697 = vperm.xlu1 %4507, %v4933_v31   ;;  %4509 = vset.pattern.permute.xlu0 %v4741_v49 }
  0x64   :  { %805 = vperm.xlu0 %4509, %v4804_v2  }
  0x67   :  { %705 = vperm.xlu1 %4507, %v4955_v35  }
  0x68   :  { %817 = vperm.xlu0 %4509, %v4827_v11  }
  0x6b   :  { %4510 = vset.pattern.permute.xlu1 %v4741_v49 }
  0x6c   :  { %809 = vperm.xlu1 %4510, %v4832_v12   ;;  %825 = vperm.xlu0 %4509, %v4845_v15  }
  0x70   :  { %813 = vperm.xlu1 %4510, %v4799_v1   ;;  %833 = vperm.xlu0 %4509, %v4867_v19  }
  0x74   :  { %821 = vperm.xlu1 %4510, %v4850_v16   ;;  %841 = vperm.xlu0 %4509, %v4889_v23  }
  0x78   :  { %829 = vperm.xlu1 %4510, %v4872_v20   ;;  %849 = vperm.xlu0 %4509, %v4911_v27  }
  0x7c   :  { %837 = vperm.xlu1 %4510, %v4894_v24   ;;  %857 = vperm.xlu0 %4509, %v4933_v31   ;;  %v5147_v31 = vrot.slane %v5024_v46, %v284_v29 }
  0x80   :  { %845 = vperm.xlu1 %4510, %v4916_v28   ;;  %865 = vperm.xlu0 %4509, %v4955_v35  }
  0x84   :  { %v5064_v53 = vpop.permute.xlu1 %384  ;;  %853 = vperm.xlu1 %4510, %v4938_v32   ;;  %v5067_v54 = vpop.permute.xlu0 %374  ;;  %v5150_v32 = vrot.slane %v5029_v47, %v284_v29 }
  0x88   :  { %v5069_v55 = vpop.permute.xlu1 %389  ;;  %861 = vperm.xlu1 %4510, %v4960_v36   ;;  %v5072_v56 = vpop.permute.xlu0 %379 }
  0x8c   :  { %v5074_v57 = vpop.permute.xlu1 %399  ;;  %v5076_v58 = vpop.permute.xlu0 %394 }
  0x8d   :  { %8739 = vst [vmem:[#allocation6_spill] sm:$0xff] %v5074_v57  ;;  %8740 = vst [vmem:[#allocation7_spill] sm:$0xff] %v5076_v58 }
  0x90   :  { %v5078_v59 = vpop.permute.xlu1 %409  ;;  %v5080_v60 = vpop.permute.xlu0 %404 }
  0x91   :  { %8741 = vst [vmem:[#allocation8_spill] sm:$0xff] %v5078_v59  ;;  %8742 = vst [vmem:[#allocation9_spill] sm:$0xff] %v5080_v60 }
  0x94   :  { %v5082_v61 = vpop.permute.xlu1 %419  ;;  %v5084_v62 = vpop.permute.xlu0 %414 }
  0x98   :  { %v5086_v63 = vpop.permute.xlu1 %429  ;;  %v5088_v0 = vpop.permute.xlu0 %424 }
  0x9c   :  { %v5090_v1 = vpop.permute.xlu1 %439  ;;  %v5092_v2 = vpop.permute.xlu0 %434 }
  0x9d   :  { %8743 = vst [vmem:[#allocation10_spill] sm:$0xff] %v5090_v1  ;;  %8744 = vst [vmem:[#allocation11_spill] sm:$0xff] %v5092_v2 }
  0xa0   :  { %v5094_v3 = vpop.permute.xlu1 %449  ;;  %v5096_v5 = vpop.permute.xlu0 %444 }
  0xa1   :  { %8745 = vst [vmem:[#allocation12_spill] sm:$0xff] %v5094_v3  ;;  %8746 = vst [vmem:[#allocation13_spill] sm:$0xff] %v5096_v5 }
  0xa5   :  { %v5098_v6 = vpop.permute.xlu1 %489  ;;  %v5100_v7 = vpop.permute.xlu0 %485 }
  0xa9   :  { %v5102_v8 = vpop.permute.xlu1 %493  ;;  %v5104_v9 = vpop.permute.xlu0 %497 }
  0xaa   :  { %8747 = vst [vmem:[#allocation14_spill] sm:$0xff] %v5104_v9 }
  0xad   :  { %v5106_v10 = vpop.permute.xlu1 %501  ;;  %v5108_v11 = vpop.permute.xlu0 %505 }
  0xae   :  { %8748 = vst [vmem:[#allocation15_spill] sm:$0xff] %v5106_v10  ;;  %8749 = vst [vmem:[#allocation16_spill] sm:$0xff] %v5108_v11 }
  0xb1   :  { %v5110_v12 = vpop.permute.xlu1 %509  ;;  %v5112_v13 = vpop.permute.xlu0 %513 }
  0xb2   :  { %8750 = vst [vmem:[#allocation17_spill] sm:$0xff] %v5110_v12  ;;  %8751 = vst [vmem:[#allocation18_spill] sm:$0xff] %v5112_v13 }
  0xb5   :  { %v5114_v14 = vpop.permute.xlu1 %517  ;;  %v5116_v15 = vpop.permute.xlu0 %521 }
  0xb9   :  { %v5118_v16 = vpop.permute.xlu1 %525  ;;  %v5122_v18 = vpop.permute.xlu0 %529 }
  0xba   :  { %8752 = vst [vmem:[#allocation19_spill] sm:$0xff] %v5118_v16  ;;  %8754 = vst [vmem:[#allocation21_spill] sm:$0xff] %v5122_v18 }
  0xbd   :  { %v5120_v17 = vpop.permute.xlu1 %533  ;;  %v5126_v20 = vpop.permute.xlu0 %537 }
  0xbe   :  { %8753 = vst [vmem:[#allocation20_spill] sm:$0xff] %v5120_v17  ;;  %8756 = vst [vmem:[#allocation23_spill] sm:$0xff] %v5126_v20 }
  0xc1   :  { %v5124_v19 = vpop.permute.xlu1 %541  ;;  %v5128_v22 = vpop.permute.xlu0 %545 }
  0xc2   :  { %8755 = vst [vmem:[#allocation22_spill] sm:$0xff] %v5124_v19  ;;  %8757 = vst [vmem:[#allocation24_spill] sm:$0xff] %v5128_v22 }
  0xc6   :  { %v646_v21 = vpop.permute.xlu1 %645  ;;  %v5134_v25 = vpop.permute.xlu0 %649 }
  0xca   :  { %v5130_v23 = vpop.permute.xlu1 %653  ;;  %v5138_v27 = vpop.permute.xlu0 %661 }
  0xcb   :  { %8760 = vst [vmem:[#allocation27_spill] sm:$0xff] %v5138_v27 }
  0xce   :  { %v5132_v24 = vpop.permute.xlu1 %657  ;;  %v5155_v34 = vpop.permute.xlu0 %669 }
  0xcf   :  { %8758 = vst [vmem:[#allocation25_spill] sm:$0xff] %v5132_v24  ;;  %8762 = vst [vmem:[#allocation29_spill] sm:$0xff] %v5155_v34 }
  0xd2   :  { %v5136_v26 = vpop.permute.xlu1 %665  ;;  %v678_v49 = vpop.permute.xlu0 %677 }
  0xd3   :  { %8759 = vst [vmem:[#allocation26_spill] sm:$0xff] %v5136_v26 }
  0xd6   :  { %v5140_v28 = vpop.permute.xlu1 %673  ;;  %v5242_v19 = vpop.permute.xlu0 %685 }
  0xd7   :  { %8761 = vst [vmem:[#allocation28_spill] sm:$0xff] %v5140_v28 }
  0xda   :  { %v5157_v35 = vpop.permute.xlu1 %681  ;;  %v5311_v20 = vpop.permute.xlu0 %693 }
  0xdb   :  { %8795 = vst [vmem:[#allocation62_spill] sm:$0xff] %v5311_v20 }
  0xde   :  { %v185_v36 = vpop.f32.mrb[0].mxu0  ;;  %v233_v38 = vpop.f32.mrb[0].mxu1 }
  0xdf   :  { %v5162_v39 = vadd.f32 %v5147_v31, %v185_v36  ;;  %v5165_v40 = vadd.f32 %v5150_v32, %v185_v36  ;;  %v5168_v41 = vadd.f32 %v5153_v33, %v185_v36  ;;  %v5171_v42 = vadd.f32 %v5147_v31, %v233_v38  ;;  %v187_v46 = vpop.f32.mrb[1].mxu0  ;;  %v235_v47 = vpop.f32.mrb[1].mxu1 }
  0xe0   :  { %v5174_v43 = vadd.f32 %v5150_v32, %v233_v38  ;;  %v5177_v44 = vadd.f32 %v5153_v33, %v233_v38  ;;  %v292_v29 = vadd.f32 %v5159_v37, %v185_v36  ;;  %v5183_v4 = vpop.permute.xlu1 %689  ;;  %v5199_v45 = vadd.f32 %v5039_v50, %v235_v47  ;;  %v5367_v18 = vpop.permute.xlu0 %701 }
  0xe1   :  { %8763 = vst [vmem:[#allocation30_spill] sm:$0xff] %v5162_v39  ;;  %8764 = vst [vmem:[#allocation31_spill] sm:$0xff] %v5165_v40  ;;  %v5189_v40 = vadd.f32 %v5043_v51, %v187_v46  ;;  %v5202_v30 = vadd.f32 %v5043_v51, %v235_v47  ;;  %v5205_v36 = vadd.f32 %v5048_v52, %v235_v47 }
  0xe2   :  { %8765 = vst [vmem:[#allocation32_spill] sm:$0xff] %v5168_v41  ;;  %8766 = vst [vmem:[#allocation33_spill] sm:$0xff] %v5171_v42  ;;  %v5186_v41 = vadd.f32 %v5039_v50, %v187_v46  ;;  %v5196_v42 = vpop.f32.mrb[2].mxu1  ;;  %v5224_v28 = vand.u32 2147483647, %v292_v29  ;;  %v308_v29 = vadd.f32 %v5159_v37, %v233_v38 }
  0xe3   :  { %8767 = vst [vmem:[#allocation34_spill] sm:$0xff] %v5174_v43  ;;  %8768 = vst [vmem:[#allocation35_spill] sm:$0xff] %v5177_v44  ;;  %v5192_v43 = vadd.f32 %v5048_v52, %v187_v46  ;;  %v5194_v44 = vpop.f32.mrb[2].mxu0  ;;  %v5222_v39 = vpop.f32.mrb[3].mxu1 }
  0xe4   :  { %8769 = vst [vmem:[#allocation36_spill] sm:$0xff] %v5183_v4  ;;  %8770 = vst [vmem:[#allocation37_spill] sm:$0xff] %v5186_v41  ;;  %v5208_v41 = vadd.f32 %v5180_v48, %v187_v46  ;;  %v5228_v46 = vadd.f32 %v5147_v31, %v5196_v42  ;;  %v5245_v22 = vpop.permute.xlu1 %697  ;;  %v5250_v12 = vadd.f32 %v5039_v50, %v5222_v39 }
  0xe5   :  { %8771 = vst [vmem:[#allocation38_spill] sm:$0xff] %v5189_v40  ;;  %8772 = vst [vmem:[#allocation39_spill] sm:$0xff] %v5192_v43  ;;  %v5212_v40 = vadd.f32 %v5147_v31, %v5194_v44  ;;  %v5216_v43 = vadd.f32 %v5150_v32, %v5194_v44  ;;  %v708_v13 = vmul.f32 %v646_v21, %v5224_v28 }
  0xe6   :  { %8773 = vst [vmem:[#allocation40_spill] sm:$0xff] %v5199_v45  ;;  %8774 = vst [vmem:[#allocation41_spill] sm:$0xff] %v5202_v30  ;;  %v5220_v45 = vadd.f32 %v5153_v33, %v5194_v44  ;;  %v193_v30 = vpop.f32.mrb[3].mxu0  ;;  %v5278_v21 = vadd.f32 %v5180_v48, %v235_v47  ;;  %v548_v16 = vmul.f32 %v5100_v7, %v5224_v28 }
  0xe7   :  { %8775 = vst [vmem:[#allocation42_spill] sm:$0xff] %v5205_v36  ;;  %8776 = vst [vmem:[#allocation43_spill] sm:$0xff] %v5212_v40  ;;  %v5232_v36 = vadd.f32 %v5150_v32, %v5196_v42  ;;  %v5238_v40 = vpop.f32.mrb[4].mxu0  ;;  %740 = vrot.lane.b32.xlu0 %v708_v13, %s4743_s24 }
  0xe8   :  { %8777 = vst [vmem:[#allocation44_spill] sm:$0xff] %v5216_v43  ;;  %8778 = vst [vmem:[#allocation45_spill] sm:$0xff] %v5220_v45  ;;  %v5236_v43 = vadd.f32 %v5153_v33, %v5196_v42  ;;  %v5240_v45 = vpop.f32.mrb[4].mxu1  ;;  %v5263_v38 = vpop.f32.mrb[5].mxu0 }
  0xe9   :  { %8779 = vst [vmem:[#allocation46_spill] sm:$0xff] %v5228_v46  ;;  %8780 = vst [vmem:[#allocation47_spill] sm:$0xff] %v5232_v36  ;;  %v340_v46 = vand.u32 2147483647, %v5208_v41  ;;  %v5254_v36 = vadd.f32 %v5043_v51, %v5222_v39  ;;  %v5261_v26 = vpop.f32.mrb[5].mxu1  ;;  %v5297_v47 = vadd.f32 %v5147_v31, %v5240_v45  ;;  %v5301_v13 = vadd.f32 %v5150_v32, %v5240_v45 }
  0xea   :  { %8781 = vst [vmem:[#allocation48_spill] sm:$0xff] %v5236_v43  ;;  %8782 = vst [vmem:[#allocation49_spill] sm:$0xff] %v5245_v22  ;;  %v5258_v43 = vadd.f32 %v5048_v52, %v5222_v39  ;;  %v5267_v22 = vadd.f32 %v5039_v50, %v193_v30  ;;  %v5275_v34 = vpop.f32.mrb[6].mxu0 }
  0xeb   :  { %8783 = vst [vmem:[#allocation50_spill] sm:$0xff] %v5250_v12  ;;  %8784 = vst [vmem:[#allocation51_spill] sm:$0xff] %v5254_v36  ;;  %1076 = vrot.lane.b32.xlu1 %v340_v46, %s4742_s3  ;;  %v5270_v12 = vadd.f32 %v5043_v51, %v193_v30  ;;  %v5273_v36 = vadd.f32 %v5048_v52, %v193_v30  ;;  %v5283_v46 = vadd.f32 %v5147_v31, %v5238_v40 }
  0xec   :  { %8785 = vst [vmem:[#allocation52_spill] sm:$0xff] %v5258_v43  ;;  %8786 = vst [vmem:[#allocation53_spill] sm:$0xff] %v5267_v22  ;;  %v251_v43 = vpop.f32.mrb[6].mxu1  ;;  %v5287_v22 = vadd.f32 %v5150_v32, %v5238_v40 }
  0xed   :  { %8787 = vst [vmem:[#allocation54_spill] sm:$0xff] %v5270_v12  ;;  %8788 = vst [vmem:[#allocation55_spill] sm:$0xff] %v5273_v36  ;;  %v5291_v36 = vadd.f32 %v5153_v33, %v5238_v40  ;;  %v5293_v12 = vand.u32 2147483647, %v308_v29  ;;  %v5307_v17 = vpop.f32.mrb[7].mxu1  ;;  %v5313_v29 = vpop.permute.xlu1 %705 }
  0xee   :  { %8789 = vst [vmem:[#allocation56_spill] sm:$0xff] %v5283_v46  ;;  %8790 = vst [vmem:[#allocation57_spill] sm:$0xff] %v5287_v22  ;;  %v5305_v46 = vadd.f32 %v5153_v33, %v5240_v45  ;;  %v5309_v22 = vpop.f32.mrb[7].mxu0  ;;  %v257_v11 = vpop.f32.mrb[8].mxu1 }
  0xef   :  { %8791 = vst [vmem:[#allocation58_spill] sm:$0xff] %v5291_v36  ;;  %8792 = vst [vmem:[#allocation59_spill] sm:$0xff] %v5297_v47  ;;  %v5317_v36 = vadd.f32 %v5039_v50, %v5261_v26  ;;  %v348_v47 = vand.u32 2147483647, %v5278_v21  ;;  %v209_v10 = vpop.f32.mrb[8].mxu0  ;;  %v716_v20 = vmul.f32 %v678_v49, %v5293_v12  ;;  %v5348_v49 = vadd.f32 %v5150_v32, %v5275_v34  ;;  %v259_v4 = vpop.f32.mrb[9].mxu1 }
  0xf0   :  { %8793 = vst [vmem:[#allocation60_spill] sm:$0xff] %v5301_v13  ;;  %8794 = vst [vmem:[#allocation61_spill] sm:$0xff] %v5305_v46  ;;  %v5322_v13 = vadd.f32 %v5043_v51, %v5261_v26  ;;  %v5326_v46 = vadd.f32 %v5048_v52, %v5261_v26  ;;  %v5398_v5 = vadd.f32 %v5039_v50, %v5309_v22 }
  0xf1   :  { %8796 = vst [vmem:[#allocation63_spill] sm:$0xff] %v5313_v29  ;;  %8797 = vst [vmem:[#allocation64_spill] sm:$0xff] %v5317_v36  ;;  %v5331_v29 = vadd.f32 %v5039_v50, %v5263_v38  ;;  %v5335_v36 = vadd.f32 %v5043_v51, %v5263_v38  ;;  %1092 = vrot.lane.b32.xlu1 %v348_v47, %s4742_s3  ;;  %756 = vrot.lane.b32.xlu0 %v716_v20, %s4743_s24 }
  0xf2   :  { %8798 = vst [vmem:[#allocation65_spill] sm:$0xff] %v5322_v13  ;;  %8799 = vst [vmem:[#allocation66_spill] sm:$0xff] %v5326_v46  ;;  %v5340_v13 = vadd.f32 %v5048_v52, %v5263_v38  ;;  %v5344_v46 = vadd.f32 %v5147_v31, %v5275_v34  ;;  %v5356_v47 = vadd.f32 %v5159_v37, %v251_v43  ;;  %v263_v24 = vpop.f32.mrb[10].mxu1 }
  0xf3   :  { %8800 = vst [vmem:[#allocation67_spill] sm:$0xff] %v5331_v29  ;;  %8801 = vst [vmem:[#allocation68_spill] sm:$0xff] %v5335_v36  ;;  %v211_v29 = vpop.f32.mrb[9].mxu0  ;;  %v5353_v36 = vadd.f32 %v5153_v33, %v5275_v34  ;;  %v5370_v20 = vadd.f32 %v5180_v48, %v193_v30  ;;  %v265_v9 = vpop.f32.mrb[11].mxu1  ;;  %v5388_v30 = vadd.f32 %v5048_v52, %v5307_v17 }
  0xf4   :  { %8802 = vst [vmem:[#allocation69_spill] sm:$0xff] %v5340_v13  ;;  %8803 = vst [vmem:[#allocation70_spill] sm:$0xff] %v5344_v46  ;;  %v5359_v13 = vadd.f32 %v5147_v31, %v251_v43  ;;  %v5362_v46 = vadd.f32 %v5150_v32, %v251_v43  ;;  %v215_v27 = vpop.f32.mrb[10].mxu0  ;;  %v5417_v60 = vadd.f32 %v5147_v31, %v209_v10 }
  0xf5   :  { %8804 = vst [vmem:[#allocation71_spill] sm:$0xff] %v5348_v49  ;;  %8805 = vst [vmem:[#allocation72_spill] sm:$0xff] %v5353_v36  ;;  %v5365_v49 = vadd.f32 %v5153_v33, %v251_v43  ;;  %v5372_v36 = vpop.permute.xlu1 %809  ;;  %v5384_v43 = vadd.f32 %v5043_v51, %v5307_v17  ;;  %580 = vrot.lane.b32.xlu1 %v548_v16, %s4742_s3  ;;  %v5414_v16 = vadd.f32 %v5159_v37, %v209_v10 }
  0xf6   :  { %8806 = vst [vmem:[#allocation73_spill] sm:$0xff] %v5359_v13  ;;  %8807 = vst [vmem:[#allocation74_spill] sm:$0xff] %v5362_v46  ;;  %v5376_v13 = vpop.f32.mrb[11].mxu0  ;;  %v5380_v46 = vadd.f32 %v5039_v50, %v5307_v17  ;;  %v5393_v7 = vpop.f32.mrb[12].mxu1  ;;  %v5429_v59 = vadd.f32 %v5147_v31, %v257_v11  ;;  %v5435_v2 = vadd.f32 %v5153_v33, %v257_v11 }
  0xf7   :  { %8808 = vst [vmem:[#allocation75_spill] sm:$0xff] %v5365_v49  ;;  %8809 = vst [vmem:[#allocation76_spill] sm:$0xff] %v5367_v18  ;;  %v341_v49 = vand.u32 2147483647, %v5370_v20  ;;  %v5391_v18 = vpop.f32.mrb[12].mxu0 }
  0xf8   :  { %8810 = vst [vmem:[#allocation77_spill] sm:$0xff] %v5380_v46  ;;  %8811 = vst [vmem:[#allocation78_spill] sm:$0xff] %v5384_v43  ;;  %v5402_v46 = vadd.f32 %v5043_v51, %v5309_v22  ;;  %v5406_v43 = vadd.f32 %v5048_v52, %v5309_v22  ;;  %v5410_v3 = vpop.f32.mrb[13].mxu0 }
  0xf9   :  { %8812 = vst [vmem:[#allocation79_spill] sm:$0xff] %v5388_v30  ;;  %8813 = vst [vmem:[#allocation80_spill] sm:$0xff] %v5398_v5  ;;  %v5408_v30 = vpop.f32.mrb[13].mxu1  ;;  %1078 = vrot.lane.b32.xlu0 %v341_v49, %s4742_s3  ;;  %v5420_v5 = vadd.f32 %v5150_v32, %v209_v10  ;;  %v5432_v49 = vadd.f32 %v5150_v32, %v257_v11  ;;  %v5441_v58 = vpop.permute.xlu1 %813 }
  0xfa   :  { %8814 = vst [vmem:[#allocation81_spill] sm:$0xff] %v5402_v46  ;;  %8815 = vst [vmem:[#allocation82_spill] sm:$0xff] %v5406_v43  ;;  %v5423_v46 = vadd.f32 %v5153_v33, %v209_v10  ;;  %v5426_v43 = vadd.f32 %v5159_v37, %v257_v11  ;;  %v5437_v1 = vpop.f32.mrb[14].mxu0  ;;  %v5445_v10 = vadd.f32 %v5180_v48, %v5222_v39 }
  0xfb   :  { %8816 = vst [vmem:[#allocation83_spill] sm:$0xff] %v5417_v60  ;;  %8817 = vst [vmem:[#allocation84_spill] sm:$0xff] %v5420_v5  ;;  %v5439_v60 = vpop.f32.mrb[14].mxu1  ;;  %v806_v5 = vpop.permute.xlu0 %805  ;;  %v5463_v39 = vadd.f32 %v5048_v52, %v259_v4 }
  0xfc   :  { %8818 = vst [vmem:[#allocation85_spill] sm:$0xff] %v5423_v46  ;;  %8819 = vst [vmem:[#allocation86_spill] sm:$0xff] %v5429_v59  ;;  %v556_v46 = vmul.f32 %v5114_v14, %v5293_v12  ;;  %v868_v11 = vmul.f32 %v806_v5, %v5224_v28  ;;  %v5456_v59 = vadd.f32 %v5039_v50, %v259_v4  ;;  %v349_v14 = vand.u32 2147483647, %v5445_v10  ;;  %v5469_v5 = vpop.f32.mrb[15].mxu0  ;;  %v5471_v57 = vpop.f32.mrb[15].mxu1 }
  0xfd   :  { %8820 = vst [vmem:[#allocation87_spill] sm:$0xff] %v5432_v49  ;;  %8821 = vst [vmem:[#allocation88_spill] sm:$0xff] %v5435_v2  ;;  %v294_v49 = vadd.f32 %v5159_v37, %v5194_v44  ;;  %v5453_v2 = vadd.f32 %v5180_v48, %v259_v4  ;;  %v5467_v44 = vadd.f32 %v5180_v48, %v211_v29 }
  0xfe   :  { %8822 = vst [vmem:[#allocation89_spill] sm:$0xff] %v5441_v58  ;;  %8824 = vst [vmem:[#allocation91_spill] sm:$0xff] %v5456_v59  ;;  %596 = vrot.lane.b32.xlu1 %v556_v46, %s4742_s3  ;;  %v5460_v58 = vadd.f32 %v5043_v51, %v259_v4  ;;  %v5477_v46 = vadd.f32 %v5043_v51, %v211_v29  ;;  %v5483_v4 = vadd.f32 %v5159_v37, %v215_v27 }
  0xff   :  { %8823 = vst [vmem:[#allocation90_spill] sm:$0xff] %v5453_v2  ;;  %8826 = vst [vmem:[#allocation93_spill] sm:$0xff] %v5463_v39  ;;  %v5474_v2 = vadd.f32 %v5039_v50, %v211_v29  ;;  %1094 = vrot.lane.b32.xlu0 %v349_v14, %s4742_s3  ;;  %v5487_v39 = vadd.f32 %v5147_v31, %v215_v27  ;;  %v5490_v59 = vadd.f32 %v5150_v32, %v215_v27 }
 0x100   :  { %8825 = vst [vmem:[#allocation92_spill] sm:$0xff] %v5460_v58  ;;  %8827 = vst [vmem:[#allocation94_spill] sm:$0xff] %v5467_v44  ;;  %v5480_v58 = vadd.f32 %v5048_v52, %v211_v29  ;;  %v5493_v44 = vadd.f32 %v5153_v33, %v215_v27  ;;  %v5500_v29 = vpop.permute.xlu0 %817  ;;  %v5506_v14 = vadd.f32 %v5150_v32, %v263_v24 }
 0x101   :  { %8828 = vst [vmem:[#allocation95_spill] sm:$0xff] %v5474_v2  ;;  %8829 = vst [vmem:[#allocation96_spill] sm:$0xff] %v5477_v46  ;;  %v5496_v2 = vadd.f32 %v5159_v37, %v263_v24  ;;  %v5498_v46 = vand.u32 2147483647, %v294_v49  ;;  %v310_v27 = vadd.f32 %v5159_v37, %v5196_v42  ;;  %v5517_v49 = vadd.f32 %v5180_v48, %v265_v9 }
 0x102   :  { %8830 = vst [vmem:[#allocation97_spill] sm:$0xff] %v5480_v58  ;;  %8831 = vst [vmem:[#allocation98_spill] sm:$0xff] %v5487_v39  ;;  %v5503_v58 = vadd.f32 %v5147_v31, %v263_v24  ;;  %v5509_v39 = vadd.f32 %v5153_v33, %v263_v24  ;;  %900 = vrot.lane.b32.xlu1 %v868_v11, %s4744_s25  ;;  %v5526_v24 = vadd.f32 %v5048_v52, %v265_v9 }
 0x103   :  { %8832 = vst [vmem:[#allocation99_spill] sm:$0xff] %v5490_v59  ;;  %8833 = vst [vmem:[#allocation100_spill] sm:$0xff] %v5493_v44  ;;  %v5511_v59 = vpop.permute.xlu1 %821  ;;  %v5520_v44 = vadd.f32 %v5039_v50, %v265_v9  ;;  %v5532_v11 = vadd.f32 %v5180_v48, %v5376_v13  ;;  %v5536_v42 = vadd.f32 %v5039_v50, %v5376_v13 }
 0x104   :  { %8834 = vst [vmem:[#allocation101_spill] sm:$0xff] %v5503_v58  ;;  %8835 = vst [vmem:[#allocation102_spill] sm:$0xff] %v5506_v14  ;;  %v5523_v58 = vadd.f32 %v5043_v51, %v265_v9  ;;  %v5540_v14 = vadd.f32 %v5043_v51, %v5376_v13  ;;  %v5548_v9 = vadd.f32 %v5159_v37, %v5391_v18 }
 0x105   :  { %8836 = vst [vmem:[#allocation103_spill] sm:$0xff] %v5509_v39  ;;  %8837 = vst [vmem:[#allocation104_spill] sm:$0xff] %v5520_v44  ;;  %v549_v39 = vmul.f32 %v5098_v6, %v5498_v46  ;;  %v5552_v6 = vadd.f32 %v5147_v31, %v5391_v18  ;;  %v5559_v44 = vadd.f32 %v5150_v32, %v5391_v18 }
 0x106   :  { %8838 = vst [vmem:[#allocation105_spill] sm:$0xff] %v5523_v58  ;;  %8839 = vst [vmem:[#allocation106_spill] sm:$0xff] %v5526_v24  ;;  %v5544_v58 = vadd.f32 %v5048_v52, %v5376_v13  ;;  %v5554_v24 = vpop.permute.xlu0 %825  ;;  %v5563_v13 = vadd.f32 %v5153_v33, %v5391_v18  ;;  %v5583_v18 = vadd.f32 %v5153_v33, %v5393_v7 }
 0x107   :  { %8840 = vst [vmem:[#allocation107_spill] sm:$0xff] %v5536_v42  ;;  %8841 = vst [vmem:[#allocation108_spill] sm:$0xff] %v5540_v14  ;;  %582 = vrot.lane.b32.xlu0 %v549_v39, %s4742_s3  ;;  %v5571_v14 = vadd.f32 %v5147_v31, %v5393_v7  ;;  %v5573_v42 = vpop.permute.xlu1 %829  ;;  %v5579_v39 = vadd.f32 %v5150_v32, %v5393_v7 }
 0x108   :  { %8842 = vst [vmem:[#allocation109_spill] sm:$0xff] %v5544_v58  ;;  %8843 = vst [vmem:[#allocation110_spill] sm:$0xff] %v5552_v6  ;;  %v5567_v58 = vadd.f32 %v5159_v37, %v5393_v7  ;;  %v5575_v6 = vand.u32 2147483647, %v310_v27  ;;  %v5595_v27 = vadd.f32 %v5043_v51, %v5408_v30 }
 0x109   :  { %8844 = vst [vmem:[#allocation111_spill] sm:$0xff] %v5559_v44  ;;  %8845 = vst [vmem:[#allocation112_spill] sm:$0xff] %v5563_v13  ;;  %v5587_v13 = vadd.f32 %v5180_v48, %v5408_v30  ;;  %v5591_v44 = vadd.f32 %v5039_v50, %v5408_v30 }
 0x10a   :  { %8846 = vst [vmem:[#allocation113_spill] sm:$0xff] %v5571_v14  ;;  %8847 = vst [vmem:[#allocation114_spill] sm:$0xff] %v5573_v42  ;;  %v5599_v14 = vadd.f32 %v5048_v52, %v5408_v30  ;;  %v557_v7 = vmul.f32 %v5116_v15, %v5575_v6  ;;  %v5619_v30 = vadd.f32 %v5048_v52, %v5410_v3 }
 0x10b   :  { %8848 = vst [vmem:[#allocation115_spill] sm:$0xff] %v5579_v39  ;;  %8849 = vst [vmem:[#allocation116_spill] sm:$0xff] %v5583_v18  ;;  %v5605_v18 = vadd.f32 %v5180_v48, %v5410_v3  ;;  %v5609_v39 = vadd.f32 %v5039_v50, %v5410_v3  ;;  %v306_v15 = vadd.f32 %v5159_v37, %v5437_v1  ;;  %v838_v42 = vpop.permute.xlu1 %837 }
 0x10c   :  { %8850 = vst [vmem:[#allocation117_spill] sm:$0xff] %v5591_v44  ;;  %8851 = vst [vmem:[#allocation118_spill] sm:$0xff] %v5595_v27  ;;  %v5613_v44 = vadd.f32 %v5043_v51, %v5410_v3  ;;  %v5615_v27 = vpop.permute.xlu0 %833  ;;  %598 = vrot.lane.b32.xlu0 %v557_v7, %s4742_s3  ;;  %v322_v3 = vadd.f32 %v5159_v37, %v5439_v60  ;;  %v296_v7 = vadd.f32 %v5159_v37, %v5238_v40 }
 0x10d   :  { %8852 = vst [vmem:[#allocation119_spill] sm:$0xff] %v5599_v14  ;;  %8853 = vst [vmem:[#allocation120_spill] sm:$0xff] %v5609_v39  ;;  %v5625_v14 = vadd.f32 %v5147_v31, %v5437_v1  ;;  %v5629_v39 = vadd.f32 %v5150_v32, %v5437_v1  ;;  %v5674_v40 = vadd.f32 %v5180_v48, %v5471_v57 }
 0x10e   :  { %8854 = vst [vmem:[#allocation121_spill] sm:$0xff] %v5613_v44  ;;  %8855 = vst [vmem:[#allocation122_spill] sm:$0xff] %v5619_v30  ;;  %v5634_v44 = vadd.f32 %v5153_v33, %v5437_v1  ;;  %v5640_v30 = vadd.f32 %v5147_v31, %v5439_v60  ;;  %v869_v1 = vmul.f32 %v5372_v36, %v5498_v46 }
 0x10f   :  { %8856 = vst [vmem:[#allocation123_spill] sm:$0xff] %v5625_v14  ;;  %8857 = vst [vmem:[#allocation124_spill] sm:$0xff] %v5629_v39  ;;  %v5644_v14 = vadd.f32 %v5150_v32, %v5439_v60  ;;  %v5648_v39 = vadd.f32 %v5153_v33, %v5439_v60  ;;  %v5657_v31 = vadd.f32 %v5180_v48, %v5469_v5 }
 0x110   :  { %8858 = vst [vmem:[#allocation125_spill] sm:$0xff] %v5634_v44  ;;  %8859 = vst [vmem:[#allocation126_spill] sm:$0xff] %v5640_v30  ;;  %v876_v44 = vmul.f32 %v838_v42, %v5293_v12  ;;  %902 = vrot.lane.b32.xlu0 %v869_v1, %s4744_s25  ;;  %v5662_v32 = vadd.f32 %v5039_v50, %v5469_v5  ;;  %v5666_v60 = vadd.f32 %v5043_v51, %v5469_v5  ;;  %v842_v36 = vpop.permute.xlu0 %841 }
 0x111   :  { %8860 = vst [vmem:[#allocation127_spill] sm:$0xff] %v5644_v14  ;;  %8861 = vst [vmem:[#allocation128_spill] sm:$0xff] %v5648_v39  ;;  %v5670_v33 = vadd.f32 %v5048_v52, %v5469_v5  ;;  %v5678_v42 = vadd.f32 %v5039_v50, %v5471_v57  ;;  %v5682_v1 = vadd.f32 %v5043_v51, %v5471_v57  ;;  %v5689_v5 = vand.u32 2147483647, %v296_v7 }
 0x112   :  { %8862 = vst [vmem:[#allocation129_spill] sm:$0xff] %v5662_v32  ;;  %8863 = vst [vmem:[#allocation130_spill] sm:$0xff] %v5666_v60  ;;  %v5686_v39 = vadd.f32 %v5048_v52, %v5471_v57  ;;  %916 = vrot.lane.b32.xlu1 %v876_v44, %s4744_s25  ;;  %v877_v60 = vmul.f32 %v842_v36, %v5575_v6  ;;  %v709_v50 = vmul.f32 %v5134_v25, %v5498_v46 }
 0x113   :  { %8864 = vst [vmem:[#allocation131_spill] sm:$0xff] %v5670_v33  ;;  %8865 = vst [vmem:[#allocation132_spill] sm:$0xff] %v5678_v42  ;;  %v312_v33 = vadd.f32 %v5159_v37, %v5240_v45  ;;  %v298_v52 = vadd.f32 %v5159_v37, %v5275_v34  ;;  %v710_v57 = vmul.f32 %v5130_v23, %v5689_v5  ;;  %v5722_v37 = vand.u32 2147483647, %v5356_v47 }
 0x114   :  { %8866 = vst [vmem:[#allocation133_spill] sm:$0xff] %v5682_v1  ;;  %8867 = vst [vmem:[#allocation134_spill] sm:$0xff] %v5686_v39  ;;  %918 = vrot.lane.b32.xlu0 %v877_v60, %s4744_s25  ;;  %v5706_v45 = vadd.f32 %v5180_v48, %v5263_v38  ;;  %v717_v44 = vmul.f32 %v5157_v35, %v5575_v6  ;;  %v5715_v7 = vadd.f32 %v5180_v48, %v5309_v22 }
 0x115   :  { %v5697_v51 = vand.u32 2147483647, %v312_v33  ;;  %v5711_v25 = vand.u32 2147483647, %v298_v52  ;;  %v5725_v38 = vand.u32 2147483647, %v5414_v16  ;;  %v5732_v22 = vadd.f32 %v5180_v48, %v5261_v26 }
 0x116   :  { %742 = vrot.lane.b32.xlu1 %v709_v50, %s4743_s24  ;;  %v342_v34 = vand.u32 2147483647, %v5706_v45  ;;  %v5728_v35 = vand.u32 2147483647, %v5426_v43  ;;  %v5735_v60 = vand.u32 2147483647, %v5483_v4  ;;  %v5744_v16 = vadd.f32 %v5180_v48, %v5307_v17 }
 0x117   :  { %v718_v23 = vmul.f32 %v5242_v19, %v5697_v51  ;;  %v5738_v19 = vand.u32 2147483647, %v5496_v2  ;;  %v343_v47 = vand.u32 2147483647, %v5715_v7  ;;  %v5747_v43 = vand.u32 2147483647, %v5548_v9 }
 0x118   :  { %744 = vrot.lane.b32.xlu0 %v710_v57, %s4743_s24  ;;  %v5750_v26 = vand.u32 2147483647, %v5567_v58  ;;  %v5752_v33 = vand.u32 2147483647, %v306_v15  ;;  %v5754_v4 = vand.u32 2147483647, %v322_v3  ;;  %v452_v36 = vmul.f32 %v5067_v54, %v5224_v28 }
 0x119   :  { %v350_v2 = vand.u32 2147483647, %v5732_v22  ;;  %v460_v17 = vmul.f32 %v5084_v62, %v5293_v12  ;;  %v351_v48 = vand.u32 2147483647, %v5744_v16  ;;  %v550_v58 = vmul.f32 %v5102_v8, %v5689_v5  ;;  %v8869_v50 = vld [vmem:[#allocation7_spill] sm:$0xff] }
 0x11a   :  { %758 = vrot.lane.b32.xlu1 %v717_v44, %s4743_s24  ;;  %v453_v9 = vmul.f32 %v5072_v56, %v5498_v46  ;;  %v461_v15 = vmul.f32 %v5082_v61, %v5575_v6  ;;  %v5771_v3 = vadd.f32 %v452_v36, %v5208_v41  ;;  %v454_v62 = vmul.f32 %v5064_v53, %v5689_v5 }
 0x11b   :  { %v5774_v54 = vadd.f32 %v460_v17, %v5278_v21  ;;  %v455_v8 = vmul.f32 %v5069_v55, %v5711_v25  ;;  %v462_v61 = vmul.f32 %v5088_v0, %v5697_v51  ;;  %v463_v28 = vmul.f32 %v5086_v63, %v5722_v37  ;;  %v8868_v55 = vld [vmem:[#allocation6_spill] sm:$0xff]  ;;  %v8873_v17 = vld [vmem:[#allocation8_spill] sm:$0xff] }
 0x11c   :  { %760 = vrot.lane.b32.xlu0 %v718_v23, %s4743_s24  ;;  %v5781_v12 = vadd.f32 %v453_v9, %v5370_v20  ;;  %v5784_v56 = vadd.f32 %v461_v15, %v5445_v10  ;;  %v5792_v46 = vadd.f32 %v454_v62, %v5706_v45  ;;  %v457_v6 = vmul.f32 %v8868_v55, %v5735_v60  ;;  %v8870_v63 = vld [vmem:[#allocation10_spill] sm:$0xff]  ;;  %v8871_v23 = vld [vmem:[#allocation11_spill] sm:$0xff]  ;;  %v8874_v15 = vld [vmem:[#allocation9_spill] sm:$0xff] }
 0x11d   :  { %v5795_v53 = vadd.f32 %v455_v8, %v5715_v7  ;;  %v456_v52 = vmul.f32 %v8869_v50, %v5725_v38  ;;  %v5802_v57 = vadd.f32 %v462_v61, %v5732_v22  ;;  %v5805_v0 = vadd.f32 %v463_v28, %v5744_v16  ;;  %v8875_v61 = vld [vmem:[#allocation90_spill] sm:$0xff] }
 0x11e   :  { %1080 = vrot.lane.b32.xlu1 %v342_v34, %s4742_s3  ;;  %v465_v44 = vmul.f32 %v8870_v63, %v5738_v19  ;;  %v464_v34 = vmul.f32 %v8871_v23, %v5728_v35  ;;  %v459_v9 = vmul.f32 %v8873_v17, %v5752_v33  ;;  %v458_v62 = vmul.f32 %v8874_v15, %v5747_v43  ;;  %v8882_v15 = vld [vmem:[#allocation19_spill] sm:$0xff] }
 0x120   :  { %1082 = vrot.lane.b32.xlu0 %v343_v47, %s4742_s3  ;;  %v5813_v47 = vadd.f32 %v457_v6, %v5532_v11  ;;  %v5823_v8 = vadd.f32 %v465_v44, %v5517_v49  ;;  %v5826_v28 = vadd.f32 %v464_v34, %v8875_v61  ;;  %v8877_v6 = vld [vmem:[#allocation13_spill] sm:$0xff]  ;;  %v5836_v23 = vadd.f32 %v459_v9, %v5657_v31 }
 0x121   :  { %v466_v50 = vmul.f32 %v8877_v6, %v5750_v26  ;;  %v5839_v44 = vadd.f32 %v458_v62, %v5605_v18  ;;  %v8884_v6 = vld [vmem:[#allocation89_spill] sm:$0xff] }
 0x122   :  { %1096 = vrot.lane.b32.xlu1 %v350_v2, %s4742_s3  ;;  %v8872_v2 = vld [vmem:[#allocation94_spill] sm:$0xff]  ;;  %8879 = vst [vmem:[#allocation6_spill] sm:$0xff] %v5836_v23  ;;  %v870_v62 = vmul.f32 %v8884_v6, %v5689_v5  ;;  %v8885_v5 = vld [vmem:[#allocation25_spill] sm:$0xff] }
 0x123   :  { %v5816_v36 = vadd.f32 %v456_v52, %v8872_v2  ;;  %v8878_v52 = vld [vmem:[#allocation14_spill] sm:$0xff]  ;;  %v5845_v17 = vadd.f32 %v466_v50, %v5587_v13  ;;  %v871_v50 = vmul.f32 %v5500_v29, %v5711_v25  ;;  %v8887_v29 = vld [vmem:[#allocation36_spill] sm:$0xff] }
 0x124   :  { %1098 = vrot.lane.b32.xlu0 %v351_v48, %s4742_s3  ;;  %v8876_v48 = vld [vmem:[#allocation12_spill] sm:$0xff]  ;;  %v551_v63 = vmul.f32 %v8878_v52, %v5711_v25  ;;  %v850_v52 = vpop.permute.xlu0 %849  ;;  %v8888_v6 = vld [vmem:[#allocation62_spill] sm:$0xff] }
 0x125   :  { %v467_v55 = vmul.f32 %v8876_v48, %v5754_v4  ;;  %8881 = vst [vmem:[#allocation10_spill] sm:$0xff] %v5845_v17  ;;  %v8883_v48 = vld [vmem:[#allocation21_spill] sm:$0xff] }
 0x126   :  { %584 = vrot.lane.b32.xlu1 %v550_v58, %s4742_s3  ;;  %v558_v58 = vmul.f32 %v8882_v15, %v5697_v51  ;;  %v559_v9 = vmul.f32 %v8883_v48, %v5722_v37  ;;  %v879_v15 = vmul.f32 %v850_v52, %v5722_v37  ;;  %v8886_v48 = vld [vmem:[#allocation27_spill] sm:$0xff] }
 0x127   :  { %v5842_v34 = vadd.f32 %v467_v55, %v5674_v40  ;;  %v846_v55 = vpop.permute.xlu1 %845 }
 0x128   :  { %586 = vrot.lane.b32.xlu0 %v551_v63, %s4742_s3  ;;  %v878_v63 = vmul.f32 %v846_v55, %v5697_v51  ;;  %v719_v51 = vmul.f32 %v8887_v29, %v5722_v37  ;;  %v344_v55 = vand.u32 2147483647, %v8872_v2  ;;  %v8889_v37 = vld [vmem:[#allocation16_spill] sm:$0xff]  ;;  %v873_v29 = vmul.f32 %v5554_v24, %v5735_v60 }
 0x129   :  { %8880 = vst [vmem:[#allocation7_spill] sm:$0xff] %v5842_v34  ;;  %v553_v52 = vmul.f32 %v8889_v37, %v5735_v60  ;;  %v8895_v37 = vld [vmem:[#allocation76_spill] sm:$0xff] }
 0x12a   :  { %600 = vrot.lane.b32.xlu1 %v558_v58, %s4742_s3  ;;  %v711_v58 = vmul.f32 %v8885_v5, %v5711_v25  ;;  %v345_v25 = vand.u32 2147483647, %v5532_v11  ;;  %v8891_v5 = vld [vmem:[#allocation23_spill] sm:$0xff] }
 0x12c   :  { %602 = vrot.lane.b32.xlu0 %v559_v9, %s4742_s3  ;;  %v712_v9 = vmul.f32 %v8886_v48, %v5725_v38  ;;  %v8892_v48 = vld [vmem:[#allocation20_spill] sm:$0xff] }
 0x12e   :  { %904 = vrot.lane.b32.xlu1 %v870_v62, %s4744_s25  ;;  %v720_v62 = vmul.f32 %v8888_v6, %v5728_v35  ;;  %v872_v6 = vmul.f32 %v5511_v59, %v5725_v38  ;;  %v8894_v59 = vld [vmem:[#allocation26_spill] sm:$0xff] }
 0x130   :  { %906 = vrot.lane.b32.xlu0 %v871_v50, %s4744_s25  ;;  %v352_v50 = vand.u32 2147483647, %v8875_v61 }
 0x132   :  { %920 = vrot.lane.b32.xlu1 %v878_v63, %s4744_s25  ;;  %v8890_v63 = vld [vmem:[#allocation15_spill] sm:$0xff] }
 0x134   :  { %922 = vrot.lane.b32.xlu0 %v879_v15, %s4744_s25  ;;  %v552_v15 = vmul.f32 %v8890_v63, %v5725_v38  ;;  %v713_v38 = vmul.f32 %v8894_v59, %v5735_v60  ;;  %v8897_v60 = vld [vmem:[#allocation18_spill] sm:$0xff] }
 0x136   :  { %746 = vrot.lane.b32.xlu1 %v711_v58, %s4743_s24  ;;  %v561_v58 = vmul.f32 %v8891_v5, %v5738_v19  ;;  %v346_v5 = vand.u32 2147483647, %v5605_v18 }
 0x138   :  { %748 = vrot.lane.b32.xlu0 %v712_v9, %s4743_s24  ;;  %v560_v9 = vmul.f32 %v8892_v48, %v5728_v35  ;;  %v8898_v48 = vld [vmem:[#allocation17_spill] sm:$0xff] }
 0x13a   :  { %762 = vrot.lane.b32.xlu1 %v719_v51, %s4743_s24  ;;  %v858_v51 = vpop.permute.xlu0 %857 }
 0x13c   :  { %764 = vrot.lane.b32.xlu0 %v720_v62, %s4743_s24  ;;  %v854_v62 = vpop.permute.xlu1 %853 }
 0x13e   :  { %1084 = vrot.lane.b32.xlu1 %v344_v55, %s4742_s3  ;;  %v881_v55 = vmul.f32 %v858_v51, %v5738_v19 }
 0x140   :  { %1086 = vrot.lane.b32.xlu0 %v345_v25, %s4742_s3  ;;  %v880_v25 = vmul.f32 %v854_v62, %v5728_v35  ;;  %v8896_v35 = vld [vmem:[#allocation49_spill] sm:$0xff]  ;;  %v862_v51 = vpop.permute.xlu1 %861 }
 0x141   :  { %v721_v63 = vmul.f32 %v8896_v35, %v5738_v19  ;;  %v8899_v19 = vld [vmem:[#allocation24_spill] sm:$0xff] }
 0x142   :  { %1100 = vrot.lane.b32.xlu1 %v352_v50, %s4742_s3  ;;  %v8893_v50 = vld [vmem:[#allocation29_spill] sm:$0xff] }
 0x143   :  { %v714_v24 = vmul.f32 %v8893_v50, %v5747_v43 }
 0x144   :  { %590 = vrot.lane.b32.xlu0 %v553_v52, %s4742_s3  ;;  %v722_v52 = vmul.f32 %v8895_v37, %v5750_v26  ;;  %v882_v37 = vmul.f32 %v862_v51, %v5750_v26  ;;  %v4745_v51 = vmov 4  }
 0x145   :  { %4511 = vset.pattern.permute.xlu1 %v4745_v51  ;;  %4512 = vset.pattern.permute.xlu0 %v4745_v51 }
 0x146   :  { %588 = vrot.lane.b32.xlu1 %v552_v15, %s4742_s3  ;;  %v347_v15 = vand.u32 2147483647, %v5657_v31 }
 0x148   :  { %606 = vrot.lane.b32.xlu0 %v561_v58, %s4742_s3  ;;  %v555_v58 = vmul.f32 %v8897_v60, %v5752_v33  ;;  %v354_v60 = vand.u32 2147483647, %v5587_v13 }
 0x14a   :  { %604 = vrot.lane.b32.xlu1 %v560_v9, %s4742_s3  ;;  %v554_v9 = vmul.f32 %v8898_v48, %v5747_v43 }
 0x14c   :  { %910 = vrot.lane.b32.xlu0 %v873_v29, %s4744_s25  ;;  %v563_v29 = vmul.f32 %v8899_v19, %v5754_v4 }
 0x14e   :  { %908 = vrot.lane.b32.xlu1 %v872_v6, %s4744_s25  ;;  %v8900_v6 = vld [vmem:[#allocation22_spill] sm:$0xff] }
 0x14f   :  { %v562_v62 = vmul.f32 %v8900_v6, %v5750_v26  ;;  %v8905_v26 = vld [vmem:[#allocation63_spill] sm:$0xff] }
 0x150   :  { %926 = vrot.lane.b32.xlu0 %v881_v55, %s4744_s25  ;;  %v875_v55 = vmul.f32 %v5615_v27, %v5752_v33  ;;  %v353_v27 = vand.u32 2147483647, %v5517_v49 }
 0x152   :  { %924 = vrot.lane.b32.xlu1 %v880_v25, %s4744_s25  ;;  %v866_v25 = vpop.permute.xlu0 %865 }
 0x154   :  { %752 = vrot.lane.b32.xlu0 %v714_v24, %s4743_s24  ;;  %v8902_v24 = vld [vmem:[#allocation114_spill] sm:$0xff] }
 0x155   :  { %v874_v59 = vmul.f32 %v8902_v24, %v5747_v43  ;;  %v8904_v43 = vld [vmem:[#allocation28_spill] sm:$0xff] }
 0x156   :  { %750 = vrot.lane.b32.xlu1 %v713_v38, %s4743_s24  ;;  %v883_v38 = vmul.f32 %v866_v25, %v5754_v4  ;;  %v715_v35 = vmul.f32 %v8904_v43, %v5752_v33  ;;  %v4420_v33 = vld [vmem:[%s8654_s4] ss:$0 sm:$0xff] }
 0x158   :  { %768 = vrot.lane.b32.xlu0 %v722_v52, %s4743_s24 }
 0x15a   :  { %766 = vrot.lane.b32.xlu1 %v721_v63, %s4743_s24  ;;  %v355_v63 = vand.u32 2147483647, %v5674_v40 }
 0x15c   :  { %1090 = vrot.lane.b32.xlu0 %v347_v15, %s4742_s3 }
 0x15d   :  { %v5934_v50 = vpop.permute.xlu1 %1076 }
 0x15e   :  { %1088 = vrot.lane.b32.xlu1 %v346_v5, %s4742_s3  ;;  %8901 = vst [vmem:[#allocation11_spill] sm:$0xff] %v5934_v50  ;;  %v723_v5 = vmul.f32 %v8905_v26, %v5754_v4 }
 0x160   :  { %594 = vrot.lane.b32.xlu0 %v555_v58, %s4742_s3 }
 0x162   :  { %592 = vrot.lane.b32.xlu1 %v554_v9, %s4742_s3 }
 0x163   :  { %v5943_v52 = vpop.permute.xlu1 %1092 }
 0x164   :  { %610 = vrot.lane.b32.xlu0 %v563_v29, %s4742_s3  ;;  %8903 = vst [vmem:[#allocation94_spill] sm:$0xff] %v5943_v52 }
 0x166   :  { %608 = vrot.lane.b32.xlu1 %v562_v62, %s4742_s3 }
 0x167   :  { %v5952_v15 = vpop.permute.xlu1 %580 }
 0x168   :  { %914 = vrot.lane.b32.xlu0 %v875_v55, %s4744_s25 }
 0x16a   :  { %912 = vrot.lane.b32.xlu1 %v874_v59, %s4744_s25  ;;  %v5986_v59 = vpop.permute.xlu0 %740 }
 0x16c   :  { %930 = vrot.lane.b32.xlu0 %v883_v38, %s4744_s25 }
 0x16e   :  { %928 = vrot.lane.b32.xlu1 %v882_v37, %s4744_s25 }
 0x170   :  { %1102 = vrot.lane.b32.xlu0 %v353_v27, %s4742_s3  ;;  %v5959_v58 = vpop.permute.xlu1 %596  ;;  %v5992_v27 = vpop.permute.xlu0 %756 }
 0x172   :  { %754 = vrot.lane.b32.xlu1 %v715_v35, %s4743_s24 }
 0x174   :  { %1106 = vrot.lane.b32.xlu0 %v355_v63, %s4742_s3  ;;  %v5966_v48 = vpop.permute.xlu1 %900  ;;  %v5996_v35 = vpop.permute.xlu0 %1078 }
 0x175   :  { %8909 = vst [vmem:[#allocation12_spill] sm:$0xff] %v5996_v35 }
 0x176   :  { %770 = vrot.lane.b32.xlu1 %v723_v5, %s4743_s24 }
 0x178   :  { %v6002_v5 = vpop.permute.xlu0 %1094 }
 0x179   :  { %8911 = vst [vmem:[#allocation14_spill] sm:$0xff] %v6002_v5 }
 0x17a   :  { %1104 = vrot.lane.b32.xlu1 %v354_v60, %s4742_s3 }
 0x17e   :  { %1145 = vrot.lane.b32.xlu1 %v4420_v33, %s4743_s24  ;;  %v6006_v33 = vpop.permute.xlu0 %582 }
 0x182   :  { %v6012_v1 = vpop.permute.xlu0 %598 }
 0x184   :  { %v5968_v9 = vpop.permute.xlu1 %916 }
 0x186   :  { %v6016_v42 = vpop.permute.xlu0 %902 }
 0x188   :  { %v5970_v19 = vpop.permute.xlu1 %742 }
 0x18c   :  { %v5972_v4 = vpop.permute.xlu1 %758 }
 0x190   :  { %v5974_v29 = vpop.permute.xlu1 %1080 }
 0x191   :  { %8906 = vst [vmem:[#allocation8_spill] sm:$0xff] %v5974_v29 }
 0x194   :  { %v5976_v6 = vpop.permute.xlu1 %1096 }
 0x195   :  { %8907 = vst [vmem:[#allocation9_spill] sm:$0xff] %v5976_v6 }
 0x198   :  { %v5978_v62 = vpop.permute.xlu1 %584 }
 0x19c   :  { %v5980_v55 = vpop.permute.xlu1 %600 }
 0x1a0   :  { %v5982_v25 = vpop.permute.xlu1 %904 }
 0x1a4   :  { %v5984_v24 = vpop.permute.xlu1 %920 }
 0x1a8   :  { %v5988_v38 = vpop.permute.xlu1 %746 }
 0x1ac   :  { %v5990_v37 = vpop.permute.xlu1 %762 }
 0x1b0   :  { %v5994_v43 = vpop.permute.xlu1 %1084 }
 0x1b1   :  { %8908 = vst [vmem:[#allocation90_spill] sm:$0xff] %v5994_v43 }
 0x1b4   :  { %v5998_v63 = vpop.permute.xlu1 %1100 }
 0x1b5   :  { %8910 = vst [vmem:[#allocation13_spill] sm:$0xff] %v5998_v63  ;;  %v6022_v63 = vpop.permute.xlu0 %918 }
 0x1b8   :  { %v6000_v26 = vpop.permute.xlu1 %588 }
 0x1b9   :  { %v6026_v6 = vpop.permute.xlu0 %744 }
 0x1bc   :  { %v6004_v60 = vpop.permute.xlu1 %604 }
 0x1bd   :  { %v6032_v5 = vpop.permute.xlu0 %760 }
 0x1c0   :  { %v6008_v51 = vpop.permute.xlu1 %908 }
 0x1c1   :  { %v6036_v34 = vpop.permute.xlu0 %1082 }
 0x1c2   :  { %8918 = vst [vmem:[#allocation62_spill] sm:$0xff] %v6036_v34 }
 0x1c4   :  { %v6010_v39 = vpop.permute.xlu1 %924 }
 0x1c5   :  { %8912 = vst [vmem:[#allocation19_spill] sm:$0xff] %v6010_v39 }
 0x1c8   :  { %v6014_v14 = vpop.permute.xlu1 %750 }
 0x1cc   :  { %v6018_v32 = vpop.permute.xlu1 %766 }
 0x1cd   :  { %8913 = vst [vmem:[#allocation21_spill] sm:$0xff] %v6018_v32 }
 0x1d0   :  { %v6020_v30 = vpop.permute.xlu1 %1088 }
 0x1d1   :  { %8914 = vst [vmem:[#allocation89_spill] sm:$0xff] %v6020_v30  ;;  %v6042_v30 = vpop.permute.xlu0 %1098 }
 0x1d2   :  { %8920 = vst [vmem:[#allocation15_spill] sm:$0xff] %v6042_v30  ;;  %v359_v30 = vmax.f32 %v5715_v7, 0.0 }
 0x1d4   :  { %v6024_v43 = vpop.permute.xlu1 %592 }
 0x1d5   :  { %v6046_v32 = vpop.permute.xlu0 %586 }
 0x1d8   :  { %v6028_v29 = vpop.permute.xlu1 %608 }
 0x1d9   :  { %8915 = vst [vmem:[#allocation25_spill] sm:$0xff] %v6028_v29  ;;  %v357_v29 = vmax.f32 %v5370_v20, 0.0 }
 0x1dc   :  { %v6030_v52 = vpop.permute.xlu1 %912 }
 0x1dd   :  { %8916 = vst [vmem:[#allocation27_spill] sm:$0xff] %v6030_v52  ;;  %v356_v52 = vmax.f32 %v5208_v41, 0.0 }
 0x1e0   :  { %v6034_v35 = vpop.permute.xlu1 %928 }
 0x1e1   :  { %8917 = vst [vmem:[#allocation36_spill] sm:$0xff] %v6034_v35 }
 0x1e4   :  { %v6038_v23 = vpop.permute.xlu1 %754 }
 0x1e8   :  { %v6040_v50 = vpop.permute.xlu1 %770 }
 0x1e9   :  { %8919 = vst [vmem:[#allocation16_spill] sm:$0xff] %v6040_v50  ;;  %v6058_v50 = vpop.permute.xlu0 %602 }
 0x1ec   :  { %v6044_v17 = vpop.permute.xlu1 %1104 }
 0x1ed   :  { %8921 = vst [vmem:[#allocation23_spill] sm:$0xff] %v6044_v17  ;;  %v358_v17 = vmax.f32 %v5706_v45, 0.0  ;;  %v363_v45 = vmax.f32 %v5657_v31, 0.0  ;;  %v364_v31 = vmax.f32 %v5278_v21, 0.0  ;;  %v369_v21 = vmax.f32 %v5517_v49, 0.0 }
 0x1f0   :  { %v6050_v39 = vpop.permute.xlu1 %1145 }
 0x1f1   :  { %8922 = vst [vmem:[#allocation20_spill] sm:$0xff] %v6050_v39  ;;  %v1149_v35 = vmul.f32 %v6050_v39, %v357_v29  ;;  %v1148_v34 = vmul.f32 %v6050_v39, %v356_v52  ;;  %v1151_v20 = vmul.f32 %v6050_v39, %v359_v30  ;;  %v1150_v41 = vmul.f32 %v6050_v39, %v358_v17 }
 0x1f2   :  { %v361_v52 = vmax.f32 %v5532_v11, 0.0  ;;  %v360_v29 = vmax.f32 %v8872_v2, 0.0  ;;  %v362_v30 = vmax.f32 %v5605_v18, 0.0  ;;  %v1155_v17 = vmul.f32 %v6050_v39, %v363_v45 }
 0x1f3   :  { %1182 = vrot.lane.b32.xlu1 %v1149_v35, %s4743_s24  ;;  %1180 = vrot.lane.b32.xlu0 %v1148_v34, %s4743_s24  ;;  %v6069_v35 = vpop.permute.xlu0 %906  ;;  %v365_v2 = vmax.f32 %v5445_v10, 0.0  ;;  %v367_v18 = vmax.f32 %v5744_v16, 0.0  ;;  %v368_v45 = vmax.f32 %v8875_v61, 0.0 }
 0x1f4   :  { %v1153_v34 = vmul.f32 %v6050_v39, %v361_v52  ;;  %v1152_v7 = vmul.f32 %v6050_v39, %v360_v29  ;;  %v1154_v11 = vmul.f32 %v6050_v39, %v362_v30  ;;  %v1156_v52 = vmul.f32 %v6050_v39, %v364_v31 }
 0x1f5   :  { %v366_v29 = vmax.f32 %v5732_v22, 0.0  ;;  %v1161_v30 = vmul.f32 %v6050_v39, %v369_v21  ;;  %v1160_v16 = vmul.f32 %v6050_v39, %v368_v45  ;;  %v371_v22 = vmax.f32 %v5674_v40, 0.0  ;;  %v6113_v40 = vld [vmem:[%s8650_s0] sm:$0xff] }
 0x1f7   :  { %1186 = vrot.lane.b32.xlu1 %v1151_v20, %s4743_s24  ;;  %1184 = vrot.lane.b32.xlu0 %v1150_v41, %s4743_s24  ;;  %v6080_v20 = vpop.permute.xlu0 %922  ;;  %v1157_v41 = vmul.f32 %v6050_v39, %v365_v2  ;;  %v1158_v10 = vmul.f32 %v6050_v39, %v366_v29  ;;  %v1163_v2 = vmul.f32 %v6050_v39, %v371_v22 }
 0x1fb   :  { %1190 = vrot.lane.b32.xlu1 %v1153_v34, %s4743_s24  ;;  %1188 = vrot.lane.b32.xlu0 %v1152_v7, %s4743_s24  ;;  %v1159_v34 = vmul.f32 %v6050_v39, %v367_v18  ;;  %v6090_v7 = vpop.permute.xlu0 %748 }
 0x1ff   :  { %1194 = vrot.lane.b32.xlu1 %v1155_v17, %s4743_s24  ;;  %1192 = vrot.lane.b32.xlu0 %v1154_v11, %s4743_s24  ;;  %v370_v17 = vmax.f32 %v5587_v13, 0.0  ;;  %v6102_v11 = vpop.permute.xlu0 %764 }
 0x201   :  { %v1162_v49 = vmul.f32 %v6050_v39, %v370_v17 }
 0x203   :  { %1198 = vrot.lane.b32.xlu1 %v1157_v41, %s4743_s24  ;;  %1196 = vrot.lane.b32.xlu0 %v1156_v52, %s4743_s24  ;;  %v6108_v61 = vpop.permute.xlu0 %1086 }
 0x207   :  { %1202 = vrot.lane.b32.xlu1 %v1159_v34, %s4743_s24  ;;  %1200 = vrot.lane.b32.xlu0 %v1158_v10, %s4743_s24  ;;  %v591_v13 = vpop.permute.xlu0 %590  ;;  %v628_v34 = vadd.f32 %v5952_v15, %v5771_v3  ;;  %v637_v3 = vadd.f32 %v6012_v1, %v5784_v56  ;;  %v631_v1 = vadd.f32 %v6046_v32, %v5795_v53 }
 0x208   :  { %v639_v32 = vadd.f32 %v6058_v50, %v5805_v0 }
 0x209   :  { %v788_v21 = vadd.f32 %v5986_v59, %v628_v34  ;;  %v797_v34 = vadd.f32 %v5972_v4, %v637_v3 }
 0x20b   :  { %1206 = vrot.lane.b32.xlu1 %v1161_v30, %s4743_s24  ;;  %1204 = vrot.lane.b32.xlu0 %v1160_v16, %s4743_s24  ;;  %v607_v31 = vpop.permute.xlu0 %606  ;;  %v948_v45 = vadd.f32 %v5966_v48, %v788_v21  ;;  %v630_v48 = vadd.f32 %v5978_v62, %v5792_v46  ;;  %v6159_v46 = vadd.f32 %v6022_v63, %v797_v34 }
 0x20c   :  { %v799_v63 = vadd.f32 %v5990_v37, %v639_v32  ;;  %v633_v37 = vadd.f32 %v591_v13, %v5813_v47  ;;  %v641_v3 = vadd.f32 %v607_v31, %v5823_v8  ;;  %v634_v47 = vadd.f32 %v6024_v43, %v5839_v44  ;;  %v8923_v13 = vld [vmem:[#allocation19_spill] sm:$0xff]  ;;  %v8926_v31 = vld [vmem:[#allocation25_spill] sm:$0xff]  ;;  %v8928_v43 = vld [vmem:[#allocation6_spill] sm:$0xff] }
 0x20d   :  { %v980_v16 = vmin.f32 %v948_v45, 0.0  ;;  %v790_v56 = vadd.f32 %v6026_v6, %v630_v48  ;;  %v989_v6 = vmin.f32 %v6159_v46, 0.0  ;;  %vm964_vm4 = vcmp.gt.f32.partialorder %v948_v45, 0.0 }
 0x20e   :  { %vm973_vm8 = vcmp.gt.f32.partialorder %v6159_v46, 0.0 }
 0x20f   :  { %1210 = vrot.lane.b32.xlu1 %v1163_v2, %s4743_s24  ;;  %1208 = vrot.lane.b32.xlu0 %v1162_v49, %s4743_s24  ;;  %v6116_v41 = vpop.permute.xlu0 %910  ;;  %v996_v22 = vmul.f32 1.442695, %v980_v16  ;;  %v636_v2 = vadd.f32 %v5959_v58, %v5774_v54  ;;  %v629_v49 = vadd.f32 %v6006_v33, %v5781_v12  ;;  %v638_v12 = vadd.f32 %v5980_v55, %v5802_v57 }
 0x210   :  { %v1014_v0 = vmul.f32 1.442695, %v989_v6 }
 0x211   :  { %4536 = vpow2.f32 %v996_v22  ;;  %v789_v15 = vadd.f32 %v5970_v19, %v629_v49  ;;  %v796_v59 = vadd.f32 %v5992_v27, %v636_v2  ;;  %v6162_v19 = vadd.f32 %v5982_v25, %v790_v56 }
 0x212   :  { %v798_v57 = vadd.f32 %v6032_v5, %v638_v12  ;;  %v632_v25 = vadd.f32 %v6000_v26, %v5816_v36 }
 0x213   :  { %1387 = vperm.xlu1 %4511, %v6113_v40   ;;  %v6118_v52 = vpop.permute.xlu0 %926  ;;  %v6148_v54 = vadd.f32 %v5968_v9, %v796_v59  ;;  %v6153_v58 = vadd.f32 %v6016_v42, %v789_v15  ;;  %v791_v9 = vadd.f32 %v5988_v38, %v631_v1  ;;  %v982_v38 = vmin.f32 %v6162_v19, 0.0  ;;  %v8927_v1 = vld [vmem:[#allocation11_spill] sm:$0xff] }
 0x214   :  { %v6174_v55 = vadd.f32 %v5984_v24, %v798_v57  ;;  %v640_v24 = vadd.f32 %v6004_v60, %v5826_v28  ;;  %v792_v22 = vadd.f32 %v6090_v7, %v632_v25  ;;  %v793_v28 = vadd.f32 %v6014_v14, %v633_v37  ;;  %v8924_v14 = vld [vmem:[#allocation21_spill] sm:$0xff]  ;;  %v8929_v25 = vld [vmem:[#allocation27_spill] sm:$0xff] }
 0x215   :  { %v988_v4 = vmin.f32 %v6148_v54, 0.0  ;;  %v981_v42 = vmin.f32 %v6153_v58, 0.0  ;;  %v6180_v27 = vadd.f32 %v6069_v35, %v791_v9  ;;  %v1000_v36 = vmul.f32 1.442695, %v982_v38 }
 0x216   :  { %v990_v50 = vmin.f32 %v6174_v55, 0.0  ;;  %v6191_v35 = vadd.f32 %v6080_v20, %v799_v63  ;;  %v6195_v49 = vadd.f32 %v6008_v51, %v792_v22  ;;  %v800_v15 = vadd.f32 %v6102_v11, %v640_v24  ;;  %v8925_v11 = vld [vmem:[#allocation10_spill] sm:$0xff] }
 0x217   :  { %v6120_v18 = vpop.permute.xlu0 %752  ;;  %v1012_v5 = vmul.f32 1.442695, %v988_v4  ;;  %v998_v33 = vmul.f32 1.442695, %v981_v42  ;;  %v983_v26 = vmin.f32 %v6180_v27, 0.0  ;;  %v6211_v8 = vadd.f32 %v6116_v41, %v793_v28 }
 0x218   :  { %v1016_v7 = vmul.f32 1.442695, %v990_v50  ;;  %v991_v48 = vmin.f32 %v6191_v35, 0.0  ;;  %v984_v51 = vmin.f32 %v6195_v49, 0.0  ;;  %v6205_v59 = vadd.f32 %v8923_v13, %v800_v15 }
 0x219   :  { %4538 = vpow2.f32 %v1012_v5  ;;  %v1002_v20 = vmul.f32 1.442695, %v983_v26  ;;  %v642_v12 = vadd.f32 %v8926_v31, %v8925_v11  ;;  %v794_v4 = vadd.f32 %v6120_v18, %v634_v47 }
 0x21a   :  { %4540 = vpow2.f32 %v998_v33  ;;  %v1018_v44 = vmul.f32 1.442695, %v991_v48  ;;  %v1004_v57 = vmul.f32 1.442695, %v984_v51  ;;  %v992_v42 = vmin.f32 %v6205_v59, 0.0 }
 0x21b   :  { %v6122_v29 = vpop.permute.xlu0 %768  ;;  %v4537_v53 = vpop.eup %4536  ;;  %4542 = vpow2.f32 %v1014_v0  ;;  %v985_v6 = vmin.f32 %v6211_v8, 0.0  ;;  %v6227_v38 = vadd.f32 %v8929_v25, %v794_v4  ;;  %vm972_vm6 = vcmp.gt.f32.partialorder %v6148_v54, 0.0 }
 0x21c   :  { %v4404_v16 = vadd.f32 -1.0, %v4537_v53  ;;  %4544 = vpow2.f32 %v1000_v36  ;;  %v802_v18 = vadd.f32 %v6122_v29, %v642_v12  ;;  %v1020_v24 = vmul.f32 1.442695, %v992_v42  ;;  %v8931_v36 = vld [vmem:[#allocation36_spill] sm:$0xff] }
 0x21d   :  { %4546 = vpow2.f32 %v1016_v7  ;;  %v1006_v28 = vmul.f32 1.442695, %v985_v6  ;;  %v8932_v7 = vld [vmem:[#allocation16_spill] sm:$0xff]  ;;  %vm965_vm7 = vcmp.gt.f32.partialorder %v6153_v58, 0.0  ;;  %vm966_vm9 = vcmp.gt.f32.partialorder %v6162_v19, 0.0 }
 0x21e   :  { %v1044_v60 = vsel %vm964_vm4, %v948_v45, %v4404_v16  ;;  %v801_v45 = vadd.f32 %v8924_v14, %v641_v3  ;;  %4548 = vpow2.f32 %v1002_v20  ;;  %v8930_v16 = vld [vmem:[#allocation7_spill] sm:$0xff]  ;;  %v6236_v26 = vadd.f32 %v8931_v36, %v802_v18 }
 0x21f   :  { %v6126_v10 = vpop.permute.xlu0 %1090  ;;  %v1124_v56 = vmul.f32 %v8927_v1, %v1044_v60  ;;  %4550 = vpow2.f32 %v1018_v44  ;;  %v986_v60 = vmin.f32 %v6227_v38, 0.0  ;;  %vm974_vm10 = vcmp.gt.f32.partialorder %v6174_v55, 0.0 }
 0x220   :  { %v6221_v32 = vadd.f32 %v6118_v52, %v801_v45  ;;  %4552 = vpow2.f32 %v1004_v57  ;;  %v994_v13 = vmin.f32 %v6236_v26, 0.0  ;;  %vm967_vm11 = vcmp.gt.f32.partialorder %v6180_v27, 0.0 }
 0x221   :  { %4554 = vpow2.f32 %v1020_v24  ;;  %v1008_v12 = vmul.f32 1.442695, %v986_v60  ;;  %vm975_vm12 = vcmp.gt.f32.partialorder %v6191_v35, 0.0  ;;  %vm968_vm13 = vcmp.gt.f32.partialorder %v6195_v49, 0.0 }
 0x222   :  { %v993_v22 = vmin.f32 %v6221_v32, 0.0  ;;  %4556 = vpow2.f32 %v1006_v28  ;;  %vm976_vm14 = vcmp.gt.f32.partialorder %v6205_v59, 0.0  ;;  %vm969_vm15 = vcmp.gt.f32.partialorder %v6211_v8, 0.0 }
 0x223   :  { %v6130_v30 = vpop.permute.xlu0 %594  ;;  %v4539_v5 = vpop.eup %4538  ;;  %vm970_vm0 = vcmp.gt.f32.partialorder %v6227_v38, 0.0  ;;  %vm977_vm1 = vcmp.gt.f32.partialorder %v6221_v32, 0.0  ;;  %vm978_vm2 = vcmp.gt.f32.partialorder %v6236_v26, 0.0 }
 0x224   :  { %v635_v9 = vadd.f32 %v6130_v30, %v8928_v43  ;;  %v4541_v33 = vpop.eup %4540  ;;  %v4412_v48 = vadd.f32 -1.0, %v4539_v5  ;;  %v1022_v51 = vmul.f32 1.442695, %v993_v22  ;;  %v1024_v43 = vmul.f32 1.442695, %v994_v13  ;;  %v8934_v5 = vld [vmem:[#allocation14_spill] sm:$0xff] }
 0x225   :  { %v4543_v50 = vpop.eup %4542  ;;  %v4405_v15 = vadd.f32 -1.0, %v4541_v33  ;;  %v8935_v33 = vld [vmem:[#allocation94_spill] sm:$0xff] }
 0x226   :  { %v795_v63 = vadd.f32 %v6038_v23, %v635_v9  ;;  %v4545_v29 = vpop.eup %4544  ;;  %v4413_v20 = vadd.f32 -1.0, %v4543_v50  ;;  %v1052_v44 = vsel %vm972_vm6, %v6148_v54, %v4412_v48  ;;  %4558 = vpow2.f32 %v1022_v51 }
 0x227   :  { %v6132_v17 = vpop.permute.xlu0 %610  ;;  %v4547_v47 = vpop.eup %4546  ;;  %v4406_v14 = vadd.f32 -1.0, %v4545_v29  ;;  %4560 = vpow2.f32 %v1008_v12 }
 0x228   :  { %v643_v52 = vadd.f32 %v6132_v17, %v8930_v16  ;;  %v4549_v31 = vpop.eup %4548  ;;  %v4414_v54 = vadd.f32 -1.0, %v4547_v47  ;;  %v1132_v16 = vmul.f32 %v8935_v33, %v1052_v44  ;;  %4562 = vpow2.f32 %v1024_v43 }
 0x229   :  { %v4551_v57 = vpop.eup %4550  ;;  %v4407_v25 = vadd.f32 -1.0, %v4549_v31 }
 0x22a   :  { %v803_v3 = vadd.f32 %v8932_v7, %v643_v52  ;;  %v4553_v6 = vpop.eup %4552  ;;  %v4415_v60 = vadd.f32 -1.0, %v4551_v57  ;;  %v1054_v7 = vsel %vm974_vm10, %v6174_v55, %v4414_v54 }
 0x22b   :  { %v6145_v21 = vpop.permute.xlu0 %914  ;;  %v4555_v36 = vpop.eup %4554  ;;  %v1047_v29 = vsel %vm967_vm11, %v6180_v27, %v4407_v25  ;;  %v4408_v28 = vadd.f32 -1.0, %v4553_v6  ;;  %v8937_v27 = vld [vmem:[#allocation62_spill] sm:$0xff] }
 0x22c   :  { %v6242_v17 = vadd.f32 %v6145_v21, %v795_v63  ;;  %v8933_v63 = vld [vmem:[#allocation12_spill] sm:$0xff]  ;;  %v1127_v13 = vmul.f32 %v8937_v27, %v1047_v29 }
 0x22e   :  { %v987_v21 = vmin.f32 %v6242_v17, 0.0  ;;  %vm971_vm3 = vcmp.gt.f32.partialorder %v6242_v17, 0.0 }
 0x22f   :  { %v6167_v62 = vpop.permute.xlu0 %930 }
 0x230   :  { %v6252_v1 = vadd.f32 %v6167_v62, %v803_v3  ;;  %v1053_v62 = vsel %vm973_vm8, %v6159_v46, %v4413_v20  ;;  %v1010_v42 = vmul.f32 1.442695, %v987_v21  ;;  %v8936_v46 = vld [vmem:[#allocation8_spill] sm:$0xff]  ;;  %v4557_v3 = vpop.eup %4556  ;;  %v4416_v21 = vadd.f32 -1.0, %v4555_v36 }
 0x231   :  { %v1133_v18 = vmul.f32 %v8934_v5, %v1053_v62  ;;  %v4559_v31 = vpop.eup %4558  ;;  %v4409_v12 = vadd.f32 -1.0, %v4557_v3 }
 0x232   :  { %4564 = vpow2.f32 %v1010_v42  ;;  %v4417_v25 = vadd.f32 -1.0, %v4559_v31  ;;  %vm979_vm4 = vcmp.gt.f32.partialorder %v6252_v1, 0.0 }
 0x233   :  { %v6187_v2 = vpop.permute.xlu0 %1102 }
 0x237   :  { %v6208_v34 = vpop.permute.xlu0 %1106 }
 0x265   :  { %v6223_v41 = vpop.permute.xlu1 %1182  ;;  %v1181_v53 = vpop.permute.xlu0 %1180 }
 0x266   :  { %v1228_v30 = vadd.f32 %v1181_v53, %v1124_v56  ;;  %v1045_v56 = vsel %vm965_vm7, %v6153_v58, %v4405_v15  ;;  %v995_v53 = vmin.f32 %v6252_v1, 0.0  ;;  %v1046_v58 = vsel %vm966_vm9, %v6162_v19, %v4406_v14  ;;  %v8938_v14 = vld [vmem:[#allocation9_spill] sm:$0xff] }
 0x267   :  { %v1126_v52 = vmul.f32 %v8936_v46, %v1046_v58  ;;  %v1134_v55 = vmul.f32 %v8938_v14, %v1054_v7  ;;  %v8940_v58 = vld [vmem:[#allocation15_spill] sm:$0xff] }
 0x268   :  { %v1245_v0 = vsel %vm1244_vm5, %v1228_v30, 0.0  ;;  %v1125_v30 = vmul.f32 %v8933_v63, %v1045_v56  ;;  %v1026_v19 = vmul.f32 1.442695, %v995_v53  ;;  %v4561_v56 = vpop.eup %4560  ;;  %v8939_v53 = vld [vmem:[#allocation90_spill] sm:$0xff]  ;;  %v1056_v63 = vsel %vm976_vm14, %v6205_v59, %v4416_v21 }
 0x269   :  { %v6238_v23 = vpop.permute.xlu1 %1186  ;;  %1246 = vadd.xlane.f32.xlu0 %v1245_v0  ;;  %v1185_v37 = vpop.permute.xlu0 %1184  ;;  %v4410_v54 = vadd.f32 -1.0, %v4561_v56  ;;  %v1057_v59 = vsel %vm977_vm1, %v6221_v32, %v4417_v25  ;;  %v8942_v32 = vld [vmem:[#allocation89_spill] sm:$0xff]  ;;  %v6346_v56 = vld [vmem:[%s8650_s0 + $0x8] sm:$0xff] }
 0x26a   :  { %v1229_v15 = vadd.f32 %v6223_v41, %v1125_v30  ;;  %v1230_v20 = vadd.f32 %v1185_v37, %v1126_v52  ;;  %4566 = vpow2.f32 %v1026_v19  ;;  %v1048_v41 = vsel %vm968_vm13, %v6195_v49, %v4408_v28  ;;  %v4563_v6 = vpop.eup %4562  ;;  %v8941_v52 = vld [vmem:[#allocation13_spill] sm:$0xff]  ;;  %v6409_v25 = vld [vmem:[%s8650_s0 + $0x68] sm:$0xff] }
 0x26b   :  { %v1055_v37 = vsel %vm975_vm12, %v6191_v35, %v4415_v60  ;;  %v1231_v44 = vadd.f32 %v6238_v23, %v1127_v13  ;;  %v1128_v49 = vmul.f32 %v8939_v53, %v1048_v41  ;;  %v1049_v23 = vsel %vm969_vm15, %v6211_v8, %v4409_v12  ;;  %v4565_v30 = vpop.eup %4564  ;;  %v6340_v21 = vld [vmem:[%s8650_s0 + $0x20] sm:$0xff]  ;;  %v6382_v53 = vld [vmem:[%s8650_s0 + $0x70] sm:$0xff] }
 0x26c   :  { %v1251_v62 = vsel %vm1244_vm5, %v1230_v20, 0.0  ;;  %v1248_v57 = vsel %vm1244_vm5, %v1229_v15, 0.0  ;;  %v1135_v35 = vmul.f32 %v8940_v58, %v1055_v37  ;;  %v1129_v8 = vmul.f32 %v6108_v61, %v1049_v23  ;;  %v6416_v23 = vld [vmem:[%s8650_s0 + $0x78] sm:$0xff] }
 0x26d   :  { %v6246_v45 = vpop.permute.xlu1 %1190  ;;  %v6248_v11 = vpop.permute.xlu0 %1188  ;;  %v1254_v33 = vsel %vm1244_vm5, %v1231_v44, 0.0  ;;  %v1050_v19 = vsel %vm970_vm0, %v6227_v38, %v4410_v54  ;;  %v1137_v61 = vmul.f32 %v6187_v2, %v1057_v59  ;;  %v8943_v2 = vld [vmem:[#allocation23_spill] sm:$0xff]  ;;  %v4746_v58 = vmov 5  }
 0x26e   :  { %v1232_v5 = vadd.f32 %v6248_v11, %v1128_v49  ;;  %v4411_v11 = vadd.f32 -1.0, %v4565_v30  ;;  %v1130_v7 = vmul.f32 %v8942_v32, %v1050_v19  ;;  %v6352_v44 = vld [vmem:[%s8650_s0 + $0x28] sm:$0xff]  ;;  %v6388_v49 = vld [vmem:[%s8650_s0 + $0x40] sm:$0xff]  ;;  %v4747_v54 = vmov 6  }
 0x270   :  { %v1257_v28 = vsel %vm1244_vm5, %v1232_v5, 0.0 }
 0x271   :  { %v6260_v9 = vpop.permute.xlu1 %1194  ;;  %v6262_v4 = vpop.permute.xlu0 %1192 }
 0x272   :  { %v1234_v15 = vadd.f32 %v6262_v4, %v1130_v7 }
 0x275   :  { %v1199_v0 = vpop.permute.xlu1 %1198  ;;  %v1197_v50 = vpop.permute.xlu0 %1196 }
 0x276   :  { %v1237_v24 = vadd.f32 %v1199_v0, %v1133_v18  ;;  %v1236_v22 = vadd.f32 %v1197_v50, %v1132_v16  ;;  %v1136_v0 = vmul.f32 %v8941_v52, %v1056_v63  ;;  %v4418_v50 = vadd.f32 -1.0, %v4563_v6  ;;  %v6402_v6 = vld [vmem:[%s8650_s0 + $0x58] sm:$0xff] }
 0x278   :  { %v1272_v48 = vsel %vm1244_vm5, %v1237_v24, 0.0  ;;  %v1269_v47 = vsel %vm1244_vm5, %v1236_v22, 0.0  ;;  %v4567_v24 = vpop.eup %4566  ;;  %v1233_v22 = vadd.f32 %v6246_v45, %v1129_v8  ;;  %v1058_v38 = vsel %vm978_vm2, %v6236_v26, %v4418_v50 }
 0x279   :  { %1273 = vadd.xlane.f32.xlu0 %v1272_v48  ;;  %1270 = vadd.xlane.f32.xlu1 %v1269_v47  ;;  %v1201_v51 = vpop.permute.xlu0 %1200  ;;  %v1203_v42 = vpop.permute.xlu1 %1202  ;;  %v1051_v45 = vsel %vm971_vm3, %v6242_v17, %v4411_v11  ;;  %v4419_v3 = vadd.f32 -1.0, %v4567_v24  ;;  %v1138_v27 = vmul.f32 %v8943_v2, %v1058_v38 }
 0x27a   :  { %v1238_v43 = vadd.f32 %v1201_v51, %v1134_v55  ;;  %v1239_v18 = vadd.f32 %v1203_v42, %v1135_v35  ;;  %v1260_v48 = vsel %vm1244_vm5, %v1233_v22, 0.0  ;;  %v1131_v13 = vmul.f32 %v6126_v10, %v1051_v45  ;;  %v6376_v42 = vld [vmem:[%s8650_s0 + $0x38] sm:$0xff]  ;;  %v6395_v35 = vld [vmem:[%s8650_s0 + $0x48] sm:$0xff] }
 0x27b   :  { %v1059_v26 = vsel %vm979_vm4, %v6252_v1, %v4419_v3  ;;  %v1263_v55 = vsel %vm1244_vm5, %v1234_v15, 0.0 }
 0x27c   :  { %v1275_v16 = vsel %vm1244_vm5, %v1238_v43, 0.0  ;;  %v1278_v29 = vsel %vm1244_vm5, %v1239_v18, 0.0  ;;  %v1235_v17 = vadd.f32 %v6260_v9, %v1131_v13  ;;  %v1139_v12 = vmul.f32 %v6208_v34, %v1059_v26  ;;  %v6328_v9 = vld [vmem:[%s8650_s0 + $0x10] sm:$0xff]  ;;  %v6334_v34 = vld [vmem:[%s8650_s0 + $0x18] sm:$0xff] }
 0x27d   :  { %1252 = vadd.xlane.f32.xlu0 %v1251_v62  ;;  %1249 = vadd.xlane.f32.xlu1 %v1248_v57  ;;  %v1205_v46 = vpop.permute.xlu0 %1204  ;;  %v1207_v60 = vpop.permute.xlu1 %1206  ;;  %v6358_v43 = vld [vmem:[%s8650_s0 + $0x50] sm:$0xff]  ;;  %v6370_v57 = vld [vmem:[%s8650_s0 + $0x60] sm:$0xff] }
 0x27e   :  { %v1240_v36 = vadd.f32 %v1205_v46, %v1136_v0  ;;  %v1241_v20 = vadd.f32 %v1207_v60, %v1137_v61  ;;  %v1266_v37 = vsel %vm1244_vm5, %v1235_v17, 0.0  ;;  %v6364_v62 = vld [vmem:[%s8650_s0 + $0x30] sm:$0xff] }
 0x280   :  { %v1281_v47 = vsel %vm1244_vm5, %v1240_v36, 0.0  ;;  %v1284_v4 = vsel %vm1244_vm5, %v1241_v20, 0.0  ;;  %v8962_v20 = vld [vmem:[#allocation30_spill] sm:$0xff] }
 0x281   :  { %1255 = vadd.xlane.f32.xlu0 %v1254_v33  ;;  %1276 = vadd.xlane.f32.xlu1 %v1275_v16  ;;  %v1209_v51 = vpop.permute.xlu0 %1208  ;;  %v1211_v31 = vpop.permute.xlu1 %1210 }
 0x282   :  { %v1242_v14 = vadd.f32 %v1209_v51, %v1138_v27  ;;  %v1243_v41 = vadd.f32 %v1211_v31, %v1139_v12 }
 0x284   :  { %v1287_v10 = vsel %vm1244_vm5, %v1242_v14, 0.0  ;;  %v1290_v1 = vsel %vm1244_vm5, %v1243_v41, 0.0 }
 0x285   :  { %1279 = vadd.xlane.f32.xlu0 %v1278_v29  ;;  %1258 = vadd.xlane.f32.xlu1 %v1257_v28 }
 0x289   :  { %1261 = vadd.xlane.f32.xlu0 %v1260_v48  ;;  %1282 = vadd.xlane.f32.xlu1 %v1281_v47  ;;  %v6486_v48 = vand.u32 2147483647, %v8962_v20 }
 0x28d   :  { %1285 = vadd.xlane.f32.xlu0 %v1284_v4  ;;  %1264 = vadd.xlane.f32.xlu1 %v1263_v55  ;;  %v8965_v55 = vld [vmem:[#allocation43_spill] sm:$0xff] }
 0x28e   :  { %v6501_v31 = vand.u32 2147483647, %v8965_v55 }
 0x291   :  { %1267 = vadd.xlane.f32.xlu0 %v1266_v37  ;;  %1288 = vadd.xlane.f32.xlu1 %v1287_v10  ;;  %v8966_v10 = vld [vmem:[#allocation56_spill] sm:$0xff] }
 0x292   :  { %v6431_v63 = vpop.permute.xlu1 %1387 }
 0x295   :  { %1291 = vadd.xlane.f32.xlu0 %v1290_v1  ;;  %v6505_v1 = vand.u32 2147483647, %v8966_v10 }
 0x2a2   :  { %1395 = vperm.xlu1 %4511, %v6328_v9  }
 0x2a6   :  { %1399 = vperm.xlu1 %4511, %v6334_v34  }
 0x2aa   :  { %1403 = vperm.xlu1 %4511, %v6340_v21  }
 0x2ab   :  { %1391 = vperm.xlu0 %4512, %v6346_v56  }
 0x2ae   :  { %1407 = vperm.xlu1 %4511, %v6352_v44  }
 0x2af   :  { %1427 = vperm.xlu0 %4512, %v6358_v43  }
 0x2b2   :  { %1411 = vperm.xlu1 %4511, %v6364_v62  }
 0x2b3   :  { %1435 = vperm.xlu0 %4512, %v6370_v57  }
 0x2b6   :  { %1415 = vperm.xlu1 %4511, %v6376_v42  }
 0x2b7   :  { %1443 = vperm.xlu0 %4512, %v6382_v53  }
 0x2ba   :  { %1419 = vperm.xlu1 %4511, %v6388_v49  }
 0x2bb   :  { %4513 = vset.pattern.permute.xlu0 %v4746_v58 }
 0x2bc   :  { %1483 = vperm.xlu0 %4513, %v6113_v40  }
 0x2be   :  { %1423 = vperm.xlu1 %4511, %v6395_v35  }
 0x2c0   :  { %1495 = vperm.xlu0 %4513, %v6334_v34  }
 0x2c2   :  { %1431 = vperm.xlu1 %4511, %v6402_v6  }
 0x2c4   :  { %1503 = vperm.xlu0 %4513, %v6352_v44  }
 0x2c6   :  { %1439 = vperm.xlu1 %4511, %v6409_v25  }
 0x2c8   :  { %1511 = vperm.xlu0 %4513, %v6376_v42  }
 0x2ca   :  { %1447 = vperm.xlu1 %4511, %v6416_v23  }
 0x2cc   :  { %1519 = vperm.xlu0 %4513, %v6395_v35  }
 0x2ce   :  { %4514 = vset.pattern.permute.xlu1 %v4746_v58  ;;  %v8967_v58 = vld [vmem:[#allocation70_spill] sm:$0xff] }
 0x2cf   :  { %1487 = vperm.xlu1 %4514, %v6346_v56  }
 0x2d0   :  { %1527 = vperm.xlu0 %4513, %v6402_v6  }
 0x2d3   :  { %1491 = vperm.xlu1 %4514, %v6328_v9  }
 0x2d4   :  { %1535 = vperm.xlu0 %4513, %v6409_v25  }
 0x2d7   :  { %1499 = vperm.xlu1 %4514, %v6340_v21  }
 0x2d8   :  { %1543 = vperm.xlu0 %4513, %v6416_v23  }
 0x2db   :  { %1507 = vperm.xlu1 %4514, %v6364_v62  }
 0x2dc   :  { %4516 = vset.pattern.permute.xlu0 %v4747_v54 }
 0x2df   :  { %1515 = vperm.xlu1 %4514, %v6388_v49  }
 0x2e3   :  { %1523 = vperm.xlu1 %4514, %v6358_v43  }
 0x2e7   :  { %1531 = vperm.xlu1 %4514, %v6370_v57  }
 0x2eb   :  { %1539 = vperm.xlu1 %4514, %v6382_v53  }
 0x2ef   :  { %4515 = vset.pattern.permute.xlu1 %v4747_v54  ;;  %v6508_v54 = vand.u32 2147483647, %v8967_v58 }
 0x2f6   :  { %v6433_v30 = vpop.xlane.xlu0 %1246 }
 0x2f7   :  { %8944 = vst [vmem:[#allocation29_spill] sm:$0xff] %v6433_v30 }
 0x306   :  { %v6435_v5 = vpop.xlane.xlu1 %1270  ;;  %v6437_v18 = vpop.xlane.xlu0 %1273 }
 0x307   :  { %8945 = vst [vmem:[#allocation26_spill] sm:$0xff] %v6435_v5  ;;  %8946 = vst [vmem:[#allocation76_spill] sm:$0xff] %v6437_v18  ;;  %v8970_v18 = vld [vmem:[#allocation110_spill] sm:$0xff] }
 0x30a   :  { %v6439_v33 = vpop.xlane.xlu1 %1249  ;;  %v6441_v16 = vpop.xlane.xlu0 %1252 }
 0x30b   :  { %8947 = vst [vmem:[#allocation49_spill] sm:$0xff] %v6439_v33  ;;  %8948 = vst [vmem:[#allocation18_spill] sm:$0xff] %v6441_v16  ;;  %v8980_v16 = vld [vmem:[#allocation113_spill] sm:$0xff] }
 0x30e   :  { %v6443_v46 = vpop.xlane.xlu1 %1276  ;;  %v6445_v8 = vpop.xlane.xlu0 %1255 }
 0x30f   :  { %8949 = vst [vmem:[#allocation17_spill] sm:$0xff] %v6443_v46  ;;  %8950 = vst [vmem:[#allocation24_spill] sm:$0xff] %v6445_v8 }
 0x312   :  { %v6447_v52 = vpop.xlane.xlu1 %1258  ;;  %v6449_v0 = vpop.xlane.xlu0 %1279 }
 0x313   :  { %8951 = vst [vmem:[#allocation22_spill] sm:$0xff] %v6447_v52  ;;  %8952 = vst [vmem:[#allocation114_spill] sm:$0xff] %v6449_v0  ;;  %v8969_v0 = vld [vmem:[#allocation98_spill] sm:$0xff] }
 0x314   :  { %v6517_v46 = vand.u32 2147483647, %v8969_v0  ;;  %v8976_v52 = vld [vmem:[#allocation86_spill] sm:$0xff] }
 0x316   :  { %v6451_v59 = vpop.xlane.xlu1 %1282  ;;  %v6453_v50 = vpop.xlane.xlu0 %1261 }
 0x317   :  { %8953 = vst [vmem:[#allocation28_spill] sm:$0xff] %v6451_v59  ;;  %8954 = vst [vmem:[#allocation63_spill] sm:$0xff] %v6453_v50  ;;  %v8968_v59 = vld [vmem:[#allocation83_spill] sm:$0xff] }
 0x318   :  { %v6514_v55 = vand.u32 2147483647, %v8968_v59 }
 0x31a   :  { %v6455_v11 = vpop.xlane.xlu1 %1264  ;;  %v6457_v19 = vpop.xlane.xlu0 %1285 }
 0x31b   :  { %8955 = vst [vmem:[#allocation19_spill] sm:$0xff] %v6455_v11  ;;  %8956 = vst [vmem:[#allocation21_spill] sm:$0xff] %v6457_v19 }
 0x31e   :  { %v6459_v24 = vpop.xlane.xlu1 %1288  ;;  %v6461_v22 = vpop.xlane.xlu0 %1267 }
 0x31f   :  { %8957 = vst [vmem:[#allocation10_spill] sm:$0xff] %v6459_v24  ;;  %8958 = vst [vmem:[#allocation25_spill] sm:$0xff] %v6461_v22  ;;  %v8972_v22 = vld [vmem:[#allocation33_spill] sm:$0xff] }
 0x322   :  { %v6463_v36 = vpop.permute.xlu1 %1395  ;;  %v6465_v29 = vpop.xlane.xlu0 %1291 }
 0x323   :  { %8959 = vst [vmem:[#allocation11_spill] sm:$0xff] %v6465_v29 }
 0x326   :  { %v6467_v28 = vpop.permute.xlu1 %1399 }
 0x32a   :  { %v6469_v60 = vpop.permute.xlu1 %1403  ;;  %v6471_v61 = vpop.permute.xlu0 %1391 }
 0x32e   :  { %v6473_v32 = vpop.permute.xlu1 %1407  ;;  %v6475_v7 = vpop.permute.xlu0 %1427 }
 0x332   :  { %v6477_v38 = vpop.permute.xlu1 %1411  ;;  %v6479_v45 = vpop.permute.xlu0 %1435 }
 0x333   :  { %8960 = vst [vmem:[#allocation6_spill] sm:$0xff] %v6479_v45 }
 0x336   :  { %v6481_v3 = vpop.permute.xlu1 %1415  ;;  %v6483_v15 = vpop.permute.xlu0 %1443 }
 0x337   :  { %8961 = vst [vmem:[#allocation27_spill] sm:$0xff] %v6483_v15 }
 0x33a   :  { %v6488_v47 = vpop.permute.xlu1 %1419 }
 0x33b   :  { %v1484_v51 = vpop.permute.xlu0 %1483 }
 0x33c   :  { %v1546_v2 = vmul.f32 %v1484_v51, %v6486_v48 }
 0x33e   :  { %v6491_v27 = vpop.permute.xlu1 %1423  ;;  %1578 = vrot.lane.b32.xlu1 %v1546_v2, %s4742_s3 }
 0x33f   :  { %v1496_v26 = vpop.permute.xlu0 %1495 }
 0x340   :  { %v1549_v51 = vmul.f32 %v1496_v26, %v6508_v54  ;;  %v6524_v26 = vand.u32 2147483647, %v8970_v18 }
 0x342   :  { %v6494_v13 = vpop.permute.xlu1 %1431 }
 0x343   :  { %v1504_v14 = vpop.permute.xlu0 %1503 }
 0x344   :  { %v1551_v58 = vmul.f32 %v1504_v14, %v6517_v46  ;;  %v6534_v14 = vand.u32 2147483647, %v8972_v22 }
 0x346   :  { %v6496_v17 = vpop.permute.xlu1 %1439 }
 0x347   :  { %8963 = vst [vmem:[#allocation7_spill] sm:$0xff] %v6496_v17  ;;  %v1512_v37 = vpop.permute.xlu0 %1511 }
 0x34a   :  { %v6498_v4 = vpop.permute.xlu1 %1447 }
 0x34b   :  { %8964 = vst [vmem:[#allocation36_spill] sm:$0xff] %v6498_v4 }
 0x34e   :  { %v1488_v12 = vpop.permute.xlu1 %1487 }
 0x34f   :  { %v1547_v41 = vmul.f32 %v1488_v12, %v6501_v31  ;;  %v1520_v12 = vpop.permute.xlu0 %1519 }
 0x351   :  { %1580 = vrot.lane.b32.xlu0 %v1547_v41, %s4742_s3 }
 0x352   :  { %v1492_v20 = vpop.permute.xlu1 %1491 }
 0x353   :  { %v1548_v2 = vmul.f32 %v1492_v20, %v6505_v1  ;;  %v8971_v20 = vld [vmem:[#allocation123_spill] sm:$0xff] }
 0x354   :  { %v6527_v5 = vand.u32 2147483647, %v8971_v20  ;;  %v8974_v20 = vld [vmem:[#allocation59_spill] sm:$0xff] }
 0x355   :  { %1582 = vrot.lane.b32.xlu1 %v1548_v2, %s4742_s3  ;;  %1584 = vrot.lane.b32.xlu0 %v1549_v51, %s4742_s3  ;;  %v1528_v2 = vpop.permute.xlu0 %1527 }
 0x356   :  { %v1500_v10 = vpop.permute.xlu1 %1499  ;;  %v1553_v59 = vmul.f32 %v1512_v37, %v6527_v5  ;;  %v6544_v37 = vand.u32 2147483647, %v8974_v20 }
 0x357   :  { %v1550_v41 = vmul.f32 %v1500_v10, %v6514_v55  ;;  %v8973_v10 = vld [vmem:[#allocation46_spill] sm:$0xff] }
 0x358   :  { %v6537_v11 = vand.u32 2147483647, %v8973_v10 }
 0x359   :  { %1586 = vrot.lane.b32.xlu1 %v1550_v41, %s4742_s3  ;;  %1588 = vrot.lane.b32.xlu0 %v1551_v58, %s4742_s3  ;;  %v1536_v22 = vpop.permute.xlu0 %1535 }
 0x35a   :  { %v1508_v0 = vpop.permute.xlu1 %1507  ;;  %v1555_v41 = vmul.f32 %v1520_v12, %v6537_v11  ;;  %v6554_v12 = vand.u32 2147483647, %v8976_v52 }
 0x35b   :  { %v1552_v51 = vmul.f32 %v1508_v0, %v6524_v26  ;;  %v8975_v0 = vld [vmem:[#allocation73_spill] sm:$0xff] }
 0x35c   :  { %v6547_v50 = vand.u32 2147483647, %v8975_v0  ;;  %8977 = vst [vmem:[#allocation16_spill] sm:$0xff] %v6554_v12 }
 0x35d   :  { %1590 = vrot.lane.b32.xlu1 %v1552_v51, %s4742_s3  ;;  %1592 = vrot.lane.b32.xlu0 %v1553_v59, %s4742_s3  ;;  %v1544_v0 = vpop.permute.xlu0 %1543 }
 0x35e   :  { %v1516_v18 = vpop.permute.xlu1 %1515  ;;  %v1557_v51 = vmul.f32 %v1528_v2, %v6547_v50  ;;  %v6564_v2 = vand.u32 2147483647, %v8980_v16  ;;  %v4748_v16 = vmov 7  }
 0x35f   :  { %v1554_v58 = vmul.f32 %v1516_v18, %v6534_v14  ;;  %v8978_v18 = vld [vmem:[#allocation101_spill] sm:$0xff] }
 0x360   :  { %v6557_v8 = vand.u32 2147483647, %v8978_v18  ;;  %8981 = vst [vmem:[#allocation14_spill] sm:$0xff] %v6564_v2 }
 0x361   :  { %1594 = vrot.lane.b32.xlu1 %v1554_v58, %s4742_s3  ;;  %1596 = vrot.lane.b32.xlu0 %v1555_v41, %s4742_s3 }
 0x362   :  { %v1524_v10 = vpop.permute.xlu1 %1523  ;;  %8979 = vst [vmem:[#allocation12_spill] sm:$0xff] %v6557_v8  ;;  %v1559_v58 = vmul.f32 %v1536_v22, %v6557_v8 }
 0x363   :  { %v1556_v59 = vmul.f32 %v1524_v10, %v6544_v37  ;;  %v8982_v10 = vld [vmem:[#allocation126_spill] sm:$0xff] }
 0x364   :  { %v6567_v33 = vand.u32 2147483647, %v8982_v10 }
 0x365   :  { %1598 = vrot.lane.b32.xlu1 %v1556_v59, %s4742_s3  ;;  %1600 = vrot.lane.b32.xlu0 %v1557_v51, %s4742_s3 }
 0x366   :  { %v1532_v20 = vpop.permute.xlu1 %1531  ;;  %8983 = vst [vmem:[#allocation94_spill] sm:$0xff] %v6567_v33  ;;  %v1561_v59 = vmul.f32 %v1544_v0, %v6567_v33 }
 0x367   :  { %v1558_v41 = vmul.f32 %v1532_v20, %v6554_v12 }
 0x369   :  { %1602 = vrot.lane.b32.xlu1 %v1558_v41, %s4742_s3  ;;  %1604 = vrot.lane.b32.xlu0 %v1559_v58, %s4742_s3 }
 0x36a   :  { %v1540_v52 = vpop.permute.xlu1 %1539 }
 0x36b   :  { %v1560_v51 = vmul.f32 %v1540_v52, %v6564_v2 }
 0x36d   :  { %1606 = vrot.lane.b32.xlu1 %v1560_v51, %s4742_s3  ;;  %1608 = vrot.lane.b32.xlu0 %v1561_v59, %s4742_s3 }
 0x371   :  { %1643 = vperm.xlu1 %4515, %v6113_v40   ;;  %1647 = vperm.xlu0 %4516, %v6346_v56  }
 0x375   :  { %1651 = vperm.xlu1 %4515, %v6328_v9   ;;  %1659 = vperm.xlu0 %4516, %v6340_v21  }
 0x379   :  { %1655 = vperm.xlu1 %4515, %v6334_v34   ;;  %1667 = vperm.xlu0 %4516, %v6364_v62  }
 0x37d   :  { %1663 = vperm.xlu1 %4515, %v6352_v44   ;;  %1675 = vperm.xlu0 %4516, %v6388_v49  }
 0x381   :  { %1671 = vperm.xlu1 %4515, %v6376_v42   ;;  %1683 = vperm.xlu0 %4516, %v6358_v43  }
 0x385   :  { %1679 = vperm.xlu1 %4515, %v6395_v35   ;;  %1691 = vperm.xlu0 %4516, %v6370_v57  }
 0x389   :  { %1687 = vperm.xlu1 %4515, %v6402_v6   ;;  %1699 = vperm.xlu0 %4516, %v6382_v53  }
 0x38d   :  { %1695 = vperm.xlu1 %4515, %v6409_v25   ;;  %4517 = vset.pattern.permute.xlu0 %v4748_v16 }
 0x391   :  { %1703 = vperm.xlu1 %4515, %v6416_v23  }
 0x395   :  { %4518 = vset.pattern.permute.xlu1 %v4748_v16 }
 0x3b0   :  { %v6593_v18 = vpop.permute.xlu1 %1578 }
 0x3c3   :  { %v6591_v22 = vpop.permute.xlu0 %1580 }
 0x3c7   :  { %v6595_v20 = vpop.permute.xlu1 %1582  ;;  %v6597_v58 = vpop.permute.xlu0 %1584 }
 0x3cb   :  { %v6599_v41 = vpop.permute.xlu1 %1586  ;;  %v6601_v0 = vpop.permute.xlu0 %1588 }
 0x3cf   :  { %v6603_v10 = vpop.permute.xlu1 %1590  ;;  %v6605_v52 = vpop.permute.xlu0 %1592 }
 0x3d3   :  { %v6607_v59 = vpop.permute.xlu1 %1594  ;;  %v6609_v51 = vpop.permute.xlu0 %1596 }
 0x3d4   :  { %8984 = vst [vmem:[#allocation8_spill] sm:$0xff] %v6607_v59  ;;  %8985 = vst [vmem:[#allocation62_spill] sm:$0xff] %v6609_v51 }
 0x3d7   :  { %v6611_v16 = vpop.permute.xlu1 %1598  ;;  %v6613_v30 = vpop.permute.xlu0 %1600 }
 0x3d8   :  { %8986 = vst [vmem:[#allocation9_spill] sm:$0xff] %v6611_v16  ;;  %8987 = vst [vmem:[#allocation90_spill] sm:$0xff] %v6613_v30 }
 0x3db   :  { %v6615_v24 = vpop.permute.xlu1 %1602  ;;  %v6617_v29 = vpop.permute.xlu0 %1604 }
 0x3dc   :  { %8988 = vst [vmem:[#allocation15_spill] sm:$0xff] %v6615_v24  ;;  %8989 = vst [vmem:[#allocation13_spill] sm:$0xff] %v6617_v29 }
 0x3df   :  { %v6619_v19 = vpop.permute.xlu1 %1606  ;;  %v6621_v4 = vpop.permute.xlu0 %1608 }
 0x3e0   :  { %8990 = vst [vmem:[#allocation89_spill] sm:$0xff] %v6619_v19  ;;  %8991 = vst [vmem:[#allocation23_spill] sm:$0xff] %v6621_v4 }
 0x3f0   :  { %v1644_v17 = vpop.permute.xlu1 %1643  ;;  %v1648_v15 = vpop.permute.xlu0 %1647 }
 0x3f1   :  { %v1706_v45 = vmul.f32 %v1644_v17, %v6486_v48  ;;  %v1707_v59 = vmul.f32 %v1648_v15, %v6501_v31 }
 0x3f3   :  { %1738 = vrot.lane.b32.xlu0 %v1706_v45, %s4743_s24  ;;  %1740 = vrot.lane.b32.xlu1 %v1707_v59, %s4743_s24 }
 0x3f4   :  { %v1652_v16 = vpop.permute.xlu1 %1651  ;;  %v1660_v30 = vpop.permute.xlu0 %1659 }
 0x3f5   :  { %v1708_v24 = vmul.f32 %v1652_v16, %v6505_v1  ;;  %v1710_v4 = vmul.f32 %v1660_v30, %v6514_v55 }
 0x3f7   :  { %1742 = vrot.lane.b32.xlu0 %v1708_v24, %s4743_s24 }
 0x3f8   :  { %v1656_v29 = vpop.permute.xlu1 %1655  ;;  %v1668_v19 = vpop.permute.xlu0 %1667 }
 0x3f9   :  { %v1709_v51 = vmul.f32 %v1656_v29, %v6508_v54  ;;  %v1712_v17 = vmul.f32 %v1668_v19, %v6524_v26 }
 0x3fb   :  { %1744 = vrot.lane.b32.xlu1 %v1709_v51, %s4743_s24  ;;  %1746 = vrot.lane.b32.xlu0 %v1710_v4, %s4743_s24 }
 0x3fc   :  { %v1664_v15 = vpop.permute.xlu1 %1663  ;;  %v1676_v45 = vpop.permute.xlu0 %1675 }
 0x3fd   :  { %v1711_v59 = vmul.f32 %v1664_v15, %v6517_v46  ;;  %v1714_v30 = vmul.f32 %v1676_v45, %v6534_v14 }
 0x3ff   :  { %1748 = vrot.lane.b32.xlu1 %v1711_v59, %s4743_s24  ;;  %1750 = vrot.lane.b32.xlu0 %v1712_v17, %s4743_s24 }
 0x400   :  { %v1672_v24 = vpop.permute.xlu1 %1671  ;;  %v1684_v16 = vpop.permute.xlu0 %1683 }
 0x401   :  { %v1713_v29 = vmul.f32 %v1672_v24, %v6527_v5  ;;  %v1716_v19 = vmul.f32 %v1684_v16, %v6544_v37 }
 0x403   :  { %1752 = vrot.lane.b32.xlu1 %v1713_v29, %s4743_s24  ;;  %1754 = vrot.lane.b32.xlu0 %v1714_v30, %s4743_s24 }
 0x404   :  { %v1680_v4 = vpop.permute.xlu1 %1679  ;;  %v1692_v51 = vpop.permute.xlu0 %1691 }
 0x405   :  { %v1715_v15 = vmul.f32 %v1680_v4, %v6537_v11  ;;  %v1718_v59 = vmul.f32 %v1692_v51, %v6554_v12 }
 0x407   :  { %1756 = vrot.lane.b32.xlu1 %v1715_v15, %s4743_s24  ;;  %1758 = vrot.lane.b32.xlu0 %v1716_v19, %s4743_s24 }
 0x408   :  { %v1688_v17 = vpop.permute.xlu1 %1687  ;;  %v1700_v24 = vpop.permute.xlu0 %1699 }
 0x409   :  { %v1717_v45 = vmul.f32 %v1688_v17, %v6547_v50  ;;  %v1720_v29 = vmul.f32 %v1700_v24, %v6564_v2 }
 0x40b   :  { %1760 = vrot.lane.b32.xlu1 %v1717_v45, %s4743_s24  ;;  %1762 = vrot.lane.b32.xlu0 %v1718_v59, %s4743_s24 }
 0x40c   :  { %v1696_v30 = vpop.permute.xlu1 %1695 }
 0x40d   :  { %v1719_v16 = vmul.f32 %v1696_v30, %v6557_v8 }
 0x40f   :  { %1764 = vrot.lane.b32.xlu1 %v1719_v16, %s4743_s24  ;;  %1766 = vrot.lane.b32.xlu0 %v1720_v29, %s4743_s24 }
 0x410   :  { %v1704_v4 = vpop.permute.xlu1 %1703 }
 0x411   :  { %v1721_v19 = vmul.f32 %v1704_v4, %v6567_v33 }
 0x413   :  { %1768 = vrot.lane.b32.xlu1 %v1721_v19, %s4743_s24  ;;  %1803 = vperm.xlu0 %4517, %v6113_v40  }
 0x417   :  { %1807 = vperm.xlu1 %4518, %v6346_v56   ;;  %1815 = vperm.xlu0 %4517, %v6334_v34  }
 0x41b   :  { %1811 = vperm.xlu1 %4518, %v6328_v9   ;;  %1823 = vperm.xlu0 %4517, %v6352_v44  }
 0x41f   :  { %1819 = vperm.xlu1 %4518, %v6340_v21   ;;  %1831 = vperm.xlu0 %4517, %v6376_v42  }
 0x423   :  { %1827 = vperm.xlu1 %4518, %v6364_v62   ;;  %1839 = vperm.xlu0 %4517, %v6395_v35  }
 0x427   :  { %1835 = vperm.xlu1 %4518, %v6388_v49   ;;  %1847 = vperm.xlu0 %4517, %v6402_v6  }
 0x42b   :  { %1843 = vperm.xlu1 %4518, %v6358_v43   ;;  %1855 = vperm.xlu0 %4517, %v6409_v25  }
 0x42f   :  { %1851 = vperm.xlu1 %4518, %v6370_v57   ;;  %1863 = vperm.xlu0 %4517, %v6416_v23  }
 0x433   :  { %1859 = vperm.xlu1 %4518, %v6382_v53  }
 0x465   :  { %v6671_v40 = vpop.permute.xlu0 %1738  ;;  %v6673_v9 = vpop.permute.xlu1 %1740 }
 0x469   :  { %v6675_v34 = vpop.permute.xlu0 %1742 }
 0x46d   :  { %v6677_v21 = vpop.permute.xlu1 %1744  ;;  %v6679_v56 = vpop.permute.xlu0 %1746 }
 0x471   :  { %v6681_v44 = vpop.permute.xlu1 %1748  ;;  %v6683_v43 = vpop.permute.xlu0 %1750 }
 0x472   :  { %8992 = vst [vmem:[#allocation30_spill] sm:$0xff] %v6683_v43 }
 0x475   :  { %v6685_v62 = vpop.permute.xlu1 %1752  ;;  %v6687_v57 = vpop.permute.xlu0 %1754 }
 0x476   :  { %8993 = vst [vmem:[#allocation43_spill] sm:$0xff] %v6685_v62  ;;  %8994 = vst [vmem:[#allocation56_spill] sm:$0xff] %v6687_v57  ;;  %v9016_v57 = vld [vmem:[#allocation117_spill] sm:$0xff] }
 0x479   :  { %v6689_v42 = vpop.permute.xlu1 %1756  ;;  %v6691_v53 = vpop.permute.xlu0 %1758 }
 0x47a   :  { %8995 = vst [vmem:[#allocation70_spill] sm:$0xff] %v6689_v42  ;;  %8996 = vst [vmem:[#allocation83_spill] sm:$0xff] %v6691_v53  ;;  %v9013_v53 = vld [vmem:[#allocation77_spill] sm:$0xff]  ;;  %v9014_v42 = vld [vmem:[#allocation91_spill] sm:$0xff] }
 0x47d   :  { %v6693_v49 = vpop.permute.xlu1 %1760  ;;  %v6695_v35 = vpop.permute.xlu0 %1762 }
 0x47e   :  { %8997 = vst [vmem:[#allocation98_spill] sm:$0xff] %v6693_v49  ;;  %8998 = vst [vmem:[#allocation110_spill] sm:$0xff] %v6695_v35  ;;  %v9010_v35 = vld [vmem:[#allocation40_spill] sm:$0xff] }
 0x47f   :  { %v9012_v49 = vld [vmem:[#allocation64_spill] sm:$0xff] }
 0x481   :  { %v6697_v6 = vpop.permute.xlu1 %1764  ;;  %v6699_v25 = vpop.permute.xlu0 %1766 }
 0x482   :  { %8999 = vst [vmem:[#allocation123_spill] sm:$0xff] %v6697_v6  ;;  %9000 = vst [vmem:[#allocation33_spill] sm:$0xff] %v6699_v25  ;;  %v9008_v25 = vld [vmem:[#allocation120_spill] sm:$0xff]  ;;  %v9009_v6 = vld [vmem:[#allocation129_spill] sm:$0xff] }
 0x485   :  { %v6701_v23 = vpop.permute.xlu1 %1768 }
 0x486   :  { %9001 = vst [vmem:[#allocation46_spill] sm:$0xff] %v6701_v23 }
 0x492   :  { %v1804_v51 = vpop.permute.xlu0 %1803 }
 0x493   :  { %v1866_v15 = vmul.f32 %v1804_v51, %v6486_v48 }
 0x495   :  { %1898 = vrot.lane.b32.xlu1 %v1866_v15, %s4744_s25 }
 0x496   :  { %v1808_v17 = vpop.permute.xlu1 %1807  ;;  %v1816_v59 = vpop.permute.xlu0 %1815 }
 0x497   :  { %v1867_v45 = vmul.f32 %v1808_v17, %v6501_v31  ;;  %v1869_v29 = vmul.f32 %v1816_v59, %v6508_v54 }
 0x499   :  { %1900 = vrot.lane.b32.xlu0 %v1867_v45, %s4744_s25 }
 0x49a   :  { %v1812_v24 = vpop.permute.xlu1 %1811  ;;  %v1824_v30 = vpop.permute.xlu0 %1823 }
 0x49b   :  { %v1868_v16 = vmul.f32 %v1812_v24, %v6505_v1  ;;  %v1871_v51 = vmul.f32 %v1824_v30, %v6517_v46 }
 0x49d   :  { %1902 = vrot.lane.b32.xlu1 %v1868_v16, %s4744_s25  ;;  %1904 = vrot.lane.b32.xlu0 %v1869_v29, %s4744_s25 }
 0x49e   :  { %v1820_v4 = vpop.permute.xlu1 %1819  ;;  %v1832_v19 = vpop.permute.xlu0 %1831 }
 0x49f   :  { %v1870_v15 = vmul.f32 %v1820_v4, %v6514_v55  ;;  %v1873_v59 = vmul.f32 %v1832_v19, %v6527_v5 }
 0x4a1   :  { %1906 = vrot.lane.b32.xlu1 %v1870_v15, %s4744_s25  ;;  %1908 = vrot.lane.b32.xlu0 %v1871_v51, %s4744_s25 }
 0x4a2   :  { %v1828_v17 = vpop.permute.xlu1 %1827  ;;  %v1840_v45 = vpop.permute.xlu0 %1839 }
 0x4a3   :  { %v1872_v24 = vmul.f32 %v1828_v17, %v6524_v26  ;;  %v1875_v30 = vmul.f32 %v1840_v45, %v6537_v11 }
 0x4a5   :  { %1910 = vrot.lane.b32.xlu1 %v1872_v24, %s4744_s25  ;;  %1912 = vrot.lane.b32.xlu0 %v1873_v59, %s4744_s25 }
 0x4a6   :  { %v1836_v29 = vpop.permute.xlu1 %1835  ;;  %v1848_v16 = vpop.permute.xlu0 %1847 }
 0x4a7   :  { %v1874_v4 = vmul.f32 %v1836_v29, %v6534_v14  ;;  %v1877_v19 = vmul.f32 %v1848_v16, %v6547_v50 }
 0x4a9   :  { %1914 = vrot.lane.b32.xlu1 %v1874_v4, %s4744_s25  ;;  %1916 = vrot.lane.b32.xlu0 %v1875_v30, %s4744_s25 }
 0x4aa   :  { %v1844_v51 = vpop.permute.xlu1 %1843  ;;  %v1856_v15 = vpop.permute.xlu0 %1855 }
 0x4ab   :  { %v1876_v17 = vmul.f32 %v1844_v51, %v6544_v37  ;;  %v1879_v24 = vmul.f32 %v1856_v15, %v6557_v8  ;;  %v9002_v51 = vld [vmem:[#allocation37_spill] sm:$0xff]  ;;  %v9015_v8 = vld [vmem:[#allocation104_spill] sm:$0xff] }
 0x4ad   :  { %1918 = vrot.lane.b32.xlu1 %v1876_v17, %s4744_s25  ;;  %1920 = vrot.lane.b32.xlu0 %v1877_v19, %s4744_s25  ;;  %v1354_v19 = vand.u32 2147483647, %v9002_v51  ;;  %v9003_v17 = vld [vmem:[#allocation53_spill] sm:$0xff] }
 0x4ae   :  { %v1852_v59 = vpop.permute.xlu1 %1851  ;;  %v1864_v29 = vpop.permute.xlu0 %1863  ;;  %v1355_v15 = vand.u32 2147483647, %v9003_v17 }
 0x4af   :  { %v1878_v45 = vmul.f32 %v1852_v59, %v6554_v12  ;;  %v1881_v4 = vmul.f32 %v1864_v29, %v6567_v33  ;;  %v9004_v59 = vld [vmem:[#allocation67_spill] sm:$0xff]  ;;  %v9011_v33 = vld [vmem:[#allocation50_spill] sm:$0xff]  ;;  %v1377_v12 = vmax.f32 %v9009_v6, 0.0 }
 0x4b0   :  { %v9006_v29 = vld [vmem:[#allocation95_spill] sm:$0xff] }
 0x4b1   :  { %1922 = vrot.lane.b32.xlu1 %v1878_v45, %s4744_s25  ;;  %1924 = vrot.lane.b32.xlu0 %v1879_v24, %s4744_s25  ;;  %v1356_v45 = vand.u32 2147483647, %v9004_v59  ;;  %v9005_v24 = vld [vmem:[#allocation80_spill] sm:$0xff] }
 0x4b2   :  { %v1860_v30 = vpop.permute.xlu1 %1859  ;;  %v1357_v23 = vand.u32 2147483647, %v9005_v24 }
 0x4b3   :  { %v1880_v16 = vmul.f32 %v1860_v30, %v6564_v2  ;;  %v1358_v30 = vand.u32 2147483647, %v9006_v29  ;;  %v9017_v2 = vld [vmem:[#allocation132_spill] sm:$0xff] }
 0x4b5   :  { %1926 = vrot.lane.b32.xlu1 %v1880_v16, %s4744_s25  ;;  %1928 = vrot.lane.b32.xlu0 %v1881_v4, %s4744_s25  ;;  %v9007_v16 = vld [vmem:[#allocation107_spill] sm:$0xff] }
 0x4b6   :  { %v1359_v4 = vand.u32 2147483647, %v9007_v16 }
 0x4b9   :  { %2074 = vrot.lane.b32.xlu1 %v1354_v19, %s4742_s3  ;;  %2076 = vrot.lane.b32.xlu0 %v1355_v15, %s4742_s3  ;;  %v1360_v19 = vand.u32 2147483647, %v9008_v25  ;;  %v1361_v15 = vand.u32 2147483647, %v9009_v6 }
 0x4bd   :  { %2078 = vrot.lane.b32.xlu1 %v1356_v45, %s4742_s3  ;;  %2080 = vrot.lane.b32.xlu0 %v1357_v23, %s4742_s3  ;;  %v1362_v45 = vand.u32 2147483647, %v9010_v35  ;;  %v1363_v23 = vand.u32 2147483647, %v9011_v33 }
 0x4c1   :  { %2082 = vrot.lane.b32.xlu1 %v1358_v30, %s4742_s3  ;;  %2084 = vrot.lane.b32.xlu0 %v1359_v4, %s4742_s3  ;;  %v1364_v30 = vand.u32 2147483647, %v9012_v49  ;;  %v1365_v4 = vand.u32 2147483647, %v9013_v53 }
 0x4c5   :  { %2086 = vrot.lane.b32.xlu1 %v1360_v19, %s4742_s3  ;;  %2088 = vrot.lane.b32.xlu0 %v1361_v15, %s4742_s3  ;;  %v1366_v19 = vand.u32 2147483647, %v9014_v42  ;;  %v1367_v15 = vand.u32 2147483647, %v9015_v8 }
 0x4c9   :  { %2090 = vrot.lane.b32.xlu1 %v1362_v45, %s4742_s3  ;;  %2092 = vrot.lane.b32.xlu0 %v1363_v23, %s4742_s3  ;;  %v1368_v45 = vand.u32 2147483647, %v9016_v57  ;;  %v1369_v23 = vand.u32 2147483647, %v9017_v2 }
 0x4cd   :  { %2094 = vrot.lane.b32.xlu1 %v1364_v30, %s4742_s3  ;;  %2096 = vrot.lane.b32.xlu0 %v1365_v4, %s4742_s3  ;;  %v1370_v30 = vmax.f32 %v9002_v51, 0.0  ;;  %v1371_v4 = vmax.f32 %v9003_v17, 0.0 }
 0x4cf   :  { %v2138_v62 = vmul.f32 %v1370_v30, %v6050_v39  ;;  %v2139_v43 = vmul.f32 %v1371_v4, %v6050_v39  ;;  %v1374_v30 = vmax.f32 %v9006_v29, 0.0  ;;  %v1375_v4 = vmax.f32 %v9007_v16, 0.0 }
 0x4d1   :  { %2098 = vrot.lane.b32.xlu1 %v1366_v19, %s4742_s3  ;;  %2100 = vrot.lane.b32.xlu0 %v1367_v15, %s4742_s3  ;;  %v1372_v19 = vmax.f32 %v9004_v59, 0.0  ;;  %v1373_v15 = vmax.f32 %v9005_v24, 0.0 }
 0x4d5   :  { %2102 = vrot.lane.b32.xlu1 %v1368_v45, %s4742_s3  ;;  %2104 = vrot.lane.b32.xlu0 %v1369_v23, %s4742_s3  ;;  %v2140_v45 = vmul.f32 %v1372_v19, %v6050_v39  ;;  %v2141_v23 = vmul.f32 %v1373_v15, %v6050_v39  ;;  %v1376_v19 = vmax.f32 %v9008_v25, 0.0 }
 0x4d7   :  { %v2144_v15 = vmul.f32 %v1376_v19, %v6050_v39 }
 0x4d9   :  { %2170 = vrot.lane.b32.xlu1 %v2138_v62, %s4743_s24  ;;  %2172 = vrot.lane.b32.xlu0 %v2139_v43, %s4743_s24  ;;  %v2142_v62 = vmul.f32 %v1374_v30, %v6050_v39  ;;  %v2143_v43 = vmul.f32 %v1375_v4, %v6050_v39  ;;  %v1379_v30 = vmax.f32 %v9011_v33, 0.0 }
 0x4dd   :  { %2174 = vrot.lane.b32.xlu1 %v2140_v45, %s4743_s24  ;;  %2176 = vrot.lane.b32.xlu0 %v2141_v23, %s4743_s24  ;;  %v2145_v45 = vmul.f32 %v1377_v12, %v6050_v39  ;;  %v1378_v23 = vmax.f32 %v9010_v35, 0.0  ;;  %v1381_v12 = vmax.f32 %v9013_v53, 0.0  ;;  %v1385_v53 = vmax.f32 %v9017_v2, 0.0 }
 0x4df   :  { %v2146_v4 = vmul.f32 %v1378_v23, %v6050_v39  ;;  %v1382_v23 = vmax.f32 %v9014_v42, 0.0 }
 0x4e1   :  { %2178 = vrot.lane.b32.xlu1 %v2142_v62, %s4743_s24  ;;  %2180 = vrot.lane.b32.xlu0 %v2143_v43, %s4743_s24  ;;  %v2147_v62 = vmul.f32 %v1379_v30, %v6050_v39  ;;  %v1380_v43 = vmax.f32 %v9012_v49, 0.0  ;;  %v1383_v30 = vmax.f32 %v9015_v8, 0.0 }
 0x4e3   :  { %v2148_v19 = vmul.f32 %v1380_v43, %v6050_v39  ;;  %v1384_v43 = vmax.f32 %v9016_v57, 0.0 }
 0x4e5   :  { %2182 = vrot.lane.b32.xlu1 %v2144_v15, %s4743_s24  ;;  %2184 = vrot.lane.b32.xlu0 %v2145_v45, %s4743_s24  ;;  %v2149_v15 = vmul.f32 %v1381_v12, %v6050_v39  ;;  %v4749_v45 = vmov 8   ;;  %v2152_v12 = vmul.f32 %v1384_v43, %v6050_v39 }
 0x4e6   :  { %4520 = vset.pattern.permute.xlu1 %v4749_v45  ;;  %4519 = vset.pattern.permute.xlu0 %v4749_v45 }
 0x4e9   :  { %2186 = vrot.lane.b32.xlu1 %v2146_v4, %s4743_s24  ;;  %2188 = vrot.lane.b32.xlu0 %v2147_v62, %s4743_s24  ;;  %v2150_v4 = vmul.f32 %v1382_v23, %v6050_v39  ;;  %v2151_v62 = vmul.f32 %v1383_v30, %v6050_v39 }
 0x4ed   :  { %2190 = vrot.lane.b32.xlu1 %v2148_v19, %s4743_s24  ;;  %2192 = vrot.lane.b32.xlu0 %v2149_v15, %s4743_s24  ;;  %v2153_v19 = vmul.f32 %v1385_v53, %v6050_v39  ;;  %v1451_v39 = vmul.f32 %v6471_v61, %v6501_v31  ;;  %v1454_v61 = vmul.f32 %v6469_v60, %v6514_v55 }
 0x4f1   :  { %2194 = vrot.lane.b32.xlu1 %v2150_v4, %s4743_s24  ;;  %2196 = vrot.lane.b32.xlu0 %v2151_v62, %s4743_s24 }
 0x4f5   :  { %2198 = vrot.lane.b32.xlu1 %v2152_v12, %s4743_s24  ;;  %2200 = vrot.lane.b32.xlu0 %v2153_v19, %s4743_s24  ;;  %v1450_v19 = vmul.f32 %v6431_v63, %v6486_v48 }
 0x507   :  { %v1899_v15 = vpop.permute.xlu1 %1898 }
 0x50b   :  { %v1901_v45 = vpop.permute.xlu0 %1900 }
 0x50f   :  { %v1903_v23 = vpop.permute.xlu1 %1902  ;;  %v1905_v30 = vpop.permute.xlu0 %1904 }
 0x513   :  { %v1907_v8 = vpop.permute.xlu1 %1906  ;;  %v6815_v2 = vpop.permute.xlu0 %1908 }
 0x514   :  { %9018 = vst [vmem:[#allocation59_spill] sm:$0xff] %v6815_v2 }
 0x517   :  { %v6817_v4 = vpop.permute.xlu1 %1910  ;;  %v6819_v62 = vpop.permute.xlu0 %1912 }
 0x518   :  { %9019 = vst [vmem:[#allocation73_spill] sm:$0xff] %v6819_v62  ;;  %v1452_v62 = vmul.f32 %v6463_v36, %v6505_v1  ;;  %v1455_v36 = vmul.f32 %v6473_v32, %v6517_v46  ;;  %v1470_v46 = vadd.f32 %v1454_v61, %v9006_v29  ;;  %v9030_v61 = vld [vmem:[#allocation62_spill] sm:$0xff] }
 0x51a   :  { %v1468_v1 = vadd.f32 %v1452_v62, %v9004_v59  ;;  %v1459_v59 = vmul.f32 %v6491_v27, %v6537_v11  ;;  %v1461_v11 = vmul.f32 %v6494_v13, %v6547_v50  ;;  %v9027_v62 = vld [vmem:[#allocation77_spill] sm:$0xff] }
 0x51b   :  { %v6821_v57 = vpop.permute.xlu1 %1914  ;;  %v6823_v43 = vpop.permute.xlu0 %1916 }
 0x51c   :  { %9020 = vst [vmem:[#allocation86_spill] sm:$0xff] %v6821_v57  ;;  %9021 = vst [vmem:[#allocation101_spill] sm:$0xff] %v6823_v43  ;;  %v1466_v57 = vadd.f32 %v1450_v19, %v9002_v51 }
 0x51e   :  { %v1626_v43 = vadd.f32 %v6593_v18, %v1466_v57  ;;  %v1628_v18 = vadd.f32 %v6595_v20, %v1468_v1  ;;  %v1471_v20 = vadd.f32 %v1455_v36, %v9007_v16  ;;  %v1475_v16 = vadd.f32 %v1459_v59, %v9011_v33  ;;  %v9031_v36 = vld [vmem:[#allocation9_spill] sm:$0xff] }
 0x51f   :  { %v6825_v53 = vpop.permute.xlu1 %1918  ;;  %v6827_v12 = vpop.permute.xlu0 %1920 }
 0x520   :  { %9022 = vst [vmem:[#allocation113_spill] sm:$0xff] %v6825_v53  ;;  %9023 = vst [vmem:[#allocation126_spill] sm:$0xff] %v6827_v12  ;;  %v1453_v53 = vmul.f32 %v6467_v28, %v6508_v54  ;;  %v1467_v12 = vadd.f32 %v1451_v39, %v9003_v17  ;;  %v1786_v28 = vadd.f32 %v6671_v40, %v1626_v43 }
 0x521   :  { %v1456_v40 = vmul.f32 %v6477_v38, %v6524_v26  ;;  %v1457_v17 = vmul.f32 %v6481_v3, %v6527_v5  ;;  %v1631_v5 = vadd.f32 %v6601_v0, %v1471_v20  ;;  %v1477_v43 = vadd.f32 %v1461_v11, %v9027_v62  ;;  %v9033_v20 = vld [vmem:[#allocation73_spill] sm:$0xff] }
 0x522   :  { %v1627_v31 = vadd.f32 %v6591_v22, %v1467_v12  ;;  %v1469_v39 = vadd.f32 %v1453_v53, %v9005_v24  ;;  %v6858_v57 = vadd.f32 %v1899_v15, %v1786_v28  ;;  %v1460_v22 = vmul.f32 %v6475_v7, %v6544_v37  ;;  %v9028_v53 = vld [vmem:[#allocation30_spill] sm:$0xff]  ;;  %v9029_v12 = vld [vmem:[#allocation8_spill] sm:$0xff] }
 0x523   :  { %v6833_v42 = vpop.permute.xlu1 %1922  ;;  %v6835_v2 = vpop.permute.xlu0 %1924  ;;  %v1630_v7 = vadd.f32 %v6599_v41, %v1470_v46  ;;  %v1472_v27 = vadd.f32 %v1456_v40, %v9008_v25  ;;  %v1791_v0 = vadd.f32 %v6681_v44, %v1631_v5  ;;  %v9024_v25 = vld [vmem:[#allocation59_spill] sm:$0xff]  ;;  %v9025_v44 = vld [vmem:[#allocation16_spill] sm:$0xff] }
 0x524   :  { %v1787_v54 = vadd.f32 %v6673_v9, %v1627_v31  ;;  %v1629_v55 = vadd.f32 %v6597_v58, %v1469_v39  ;;  %v1788_v9 = vadd.f32 %v6675_v34, %v1628_v18  ;;  %v1458_v58 = vmul.f32 %v6488_v47, %v6534_v14 }
 0x525   :  { %v1978_v37 = vmin.f32 %v6858_v57, 0.0  ;;  %v1476_v14 = vadd.f32 %v1460_v22, %v9012_v49  ;;  %v1790_v41 = vadd.f32 %v6679_v56, %v1630_v7  ;;  %v1632_v15 = vadd.f32 %v6603_v10, %v1472_v27  ;;  %v9040_v27 = vld [vmem:[#allocation90_spill] sm:$0xff] }
 0x526   :  { %v6866_v32 = vadd.f32 %v1901_v45, %v1787_v54  ;;  %v1789_v24 = vadd.f32 %v6677_v21, %v1629_v55  ;;  %v6883_v38 = vadd.f32 %v1903_v23, %v1788_v9  ;;  %v1473_v21 = vadd.f32 %v1457_v17, %v9009_v6  ;;  %v9034_v17 = vld [vmem:[#allocation14_spill] sm:$0xff] }
 0x527   :  { %v6844_v63 = vpop.permute.xlu1 %1926  ;;  %v6846_v48 = vpop.permute.xlu0 %1928  ;;  %v1474_v29 = vadd.f32 %v1458_v58, %v9010_v35  ;;  %v1994_v45 = vmul.f32 1.442695, %v1978_v37  ;;  %v6904_v50 = vadd.f32 %v1907_v8, %v1790_v41  ;;  %v6913_v33 = vadd.f32 %v9024_v25, %v1791_v0  ;;  %v9035_v58 = vld [vmem:[#allocation27_spill] sm:$0xff]  ;;  %v9037_v37 = vld [vmem:[#allocation56_spill] sm:$0xff]  ;;  %v9041_v41 = vld [vmem:[#allocation70_spill] sm:$0xff] }
 0x528   :  { %v1979_v3 = vmin.f32 %v6866_v32, 0.0  ;;  %v6891_v47 = vadd.f32 %v1905_v30, %v1789_v24  ;;  %v1980_v23 = vmin.f32 %v6883_v38, 0.0  ;;  %v1633_v56 = vadd.f32 %v6605_v52, %v1473_v21  ;;  %v9026_v30 = vld [vmem:[#allocation6_spill] sm:$0xff]  ;;  %v9032_v52 = vld [vmem:[#allocation43_spill] sm:$0xff] }
 0x529   :  { %v1462_v10 = vmul.f32 %v9026_v30, %v9025_v44  ;;  %v1792_v8 = vadd.f32 %v9028_v53, %v1632_v15  ;;  %v1634_v19 = vadd.f32 %v9029_v12, %v1474_v29  ;;  %v1635_v31 = vadd.f32 %v9030_v61, %v1475_v16  ;;  %v9036_v24 = vld [vmem:[#allocation91_spill] sm:$0xff]  ;;  %v9044_v44 = vld [vmem:[#allocation101_spill] sm:$0xff]  ;;  %v9048_v12 = vld [vmem:[#allocation36_spill] sm:$0xff] }
 0x52a   :  { %v1996_v6 = vmul.f32 1.442695, %v1979_v3  ;;  %v1981_v35 = vmin.f32 %v6891_v47, 0.0  ;;  %v1636_v1 = vadd.f32 %v9031_v36, %v1476_v14  ;;  %v1793_v28 = vadd.f32 %v9032_v52, %v1633_v56  ;;  %v9039_v3 = vld [vmem:[#allocation7_spill] sm:$0xff]  ;;  %v9050_v36 = vld [vmem:[#allocation104_spill] sm:$0xff]  ;;  %v9051_v52 = vld [vmem:[#allocation113_spill] sm:$0xff] }
 0x52b   :  { %v6860_v51 = vpop.permute.xlu1 %2074  ;;  %v6862_v60 = vpop.permute.xlu0 %2076  ;;  %4568 = vpow2.f32 %v1994_v45  ;;  %v1998_v39 = vmul.f32 1.442695, %v1980_v23  ;;  %v1982_v54 = vmin.f32 %v6904_v50, 0.0  ;;  %v6925_v18 = vadd.f32 %v6817_v4, %v1792_v8  ;;  %v9038_v4 = vld [vmem:[#allocation12_spill] sm:$0xff]  ;;  %v9042_v29 = vld [vmem:[#allocation83_spill] sm:$0xff]  ;;  %v9043_v45 = vld [vmem:[#allocation86_spill] sm:$0xff] }
 0x52c   :  { %4570 = vpow2.f32 %v1996_v6  ;;  %v2000_v22 = vmul.f32 1.442695, %v1981_v35  ;;  %v1983_v40 = vmin.f32 %v6913_v33, 0.0  ;;  %v6933_v9 = vadd.f32 %v9033_v20, %v1793_v28  ;;  %v9047_v8 = vld [vmem:[#allocation94_spill] sm:$0xff]  ;;  %v9049_v61 = vld [vmem:[#allocation15_spill] sm:$0xff] }
 0x52d   :  { %v1464_v59 = vmul.f32 %v9035_v58, %v9034_v17  ;;  %v1478_v7 = vadd.f32 %v1462_v10, %v9036_v24  ;;  %v1794_v5 = vadd.f32 %v9037_v37, %v1634_v19  ;;  %v1463_v11 = vmul.f32 %v9039_v3, %v9038_v4  ;;  %v9045_v10 = vld [vmem:[#allocation117_spill] sm:$0xff] }
 0x52e   :  { %v1637_v14 = vadd.f32 %v9040_v27, %v1477_v43  ;;  %v1795_v21 = vadd.f32 %v9041_v41, %v1635_v31  ;;  %v1796_v16 = vadd.f32 %v9042_v29, %v1636_v1  ;;  %4572 = vpow2.f32 %v1998_v39  ;;  %v9046_v43 = vld [vmem:[#allocation98_spill] sm:$0xff]  ;;  %v9053_v58 = vld [vmem:[#allocation13_spill] sm:$0xff] }
 0x52f   :  { %v6885_v26 = vpop.permute.xlu1 %2078  ;;  %v6887_v34 = vpop.permute.xlu0 %2080  ;;  %v2002_v0 = vmul.f32 1.442695, %v1982_v54  ;;  %v1984_v15 = vmin.f32 %v6925_v18, 0.0  ;;  %v6946_v23 = vadd.f32 %v9043_v45, %v1794_v5  ;;  %4574 = vpow2.f32 %v2000_v22  ;;  %v9052_v22 = vld [vmem:[#allocation126_spill] sm:$0xff] }
 0x530   :  { %v2004_v35 = vmul.f32 1.442695, %v1983_v40  ;;  %v1985_v25 = vmin.f32 %v6933_v9, 0.0  ;;  %v6954_v30 = vadd.f32 %v9044_v44, %v1795_v21  ;;  %v1480_v62 = vadd.f32 %v1464_v59, %v9045_v10  ;;  %v9054_v5 = vld [vmem:[#allocation110_spill] sm:$0xff]  ;;  %v9057_v21 = vld [vmem:[#allocation123_spill] sm:$0xff] }
 0x531   :  { %v1797_v53 = vadd.f32 %v9046_v43, %v1637_v14  ;;  %v1465_v19 = vmul.f32 %v9048_v12, %v9047_v8  ;;  %v1638_v31 = vadd.f32 %v9049_v61, %v1478_v7  ;;  %v1479_v1 = vadd.f32 %v1463_v11, %v9050_v36  ;;  %v9055_v11 = vld [vmem:[#allocation89_spill] sm:$0xff]  ;;  %v9056_v14 = vld [vmem:[#allocation132_spill] sm:$0xff]  ;;  %v9058_v44 = vld [vmem:[#allocation23_spill] sm:$0xff] }
 0x532   :  { %v6963_v28 = vadd.f32 %v9051_v52, %v1796_v16  ;;  %4576 = vpow2.f32 %v2002_v0  ;;  %v2006_v39 = vmul.f32 1.442695, %v1984_v15  ;;  %v1986_v54 = vmin.f32 %v6946_v23, 0.0  ;;  %v9059_v8 = vld [vmem:[#allocation33_spill] sm:$0xff]  ;;  %v9060_v36 = vld [vmem:[#allocation46_spill] sm:$0xff] }
 0x533   :  { %v6906_v13 = vpop.permute.xlu1 %2082  ;;  %v6908_v49 = vpop.permute.xlu0 %2084  ;;  %v6967_v40 = vadd.f32 %v9052_v22, %v1797_v53  ;;  %v1639_v59 = vadd.f32 %v9053_v58, %v1479_v1  ;;  %4578 = vpow2.f32 %v2004_v35  ;;  %v2008_v24 = vmul.f32 1.442695, %v1985_v25 }
 0x534   :  { %v1987_v7 = vmin.f32 %v6954_v30, 0.0  ;;  %v1798_v4 = vadd.f32 %v9054_v5, %v1638_v31  ;;  %v1640_v27 = vadd.f32 %v9055_v11, %v1480_v62  ;;  %v1481_v41 = vadd.f32 %v1465_v19, %v9056_v14 }
 0x535   :  { %v4569_v37 = vpop.eup %4568  ;;  %v1799_v29 = vadd.f32 %v9057_v21, %v1639_v59  ;;  %v1988_v16 = vmin.f32 %v6963_v28, 0.0  ;;  %4580 = vpow2.f32 %v2006_v39  ;;  %v2010_v0 = vmul.f32 1.442695, %v1986_v54 }
 0x536   :  { %v4571_v3 = vpop.eup %4570  ;;  %v1989_v15 = vmin.f32 %v6967_v40, 0.0  ;;  %v6982_v45 = vadd.f32 %v6833_v42, %v1798_v4  ;;  %v1641_v10 = vadd.f32 %v9058_v44, %v1481_v41  ;;  %4582 = vpow2.f32 %v2008_v24 }
 0x537   :  { %v6927_v55 = vpop.permute.xlu1 %2086  ;;  %v6929_v46 = vpop.permute.xlu0 %2088  ;;  %v2012_v62 = vmul.f32 1.442695, %v1987_v7  ;;  %v6990_v43 = vadd.f32 %v6835_v2, %v1799_v29  ;;  %v1800_v12 = vadd.f32 %v9059_v8, %v1640_v27  ;;  %v4422_v19 = vadd.f32 -1.0, %v4569_v37 }
 0x538   :  { %v4573_v53 = vpop.eup %4572  ;;  %v4423_v61 = vadd.f32 -1.0, %v4571_v3  ;;  %v1801_v42 = vadd.f32 %v9060_v36, %v1641_v10  ;;  %v2014_v1 = vmul.f32 1.442695, %v1988_v16  ;;  %vm1962_vm6 = vcmp.gt.f32.partialorder %v6858_v57, 0.0 }
 0x539   :  { %v4575_v31 = vpop.eup %4574  ;;  %4584 = vpow2.f32 %v2010_v0  ;;  %v2016_v52 = vmul.f32 1.442695, %v1989_v15  ;;  %v1990_v39 = vmin.f32 %v6982_v45, 0.0  ;;  %v6997_v54 = vadd.f32 %v6844_v63, %v1800_v12 }
 0x53a   :  { %4586 = vpow2.f32 %v2012_v62  ;;  %v1991_v58 = vmin.f32 %v6990_v43, 0.0  ;;  %v7005_v59 = vadd.f32 %v6846_v48, %v1801_v42  ;;  %vm1963_vm7 = vcmp.gt.f32.partialorder %v6866_v32, 0.0 }
 0x53b   :  { %v6948_v56 = vpop.permute.xlu1 %2090  ;;  %v6950_v6 = vpop.permute.xlu0 %2092  ;;  %v2042_v7 = vsel %vm1962_vm6, %v6858_v57, %v4422_v19  ;;  %v2043_v37 = vsel %vm1963_vm7, %v6866_v32, %v4423_v61  ;;  %v4424_v5 = vadd.f32 -1.0, %v4573_v53  ;;  %v4425_v63 = vadd.f32 -1.0, %v4575_v31 }
 0x53c   :  { %v4577_v24 = vpop.eup %4576  ;;  %4588 = vpow2.f32 %v2014_v1  ;;  %v2122_v3 = vmul.f32 %v6860_v51, %v2042_v7  ;;  %v2123_v11 = vmul.f32 %v6862_v60, %v2043_v37  ;;  %vm1964_vm8 = vcmp.gt.f32.partialorder %v6883_v38, 0.0 }
 0x53d   :  { %v4579_v4 = vpop.eup %4578  ;;  %4590 = vpow2.f32 %v2016_v52  ;;  %v2018_v48 = vmul.f32 1.442695, %v1990_v39  ;;  %v1992_v27 = vmin.f32 %v6997_v54, 0.0  ;;  %vm1965_vm9 = vcmp.gt.f32.partialorder %v6891_v47, 0.0 }
 0x53e   :  { %v2020_v41 = vmul.f32 1.442695, %v1991_v58  ;;  %v1993_v32 = vmin.f32 %v7005_v59, 0.0  ;;  %v2044_v51 = vsel %vm1964_vm8, %v6883_v38, %v4424_v5  ;;  %v2045_v60 = vsel %vm1965_vm9, %v6891_v47, %v4425_v63 }
 0x53f   :  { %v6969_v20 = vpop.permute.xlu1 %2094  ;;  %v6971_v17 = vpop.permute.xlu0 %2096  ;;  %v4426_v0 = vadd.f32 -1.0, %v4577_v24  ;;  %v4427_v15 = vadd.f32 -1.0, %v4579_v4  ;;  %v2124_v10 = vmul.f32 %v6885_v26, %v2044_v51  ;;  %v2125_v62 = vmul.f32 %v6887_v34, %v2045_v60 }
 0x540   :  { %v4581_v16 = vpop.eup %4580  ;;  %4592 = vpow2.f32 %v2018_v48  ;;  %v2022_v12 = vmul.f32 1.442695, %v1992_v27  ;;  %vm1966_vm10 = vcmp.gt.f32.partialorder %v6904_v50, 0.0  ;;  %vm1967_vm11 = vcmp.gt.f32.partialorder %v6913_v33, 0.0 }
 0x541   :  { %v4583_v44 = vpop.eup %4582  ;;  %4594 = vpow2.f32 %v2020_v41  ;;  %v2024_v19 = vmul.f32 1.442695, %v1993_v32  ;;  %v2046_v34 = vsel %vm1966_vm10, %v6904_v50, %v4426_v0  ;;  %v2047_v36 = vsel %vm1967_vm11, %v6913_v33, %v4427_v15 }
 0x542   :  { %v4428_v42 = vadd.f32 -1.0, %v4581_v16  ;;  %v4429_v1 = vadd.f32 -1.0, %v4583_v44  ;;  %v2126_v39 = vmul.f32 %v6906_v13, %v2046_v34  ;;  %v2127_v58 = vmul.f32 %v6908_v49, %v2047_v36 }
 0x543   :  { %v6984_v35 = vpop.permute.xlu1 %2098  ;;  %v6986_v25 = vpop.permute.xlu0 %2100  ;;  %4596 = vpow2.f32 %v2022_v12  ;;  %vm1968_vm12 = vcmp.gt.f32.partialorder %v6925_v18, 0.0  ;;  %vm1969_vm13 = vcmp.gt.f32.partialorder %v6933_v9, 0.0  ;;  %vm1970_vm14 = vcmp.gt.f32.partialorder %v6946_v23, 0.0 }
 0x544   :  { %v4585_v31 = vpop.eup %4584  ;;  %4598 = vpow2.f32 %v2024_v19  ;;  %v2048_v49 = vsel %vm1968_vm12, %v6925_v18, %v4428_v42  ;;  %v2049_v4 = vsel %vm1969_vm13, %v6933_v9, %v4429_v1  ;;  %vm1971_vm15 = vcmp.gt.f32.partialorder %v6954_v30, 0.0 }
 0x545   :  { %v4587_v52 = vpop.eup %4586  ;;  %v2128_v48 = vmul.f32 %v6927_v55, %v2048_v49  ;;  %v2129_v27 = vmul.f32 %v6929_v46, %v2049_v4  ;;  %vm1972_vm0 = vcmp.gt.f32.partialorder %v6963_v28, 0.0  ;;  %vm1973_vm1 = vcmp.gt.f32.partialorder %v6967_v40, 0.0 }
 0x546   :  { %v4589_v5 = vpop.eup %4588  ;;  %vm1974_vm2 = vcmp.gt.f32.partialorder %v6982_v45, 0.0  ;;  %vm1975_vm3 = vcmp.gt.f32.partialorder %v6990_v43, 0.0  ;;  %vm1976_vm4 = vcmp.gt.f32.partialorder %v6997_v54, 0.0  ;;  %vm1977_vm6 = vcmp.gt.f32.partialorder %v7005_v59, 0.0 }
 0x547   :  { %v6999_v2 = vpop.permute.xlu1 %2102  ;;  %v7001_v22 = vpop.permute.xlu0 %2104  ;;  %v4432_v46 = vadd.f32 -1.0, %v4589_v5 }
 0x548   :  { %v4591_v13 = vpop.eup %4590 }
 0x549   :  { %v4433_v16 = vadd.f32 -1.0, %v4591_v13 }
 0x54b   :  { %v2171_v14 = vpop.permute.xlu1 %2170  ;;  %v2173_v57 = vpop.permute.xlu0 %2172 }
 0x54c   :  { %v2218_v21 = vadd.f32 %v2171_v14, %v2122_v3  ;;  %v2219_v29 = vadd.f32 %v2173_v57, %v2123_v11  ;;  %v4430_v3 = vadd.f32 -1.0, %v4585_v31  ;;  %v4431_v11 = vadd.f32 -1.0, %v4587_v52 }
 0x54e   :  { %v2234_v53 = vsel %vm1244_vm5, %v2218_v21, 0.0  ;;  %v2237_v8 = vsel %vm1244_vm5, %v2219_v29, 0.0  ;;  %v4593_v21 = vpop.eup %4592  ;;  %v2050_v29 = vsel %vm1970_vm14, %v6946_v23, %v4430_v3  ;;  %v2051_v55 = vsel %vm1971_vm15, %v6954_v30, %v4431_v11  ;;  %v7093_v11 = vld [vmem:[%s8650_s0 + $0x18] sm:$0xff] }
 0x54f   :  { %2235 = vadd.xlane.f32.xlu1 %v2234_v53  ;;  %v2175_v38 = vpop.permute.xlu1 %2174  ;;  %2238 = vadd.xlane.f32.xlu0 %v2237_v8  ;;  %v2177_v47 = vpop.permute.xlu0 %2176  ;;  %v2130_v60 = vmul.f32 %v6948_v56, %v2050_v29  ;;  %v2131_v0 = vmul.f32 %v6950_v6, %v2051_v55  ;;  %v2052_v8 = vsel %vm1972_vm0, %v6963_v28, %v4432_v46  ;;  %v4434_v6 = vadd.f32 -1.0, %v4593_v21  ;;  %v7148_v29 = vld [vmem:[%s8650_s0 + $0x48] sm:$0xff]  ;;  %v7155_v55 = vld [vmem:[%s8650_s0 + $0x58] sm:$0xff] }
 0x550   :  { %v2220_v61 = vadd.f32 %v2175_v38, %v2124_v10  ;;  %v2221_v26 = vadd.f32 %v2177_v47, %v2125_v62  ;;  %v4595_v51 = vpop.eup %4594  ;;  %v2053_v56 = vsel %vm1973_vm1, %v6967_v40, %v4433_v16  ;;  %v2132_v47 = vmul.f32 %v6969_v20, %v2052_v8  ;;  %v7162_v46 = vld [vmem:[%s8650_s0 + $0x68] sm:$0xff]  ;;  %v7169_v16 = vld [vmem:[%s8650_s0 + $0x78] sm:$0xff] }
 0x551   :  { %v4597_v53 = vpop.eup %4596  ;;  %v4435_v12 = vadd.f32 -1.0, %v4595_v51  ;;  %v2133_v19 = vmul.f32 %v6971_v17, %v2053_v56  ;;  %v2054_v36 = vsel %vm1974_vm2, %v6982_v45, %v4434_v6  ;;  %v4750_v21 = vmov 9  }
 0x552   :  { %v2240_v24 = vsel %vm1244_vm5, %v2220_v61, 0.0  ;;  %v2243_v7 = vsel %vm1244_vm5, %v2221_v26, 0.0  ;;  %v4599_v38 = vpop.eup %4598  ;;  %v4436_v42 = vadd.f32 -1.0, %v4597_v53  ;;  %v2134_v1 = vmul.f32 %v6984_v35, %v2054_v36 }
 0x553   :  { %v2179_v37 = vpop.permute.xlu1 %2178  ;;  %2241 = vadd.xlane.f32.xlu0 %v2240_v24  ;;  %2244 = vadd.xlane.f32.xlu1 %v2243_v7  ;;  %v2181_v50 = vpop.permute.xlu0 %2180  ;;  %v2055_v20 = vsel %vm1975_vm3, %v6990_v43, %v4435_v12  ;;  %v4437_v17 = vadd.f32 -1.0, %v4599_v38  ;;  %v4751_v51 = vmov 10  }
 0x554   :  { %v2222_v33 = vadd.f32 %v2179_v37, %v2126_v39  ;;  %v2223_v63 = vadd.f32 %v2181_v50, %v2127_v58  ;;  %v2135_v52 = vmul.f32 %v6986_v25, %v2055_v20  ;;  %v2056_v37 = vsel %vm1976_vm4, %v6997_v54, %v4436_v42 }
 0x555   :  { %v2057_v35 = vsel %vm1977_vm6, %v7005_v59, %v4437_v17  ;;  %v2136_v25 = vmul.f32 %v6999_v2, %v2056_v37  ;;  %v7075_v2 = vld [vmem:[%s8650_s0 + $0x8] sm:$0xff]  ;;  %v7087_v59 = vld [vmem:[%s8650_s0] sm:$0xff] }
 0x556   :  { %v2246_v14 = vsel %vm1244_vm5, %v2222_v33, 0.0  ;;  %v2249_v57 = vsel %vm1244_vm5, %v2223_v63, 0.0  ;;  %v2137_v50 = vmul.f32 %v7001_v22, %v2057_v35  ;;  %v7081_v22 = vld [vmem:[%s8650_s0 + $0x10] sm:$0xff] }
 0x557   :  { %v2183_v41 = vpop.permute.xlu1 %2182  ;;  %2247 = vadd.xlane.f32.xlu0 %v2246_v14  ;;  %2250 = vadd.xlane.f32.xlu1 %v2249_v57  ;;  %v2185_v32 = vpop.permute.xlu0 %2184  ;;  %v7111_v14 = vld [vmem:[%s8650_s0 + $0x50] sm:$0xff]  ;;  %v7117_v57 = vld [vmem:[%s8650_s0 + $0x28] sm:$0xff] }
 0x558   :  { %v2224_v18 = vadd.f32 %v2183_v41, %v2128_v48  ;;  %v2225_v9 = vadd.f32 %v2185_v32, %v2129_v27  ;;  %v7099_v48 = vld [vmem:[%s8650_s0 + $0x40] sm:$0xff]  ;;  %v7129_v32 = vld [vmem:[%s8650_s0 + $0x30] sm:$0xff] }
 0x559   :  { %v7105_v27 = vld [vmem:[%s8650_s0 + $0x20] sm:$0xff] }
 0x55a   :  { %v2252_v15 = vsel %vm1244_vm5, %v2224_v18, 0.0  ;;  %v2255_v44 = vsel %vm1244_vm5, %v2225_v9, 0.0  ;;  %v7123_v41 = vld [vmem:[%s8650_s0 + $0x60] sm:$0xff]  ;;  %v7135_v18 = vld [vmem:[%s8650_s0 + $0x70] sm:$0xff]  ;;  %v7141_v9 = vld [vmem:[%s8650_s0 + $0x38] sm:$0xff] }
 0x55b   :  { %v2187_v10 = vpop.permute.xlu1 %2186  ;;  %2253 = vadd.xlane.f32.xlu0 %v2252_v15  ;;  %2256 = vadd.xlane.f32.xlu1 %v2255_v44  ;;  %v2189_v62 = vpop.permute.xlu0 %2188 }
 0x55c   :  { %v2226_v23 = vadd.f32 %v2187_v10, %v2130_v60  ;;  %v2227_v30 = vadd.f32 %v2189_v62, %v2131_v0 }
 0x55e   :  { %v2258_v61 = vsel %vm1244_vm5, %v2226_v23, 0.0  ;;  %v2261_v26 = vsel %vm1244_vm5, %v2227_v30, 0.0 }
 0x55f   :  { %v2191_v31 = vpop.permute.xlu1 %2190  ;;  %2259 = vadd.xlane.f32.xlu0 %v2258_v61  ;;  %2262 = vadd.xlane.f32.xlu1 %v2261_v26  ;;  %v2193_v34 = vpop.permute.xlu0 %2192 }
 0x560   :  { %v2228_v28 = vadd.f32 %v2191_v31, %v2132_v47  ;;  %v2229_v40 = vadd.f32 %v2193_v34, %v2133_v19 }
 0x562   :  { %v2264_v39 = vsel %vm1244_vm5, %v2228_v28, 0.0  ;;  %v2267_v58 = vsel %vm1244_vm5, %v2229_v40, 0.0 }
 0x563   :  { %v2195_v24 = vpop.permute.xlu1 %2194  ;;  %2265 = vadd.xlane.f32.xlu0 %v2264_v39  ;;  %2268 = vadd.xlane.f32.xlu1 %v2267_v58  ;;  %v2197_v7 = vpop.permute.xlu0 %2196 }
 0x564   :  { %v2230_v45 = vadd.f32 %v2195_v24, %v2134_v1  ;;  %v2231_v43 = vadd.f32 %v2197_v7, %v2135_v52  ;;  %v9079_v52 = vld [vmem:[#allocation31_spill] sm:$0xff] }
 0x565   :  { %v7239_v39 = vand.u32 2147483647, %v9079_v52 }
 0x566   :  { %v2270_v5 = vsel %vm1244_vm5, %v2230_v45, 0.0  ;;  %v2273_v33 = vsel %vm1244_vm5, %v2231_v43, 0.0 }
 0x567   :  { %v2199_v63 = vpop.permute.xlu1 %2198  ;;  %2271 = vadd.xlane.f32.xlu0 %v2270_v5  ;;  %2274 = vadd.xlane.f32.xlu1 %v2273_v33  ;;  %v2201_v13 = vpop.permute.xlu0 %2200  ;;  %v9082_v5 = vld [vmem:[#allocation44_spill] sm:$0xff] }
 0x568   :  { %v2232_v49 = vadd.f32 %v2199_v63, %v2136_v25  ;;  %v2233_v4 = vadd.f32 %v2201_v13, %v2137_v50  ;;  %v7254_v33 = vand.u32 2147483647, %v9082_v5 }
 0x56a   :  { %v2276_v3 = vsel %vm1244_vm5, %v2232_v49, 0.0  ;;  %v2279_v54 = vsel %vm1244_vm5, %v2233_v4, 0.0  ;;  %v9083_v4 = vld [vmem:[#allocation57_spill] sm:$0xff] }
 0x56b   :  { %2277 = vadd.xlane.f32.xlu0 %v2276_v3  ;;  %2280 = vadd.xlane.f32.xlu1 %v2279_v54  ;;  %v7258_v3 = vand.u32 2147483647, %v9083_v4  ;;  %v9084_v54 = vld [vmem:[#allocation71_spill] sm:$0xff] }
 0x57c   :  { %2380 = vperm.xlu1 %4520, %v7075_v2  }
 0x580   :  { %2384 = vperm.xlu1 %4520, %v7081_v22  }
 0x581   :  { %2376 = vperm.xlu0 %4519, %v7087_v59  }
 0x584   :  { %2388 = vperm.xlu1 %4520, %v7093_v11  }
 0x585   :  { %2408 = vperm.xlu0 %4519, %v7099_v48  }
 0x588   :  { %2392 = vperm.xlu1 %4520, %v7105_v27  }
 0x589   :  { %2416 = vperm.xlu0 %4519, %v7111_v14  }
 0x58c   :  { %2396 = vperm.xlu1 %4520, %v7117_v57  }
 0x58d   :  { %2424 = vperm.xlu0 %4519, %v7123_v41  }
 0x590   :  { %2400 = vperm.xlu1 %4520, %v7129_v32  }
 0x591   :  { %2432 = vperm.xlu0 %4519, %v7135_v18  }
 0x594   :  { %2404 = vperm.xlu1 %4520, %v7141_v9  }
 0x595   :  { %4521 = vset.pattern.permute.xlu0 %v4750_v21 }
 0x596   :  { %2472 = vperm.xlu0 %4521, %v7087_v59  }
 0x598   :  { %2412 = vperm.xlu1 %4520, %v7148_v29  }
 0x59a   :  { %2484 = vperm.xlu0 %4521, %v7093_v11  }
 0x59c   :  { %2420 = vperm.xlu1 %4520, %v7155_v55  }
 0x59e   :  { %2492 = vperm.xlu0 %4521, %v7117_v57  }
 0x5a0   :  { %2428 = vperm.xlu1 %4520, %v7162_v46  }
 0x5a2   :  { %2500 = vperm.xlu0 %4521, %v7141_v9  }
 0x5a4   :  { %2436 = vperm.xlu1 %4520, %v7169_v16  }
 0x5a6   :  { %2508 = vperm.xlu0 %4521, %v7148_v29  }
 0x5a8   :  { %4522 = vset.pattern.permute.xlu1 %v4750_v21  ;;  %v7261_v21 = vand.u32 2147483647, %v9084_v54 }
 0x5a9   :  { %2476 = vperm.xlu1 %4522, %v7075_v2  }
 0x5aa   :  { %2516 = vperm.xlu0 %4521, %v7155_v55  }
 0x5ad   :  { %2480 = vperm.xlu1 %4522, %v7081_v22  }
 0x5ae   :  { %2524 = vperm.xlu0 %4521, %v7162_v46  }
 0x5b1   :  { %2488 = vperm.xlu1 %4522, %v7105_v27  }
 0x5b2   :  { %2532 = vperm.xlu0 %4521, %v7169_v16  }
 0x5b5   :  { %2496 = vperm.xlu1 %4522, %v7129_v32  }
 0x5b6   :  { %4524 = vset.pattern.permute.xlu0 %v4751_v51 }
 0x5b9   :  { %2504 = vperm.xlu1 %4522, %v7099_v48  }
 0x5bd   :  { %2512 = vperm.xlu1 %4522, %v7111_v14  }
 0x5c1   :  { %2520 = vperm.xlu1 %4522, %v7123_v41  }
 0x5c5   :  { %2528 = vperm.xlu1 %4522, %v7135_v18  }
 0x5c9   :  { %4523 = vset.pattern.permute.xlu1 %v4751_v51 }
 0x5dc   :  { %v7184_v60 = vpop.xlane.xlu1 %2235  ;;  %v7186_v0 = vpop.xlane.xlu0 %2238 }
 0x5dd   :  { %9061 = vst [vmem:[#allocation37_spill] sm:$0xff] %v7184_v60  ;;  %9062 = vst [vmem:[#allocation53_spill] sm:$0xff] %v7186_v0 }
 0x5e0   :  { %v7188_v15 = vpop.xlane.xlu1 %2244  ;;  %v7190_v44 = vpop.xlane.xlu0 %2241 }
 0x5e1   :  { %9063 = vst [vmem:[#allocation67_spill] sm:$0xff] %v7188_v15  ;;  %9064 = vst [vmem:[#allocation80_spill] sm:$0xff] %v7190_v44  ;;  %v9097_v15 = vld [vmem:[#allocation115_spill] sm:$0xff] }
 0x5e4   :  { %v7192_v10 = vpop.xlane.xlu1 %2250  ;;  %v7194_v62 = vpop.xlane.xlu0 %2247 }
 0x5e5   :  { %9065 = vst [vmem:[#allocation95_spill] sm:$0xff] %v7192_v10  ;;  %9066 = vst [vmem:[#allocation107_spill] sm:$0xff] %v7194_v62  ;;  %v9093_v10 = vld [vmem:[#allocation87_spill] sm:$0xff] }
 0x5e8   :  { %v7196_v23 = vpop.xlane.xlu1 %2256  ;;  %v7198_v30 = vpop.xlane.xlu0 %2253 }
 0x5e9   :  { %9067 = vst [vmem:[#allocation120_spill] sm:$0xff] %v7196_v23  ;;  %9068 = vst [vmem:[#allocation129_spill] sm:$0xff] %v7198_v30 }
 0x5ec   :  { %v7200_v53 = vpop.xlane.xlu1 %2262  ;;  %v7202_v8 = vpop.xlane.xlu0 %2259 }
 0x5ed   :  { %9069 = vst [vmem:[#allocation40_spill] sm:$0xff] %v7200_v53  ;;  %9070 = vst [vmem:[#allocation50_spill] sm:$0xff] %v7202_v8  ;;  %v9089_v8 = vld [vmem:[#allocation34_spill] sm:$0xff] }
 0x5f0   :  { %v7204_v56 = vpop.xlane.xlu1 %2268  ;;  %v7206_v6 = vpop.xlane.xlu0 %2265 }
 0x5f1   :  { %9071 = vst [vmem:[#allocation64_spill] sm:$0xff] %v7204_v56  ;;  %9072 = vst [vmem:[#allocation59_spill] sm:$0xff] %v7206_v6  ;;  %v9087_v6 = vld [vmem:[#allocation111_spill] sm:$0xff] }
 0x5f4   :  { %v7208_v12 = vpop.xlane.xlu1 %2274  ;;  %v7210_v38 = vpop.xlane.xlu0 %2271 }
 0x5f5   :  { %9073 = vst [vmem:[#allocation16_spill] sm:$0xff] %v7208_v12  ;;  %9074 = vst [vmem:[#allocation6_spill] sm:$0xff] %v7210_v38  ;;  %v9086_v38 = vld [vmem:[#allocation99_spill] sm:$0xff] }
 0x5f6   :  { %v7270_v56 = vand.u32 2147483647, %v9086_v38 }
 0x5f8   :  { %v7212_v47 = vpop.xlane.xlu1 %2280  ;;  %v7214_v19 = vpop.xlane.xlu0 %2277 }
 0x5f9   :  { %9075 = vst [vmem:[#allocation77_spill] sm:$0xff] %v7212_v47  ;;  %9076 = vst [vmem:[#allocation30_spill] sm:$0xff] %v7214_v19 }
 0x5fc   :  { %v7216_v61 = vpop.permute.xlu1 %2380 }
 0x600   :  { %v7218_v26 = vpop.permute.xlu1 %2384  ;;  %v7220_v31 = vpop.permute.xlu0 %2376 }
 0x604   :  { %v7222_v34 = vpop.permute.xlu1 %2388  ;;  %v7224_v28 = vpop.permute.xlu0 %2408 }
 0x608   :  { %v7226_v40 = vpop.permute.xlu1 %2392  ;;  %v7228_v36 = vpop.permute.xlu0 %2416 }
 0x60c   :  { %v7230_v20 = vpop.permute.xlu1 %2396  ;;  %v7232_v42 = vpop.permute.xlu0 %2424 }
 0x60d   :  { %9077 = vst [vmem:[#allocation8_spill] sm:$0xff] %v7232_v42 }
 0x610   :  { %v7234_v17 = vpop.permute.xlu1 %2400  ;;  %v7236_v1 = vpop.permute.xlu0 %2432 }
 0x611   :  { %9078 = vst [vmem:[#allocation62_spill] sm:$0xff] %v7236_v1 }
 0x614   :  { %v7241_v58 = vpop.permute.xlu1 %2404 }
 0x615   :  { %v2473_v24 = vpop.permute.xlu0 %2472 }
 0x616   :  { %v2535_v7 = vmul.f32 %v2473_v24, %v7239_v39 }
 0x618   :  { %v7244_v45 = vpop.permute.xlu1 %2412  ;;  %2567 = vrot.lane.b32.xlu1 %v2535_v7, %s4742_s3  ;;  %v9085_v7 = vld [vmem:[#allocation84_spill] sm:$0xff] }
 0x619   :  { %v2485_v37 = vpop.permute.xlu0 %2484  ;;  %v7267_v5 = vand.u32 2147483647, %v9085_v7 }
 0x61a   :  { %v2538_v52 = vmul.f32 %v2485_v37, %v7261_v21  ;;  %v7277_v37 = vand.u32 2147483647, %v9087_v6 }
 0x61c   :  { %v7247_v43 = vpop.permute.xlu1 %2420 }
 0x61d   :  { %v2493_v25 = vpop.permute.xlu0 %2492 }
 0x61e   :  { %v2540_v54 = vmul.f32 %v2493_v25, %v7270_v56  ;;  %v7287_v25 = vand.u32 2147483647, %v9089_v8 }
 0x620   :  { %v7249_v35 = vpop.permute.xlu1 %2428 }
 0x621   :  { %9080 = vst [vmem:[#allocation9_spill] sm:$0xff] %v7249_v35  ;;  %v2501_v49 = vpop.permute.xlu0 %2500 }
 0x624   :  { %v7251_v50 = vpop.permute.xlu1 %2436 }
 0x625   :  { %9081 = vst [vmem:[#allocation43_spill] sm:$0xff] %v7251_v50 }
 0x628   :  { %v2477_v63 = vpop.permute.xlu1 %2476 }
 0x629   :  { %v2536_v13 = vmul.f32 %v2477_v63, %v7254_v33  ;;  %v2509_v63 = vpop.permute.xlu0 %2508 }
 0x62b   :  { %2569 = vrot.lane.b32.xlu0 %v2536_v13, %s4742_s3 }
 0x62c   :  { %v2481_v51 = vpop.permute.xlu1 %2480 }
 0x62d   :  { %v2537_v24 = vmul.f32 %v2481_v51, %v7258_v3  ;;  %v9088_v51 = vld [vmem:[#allocation124_spill] sm:$0xff]  ;;  %v2517_v7 = vpop.permute.xlu0 %2516 }
 0x62e   :  { %v7280_v53 = vand.u32 2147483647, %v9088_v51  ;;  %v9091_v51 = vld [vmem:[#allocation60_spill] sm:$0xff] }
 0x62f   :  { %2571 = vrot.lane.b32.xlu1 %v2537_v24, %s4742_s3  ;;  %2573 = vrot.lane.b32.xlu0 %v2538_v52, %s4742_s3 }
 0x630   :  { %v2489_v4 = vpop.permute.xlu1 %2488  ;;  %v2542_v24 = vmul.f32 %v2501_v49, %v7280_v53  ;;  %v7297_v49 = vand.u32 2147483647, %v9091_v51 }
 0x631   :  { %v2539_v13 = vmul.f32 %v2489_v4, %v7267_v5  ;;  %v9090_v4 = vld [vmem:[#allocation47_spill] sm:$0xff]  ;;  %v2525_v8 = vpop.permute.xlu0 %2524 }
 0x632   :  { %v7290_v23 = vand.u32 2147483647, %v9090_v4 }
 0x633   :  { %2575 = vrot.lane.b32.xlu1 %v2539_v13, %s4742_s3  ;;  %2577 = vrot.lane.b32.xlu0 %v2540_v54, %s4742_s3 }
 0x634   :  { %v2497_v38 = vpop.permute.xlu1 %2496  ;;  %v2544_v13 = vmul.f32 %v2509_v63, %v7290_v23  ;;  %v7307_v63 = vand.u32 2147483647, %v9093_v10 }
 0x635   :  { %v2541_v52 = vmul.f32 %v2497_v38, %v7277_v37  ;;  %v9092_v38 = vld [vmem:[#allocation74_spill] sm:$0xff] }
 0x636   :  { %v7300_v30 = vand.u32 2147483647, %v9092_v38  ;;  %9094 = vst [vmem:[#allocation73_spill] sm:$0xff] %v7307_v63  ;;  %v2533_v38 = vpop.permute.xlu0 %2532 }
 0x637   :  { %2579 = vrot.lane.b32.xlu1 %v2541_v52, %s4742_s3  ;;  %2581 = vrot.lane.b32.xlu0 %v2542_v24, %s4742_s3 }
 0x638   :  { %v2505_v6 = vpop.permute.xlu1 %2504  ;;  %v2546_v52 = vmul.f32 %v2517_v7, %v7300_v30  ;;  %v7317_v7 = vand.u32 2147483647, %v9097_v15  ;;  %v4752_v15 = vmov 11  }
 0x639   :  { %v2543_v54 = vmul.f32 %v2505_v6, %v7287_v25  ;;  %v9095_v6 = vld [vmem:[#allocation102_spill] sm:$0xff] }
 0x63a   :  { %v7310_v62 = vand.u32 2147483647, %v9095_v6  ;;  %9098 = vst [vmem:[#allocation27_spill] sm:$0xff] %v7317_v7 }
 0x63b   :  { %2583 = vrot.lane.b32.xlu1 %v2543_v54, %s4742_s3  ;;  %2585 = vrot.lane.b32.xlu0 %v2544_v13, %s4742_s3 }
 0x63c   :  { %v2513_v4 = vpop.permute.xlu1 %2512  ;;  %9096 = vst [vmem:[#allocation14_spill] sm:$0xff] %v7310_v62  ;;  %v2548_v54 = vmul.f32 %v2525_v8, %v7310_v62 }
 0x63d   :  { %v2545_v24 = vmul.f32 %v2513_v4, %v7297_v49  ;;  %v9099_v4 = vld [vmem:[#allocation127_spill] sm:$0xff] }
 0x63e   :  { %v7320_v44 = vand.u32 2147483647, %v9099_v4 }
 0x63f   :  { %2587 = vrot.lane.b32.xlu1 %v2545_v24, %s4742_s3  ;;  %2589 = vrot.lane.b32.xlu0 %v2546_v52, %s4742_s3 }
 0x640   :  { %v2521_v51 = vpop.permute.xlu1 %2520  ;;  %9100 = vst [vmem:[#allocation91_spill] sm:$0xff] %v7320_v44  ;;  %v2550_v24 = vmul.f32 %v2533_v38, %v7320_v44 }
 0x641   :  { %v2547_v13 = vmul.f32 %v2521_v51, %v7307_v63 }
 0x643   :  { %2591 = vrot.lane.b32.xlu1 %v2547_v13, %s4742_s3  ;;  %2593 = vrot.lane.b32.xlu0 %v2548_v54, %s4742_s3 }
 0x644   :  { %v2529_v10 = vpop.permute.xlu1 %2528 }
 0x645   :  { %v2549_v52 = vmul.f32 %v2529_v10, %v7317_v7 }
 0x647   :  { %2595 = vrot.lane.b32.xlu1 %v2549_v52, %s4742_s3  ;;  %2597 = vrot.lane.b32.xlu0 %v2550_v24, %s4742_s3 }
 0x64b   :  { %2632 = vperm.xlu1 %4523, %v7087_v59   ;;  %2636 = vperm.xlu0 %4524, %v7075_v2  }
 0x64f   :  { %2640 = vperm.xlu1 %4523, %v7081_v22   ;;  %2648 = vperm.xlu0 %4524, %v7105_v27  }
 0x653   :  { %2644 = vperm.xlu1 %4523, %v7093_v11   ;;  %2656 = vperm.xlu0 %4524, %v7129_v32  }
 0x657   :  { %2652 = vperm.xlu1 %4523, %v7117_v57   ;;  %2664 = vperm.xlu0 %4524, %v7099_v48  }
 0x65b   :  { %2660 = vperm.xlu1 %4523, %v7141_v9   ;;  %2672 = vperm.xlu0 %4524, %v7111_v14  }
 0x65f   :  { %2668 = vperm.xlu1 %4523, %v7148_v29   ;;  %2680 = vperm.xlu0 %4524, %v7123_v41  }
 0x663   :  { %2676 = vperm.xlu1 %4523, %v7155_v55   ;;  %2688 = vperm.xlu0 %4524, %v7135_v18  }
 0x667   :  { %2684 = vperm.xlu1 %4523, %v7162_v46   ;;  %4525 = vset.pattern.permute.xlu0 %v4752_v15 }
 0x66b   :  { %2692 = vperm.xlu1 %4523, %v7169_v16  }
 0x66f   :  { %4526 = vset.pattern.permute.xlu1 %v4752_v15 }
 0x68a   :  { %v7346_v6 = vpop.permute.xlu1 %2567 }
 0x69d   :  { %v7344_v8 = vpop.permute.xlu0 %2569 }
 0x6a1   :  { %v7348_v51 = vpop.permute.xlu1 %2571  ;;  %v7350_v54 = vpop.permute.xlu0 %2573 }
 0x6a5   :  { %v7352_v13 = vpop.permute.xlu1 %2575  ;;  %v7354_v38 = vpop.permute.xlu0 %2577 }
 0x6a9   :  { %v7356_v4 = vpop.permute.xlu1 %2579  ;;  %v7358_v10 = vpop.permute.xlu0 %2581 }
 0x6ad   :  { %v7360_v24 = vpop.permute.xlu1 %2583  ;;  %v7362_v52 = vpop.permute.xlu0 %2585 }
 0x6ae   :  { %9101 = vst [vmem:[#allocation56_spill] sm:$0xff] %v7360_v24  ;;  %9102 = vst [vmem:[#allocation12_spill] sm:$0xff] %v7362_v52 }
 0x6b1   :  { %v7364_v15 = vpop.permute.xlu1 %2587  ;;  %v7366_v0 = vpop.permute.xlu0 %2589 }
 0x6b2   :  { %9103 = vst [vmem:[#allocation7_spill] sm:$0xff] %v7364_v15  ;;  %9104 = vst [vmem:[#allocation90_spill] sm:$0xff] %v7366_v0 }
 0x6b5   :  { %v7368_v60 = vpop.permute.xlu1 %2591  ;;  %v7370_v19 = vpop.permute.xlu0 %2593 }
 0x6b6   :  { %9105 = vst [vmem:[#allocation70_spill] sm:$0xff] %v7368_v60  ;;  %9106 = vst [vmem:[#allocation83_spill] sm:$0xff] %v7370_v19 }
 0x6b9   :  { %v7372_v47 = vpop.permute.xlu1 %2595  ;;  %v7374_v12 = vpop.permute.xlu0 %2597 }
 0x6ba   :  { %9107 = vst [vmem:[#allocation86_spill] sm:$0xff] %v7372_v47  ;;  %9108 = vst [vmem:[#allocation101_spill] sm:$0xff] %v7374_v12 }
 0x6ca   :  { %v2633_v50 = vpop.permute.xlu1 %2632  ;;  %v2637_v35 = vpop.permute.xlu0 %2636 }
 0x6cb   :  { %v2695_v1 = vmul.f32 %v2633_v50, %v7239_v39  ;;  %v2696_v24 = vmul.f32 %v2637_v35, %v7254_v33 }
 0x6cd   :  { %2727 = vrot.lane.b32.xlu0 %v2695_v1, %s4743_s24  ;;  %2729 = vrot.lane.b32.xlu1 %v2696_v24, %s4743_s24 }
 0x6ce   :  { %v2641_v15 = vpop.permute.xlu1 %2640  ;;  %v2649_v0 = vpop.permute.xlu0 %2648 }
 0x6cf   :  { %v2697_v60 = vmul.f32 %v2641_v15, %v7258_v3  ;;  %v2699_v12 = vmul.f32 %v2649_v0, %v7267_v5 }
 0x6d1   :  { %2731 = vrot.lane.b32.xlu0 %v2697_v60, %s4743_s24 }
 0x6d2   :  { %v2645_v19 = vpop.permute.xlu1 %2644  ;;  %v2657_v47 = vpop.permute.xlu0 %2656 }
 0x6d3   :  { %v2698_v52 = vmul.f32 %v2645_v19, %v7261_v21  ;;  %v2701_v50 = vmul.f32 %v2657_v47, %v7277_v37 }
 0x6d5   :  { %2733 = vrot.lane.b32.xlu1 %v2698_v52, %s4743_s24  ;;  %2735 = vrot.lane.b32.xlu0 %v2699_v12, %s4743_s24 }
 0x6d6   :  { %v2653_v35 = vpop.permute.xlu1 %2652  ;;  %v2665_v1 = vpop.permute.xlu0 %2664 }
 0x6d7   :  { %v2700_v24 = vmul.f32 %v2653_v35, %v7270_v56  ;;  %v2703_v0 = vmul.f32 %v2665_v1, %v7287_v25 }
 0x6d9   :  { %2737 = vrot.lane.b32.xlu1 %v2700_v24, %s4743_s24  ;;  %2739 = vrot.lane.b32.xlu0 %v2701_v50, %s4743_s24 }
 0x6da   :  { %v2661_v60 = vpop.permute.xlu1 %2660  ;;  %v2673_v15 = vpop.permute.xlu0 %2672 }
 0x6db   :  { %v2702_v19 = vmul.f32 %v2661_v60, %v7280_v53  ;;  %v2705_v47 = vmul.f32 %v2673_v15, %v7297_v49 }
 0x6dd   :  { %2741 = vrot.lane.b32.xlu1 %v2702_v19, %s4743_s24  ;;  %2743 = vrot.lane.b32.xlu0 %v2703_v0, %s4743_s24 }
 0x6de   :  { %v2669_v12 = vpop.permute.xlu1 %2668  ;;  %v2681_v52 = vpop.permute.xlu0 %2680 }
 0x6df   :  { %v2704_v35 = vmul.f32 %v2669_v12, %v7290_v23  ;;  %v2707_v24 = vmul.f32 %v2681_v52, %v7307_v63 }
 0x6e1   :  { %2745 = vrot.lane.b32.xlu1 %v2704_v35, %s4743_s24  ;;  %2747 = vrot.lane.b32.xlu0 %v2705_v47, %s4743_s24 }
 0x6e2   :  { %v2677_v50 = vpop.permute.xlu1 %2676  ;;  %v2689_v60 = vpop.permute.xlu0 %2688 }
 0x6e3   :  { %v2706_v1 = vmul.f32 %v2677_v50, %v7300_v30  ;;  %v2709_v19 = vmul.f32 %v2689_v60, %v7317_v7 }
 0x6e5   :  { %2749 = vrot.lane.b32.xlu1 %v2706_v1, %s4743_s24  ;;  %2751 = vrot.lane.b32.xlu0 %v2707_v24, %s4743_s24 }
 0x6e6   :  { %v2685_v0 = vpop.permute.xlu1 %2684 }
 0x6e7   :  { %v2708_v15 = vmul.f32 %v2685_v0, %v7310_v62 }
 0x6e9   :  { %2753 = vrot.lane.b32.xlu1 %v2708_v15, %s4743_s24  ;;  %2755 = vrot.lane.b32.xlu0 %v2709_v19, %s4743_s24 }
 0x6ea   :  { %v2693_v12 = vpop.permute.xlu1 %2692 }
 0x6eb   :  { %v2710_v47 = vmul.f32 %v2693_v12, %v7320_v44 }
 0x6ed   :  { %2757 = vrot.lane.b32.xlu1 %v2710_v47, %s4743_s24  ;;  %2792 = vperm.xlu0 %4525, %v7087_v59  }
 0x6f1   :  { %2796 = vperm.xlu1 %4526, %v7075_v2   ;;  %2804 = vperm.xlu0 %4525, %v7093_v11  }
 0x6f5   :  { %2800 = vperm.xlu1 %4526, %v7081_v22   ;;  %2812 = vperm.xlu0 %4525, %v7117_v57  }
 0x6f9   :  { %2808 = vperm.xlu1 %4526, %v7105_v27   ;;  %2820 = vperm.xlu0 %4525, %v7141_v9  }
 0x6fd   :  { %2816 = vperm.xlu1 %4526, %v7129_v32   ;;  %2828 = vperm.xlu0 %4525, %v7148_v29  }
 0x701   :  { %2824 = vperm.xlu1 %4526, %v7099_v48   ;;  %2836 = vperm.xlu0 %4525, %v7155_v55  }
 0x705   :  { %2832 = vperm.xlu1 %4526, %v7111_v14   ;;  %2844 = vperm.xlu0 %4525, %v7162_v46  }
 0x709   :  { %2840 = vperm.xlu1 %4526, %v7123_v41   ;;  %2852 = vperm.xlu0 %4525, %v7169_v16  }
 0x70d   :  { %2848 = vperm.xlu1 %4526, %v7135_v18  }
 0x73f   :  { %v7424_v2 = vpop.permute.xlu0 %2727  ;;  %v7426_v22 = vpop.permute.xlu1 %2729 }
 0x743   :  { %v7428_v59 = vpop.permute.xlu0 %2731 }
 0x747   :  { %v7430_v11 = vpop.permute.xlu1 %2733  ;;  %v7432_v48 = vpop.permute.xlu0 %2735 }
 0x74b   :  { %v7434_v27 = vpop.permute.xlu1 %2737  ;;  %v7436_v14 = vpop.permute.xlu0 %2739 }
 0x74c   :  { %9109 = vst [vmem:[#allocation117_spill] sm:$0xff] %v7436_v14 }
 0x74f   :  { %v7438_v57 = vpop.permute.xlu1 %2741  ;;  %v7440_v41 = vpop.permute.xlu0 %2743 }
 0x750   :  { %9110 = vst [vmem:[#allocation98_spill] sm:$0xff] %v7438_v57  ;;  %9111 = vst [vmem:[#allocation94_spill] sm:$0xff] %v7440_v41  ;;  %v9133_v41 = vld [vmem:[#allocation118_spill] sm:$0xff]  ;;  %v9135_v57 = vld [vmem:[#allocation20_spill] sm:$0xff] }
 0x753   :  { %v7442_v32 = vpop.permute.xlu1 %2745  ;;  %v7444_v18 = vpop.permute.xlu0 %2747 }
 0x754   :  { %9112 = vst [vmem:[#allocation36_spill] sm:$0xff] %v7442_v32  ;;  %9113 = vst [vmem:[#allocation15_spill] sm:$0xff] %v7444_v18  ;;  %v9130_v18 = vld [vmem:[#allocation78_spill] sm:$0xff]  ;;  %v9131_v32 = vld [vmem:[#allocation92_spill] sm:$0xff] }
 0x757   :  { %v7446_v9 = vpop.permute.xlu1 %2749  ;;  %v7448_v29 = vpop.permute.xlu0 %2751 }
 0x758   :  { %9114 = vst [vmem:[#allocation104_spill] sm:$0xff] %v7446_v9  ;;  %9115 = vst [vmem:[#allocation113_spill] sm:$0xff] %v7448_v29  ;;  %v9127_v29 = vld [vmem:[#allocation41_spill] sm:$0xff] }
 0x759   :  { %v9129_v9 = vld [vmem:[#allocation65_spill] sm:$0xff] }
 0x75b   :  { %v7450_v55 = vpop.permute.xlu1 %2753  ;;  %v7452_v46 = vpop.permute.xlu0 %2755 }
 0x75c   :  { %9116 = vst [vmem:[#allocation126_spill] sm:$0xff] %v7450_v55  ;;  %9117 = vst [vmem:[#allocation13_spill] sm:$0xff] %v7452_v46  ;;  %v9125_v46 = vld [vmem:[#allocation121_spill] sm:$0xff]  ;;  %v9126_v55 = vld [vmem:[#allocation130_spill] sm:$0xff] }
 0x75f   :  { %v7454_v16 = vpop.permute.xlu1 %2757 }
 0x760   :  { %9118 = vst [vmem:[#allocation110_spill] sm:$0xff] %v7454_v16 }
 0x76c   :  { %v2793_v52 = vpop.permute.xlu0 %2792 }
 0x76d   :  { %v2855_v35 = vmul.f32 %v2793_v52, %v7239_v39 }
 0x76f   :  { %2887 = vrot.lane.b32.xlu1 %v2855_v35, %s4744_s25 }
 0x770   :  { %v2797_v50 = vpop.permute.xlu1 %2796  ;;  %v2805_v24 = vpop.permute.xlu0 %2804 }
 0x771   :  { %v2856_v1 = vmul.f32 %v2797_v50, %v7254_v33  ;;  %v2858_v19 = vmul.f32 %v2805_v24, %v7261_v21 }
 0x773   :  { %2889 = vrot.lane.b32.xlu0 %v2856_v1, %s4744_s25 }
 0x774   :  { %v2801_v60 = vpop.permute.xlu1 %2800  ;;  %v2813_v0 = vpop.permute.xlu0 %2812 }
 0x775   :  { %v2857_v15 = vmul.f32 %v2801_v60, %v7258_v3  ;;  %v2860_v52 = vmul.f32 %v2813_v0, %v7270_v56 }
 0x777   :  { %2891 = vrot.lane.b32.xlu1 %v2857_v15, %s4744_s25  ;;  %2893 = vrot.lane.b32.xlu0 %v2858_v19, %s4744_s25 }
 0x778   :  { %v2809_v12 = vpop.permute.xlu1 %2808  ;;  %v2821_v47 = vpop.permute.xlu0 %2820 }
 0x779   :  { %v2859_v35 = vmul.f32 %v2809_v12, %v7267_v5  ;;  %v2862_v24 = vmul.f32 %v2821_v47, %v7280_v53 }
 0x77b   :  { %2895 = vrot.lane.b32.xlu1 %v2859_v35, %s4744_s25  ;;  %2897 = vrot.lane.b32.xlu0 %v2860_v52, %s4744_s25 }
 0x77c   :  { %v2817_v50 = vpop.permute.xlu1 %2816  ;;  %v2829_v1 = vpop.permute.xlu0 %2828 }
 0x77d   :  { %v2861_v60 = vmul.f32 %v2817_v50, %v7277_v37  ;;  %v2864_v0 = vmul.f32 %v2829_v1, %v7290_v23 }
 0x77f   :  { %2899 = vrot.lane.b32.xlu1 %v2861_v60, %s4744_s25  ;;  %2901 = vrot.lane.b32.xlu0 %v2862_v24, %s4744_s25 }
 0x780   :  { %v2825_v19 = vpop.permute.xlu1 %2824  ;;  %v2837_v15 = vpop.permute.xlu0 %2836 }
 0x781   :  { %v2863_v12 = vmul.f32 %v2825_v19, %v7287_v25  ;;  %v2866_v47 = vmul.f32 %v2837_v15, %v7300_v30 }
 0x783   :  { %2903 = vrot.lane.b32.xlu1 %v2863_v12, %s4744_s25  ;;  %2905 = vrot.lane.b32.xlu0 %v2864_v0, %s4744_s25 }
 0x784   :  { %v2833_v52 = vpop.permute.xlu1 %2832  ;;  %v2845_v35 = vpop.permute.xlu0 %2844 }
 0x785   :  { %v2865_v50 = vmul.f32 %v2833_v52, %v7297_v49  ;;  %v2868_v60 = vmul.f32 %v2845_v35, %v7310_v62  ;;  %v9119_v52 = vld [vmem:[#allocation38_spill] sm:$0xff]  ;;  %v9132_v62 = vld [vmem:[#allocation105_spill] sm:$0xff] }
 0x787   :  { %2907 = vrot.lane.b32.xlu1 %v2865_v50, %s4744_s25  ;;  %2909 = vrot.lane.b32.xlu0 %v2866_v47, %s4744_s25  ;;  %v2343_v47 = vand.u32 2147483647, %v9119_v52  ;;  %v9120_v50 = vld [vmem:[#allocation54_spill] sm:$0xff] }
 0x788   :  { %v2841_v24 = vpop.permute.xlu1 %2840  ;;  %v2853_v19 = vpop.permute.xlu0 %2852  ;;  %v2344_v35 = vand.u32 2147483647, %v9120_v50 }
 0x789   :  { %v2867_v1 = vmul.f32 %v2841_v24, %v7307_v63  ;;  %v2870_v12 = vmul.f32 %v2853_v19, %v7320_v44  ;;  %v9121_v24 = vld [vmem:[#allocation68_spill] sm:$0xff]  ;;  %v9128_v44 = vld [vmem:[#allocation51_spill] sm:$0xff]  ;;  %v2366_v63 = vmax.f32 %v9126_v55, 0.0 }
 0x78a   :  { %v9123_v19 = vld [vmem:[#allocation96_spill] sm:$0xff] }
 0x78b   :  { %2911 = vrot.lane.b32.xlu1 %v2867_v1, %s4744_s25  ;;  %2913 = vrot.lane.b32.xlu0 %v2868_v60, %s4744_s25  ;;  %v2345_v1 = vand.u32 2147483647, %v9121_v24  ;;  %v9122_v60 = vld [vmem:[#allocation81_spill] sm:$0xff] }
 0x78c   :  { %v2849_v0 = vpop.permute.xlu1 %2848  ;;  %v2346_v16 = vand.u32 2147483647, %v9122_v60 }
 0x78d   :  { %v2869_v15 = vmul.f32 %v2849_v0, %v7317_v7  ;;  %v2347_v0 = vand.u32 2147483647, %v9123_v19  ;;  %v9134_v7 = vld [vmem:[#allocation133_spill] sm:$0xff] }
 0x78f   :  { %2915 = vrot.lane.b32.xlu1 %v2869_v15, %s4744_s25  ;;  %2917 = vrot.lane.b32.xlu0 %v2870_v12, %s4744_s25  ;;  %v9124_v15 = vld [vmem:[#allocation108_spill] sm:$0xff] }
 0x790   :  { %v2348_v12 = vand.u32 2147483647, %v9124_v15 }
 0x793   :  { %3063 = vrot.lane.b32.xlu1 %v2343_v47, %s4742_s3  ;;  %3065 = vrot.lane.b32.xlu0 %v2344_v35, %s4742_s3  ;;  %v2349_v47 = vand.u32 2147483647, %v9125_v46  ;;  %v2350_v35 = vand.u32 2147483647, %v9126_v55 }
 0x797   :  { %3067 = vrot.lane.b32.xlu1 %v2345_v1, %s4742_s3  ;;  %3069 = vrot.lane.b32.xlu0 %v2346_v16, %s4742_s3  ;;  %v2351_v1 = vand.u32 2147483647, %v9127_v29  ;;  %v2352_v16 = vand.u32 2147483647, %v9128_v44 }
 0x79b   :  { %3071 = vrot.lane.b32.xlu1 %v2347_v0, %s4742_s3  ;;  %3073 = vrot.lane.b32.xlu0 %v2348_v12, %s4742_s3  ;;  %v2353_v0 = vand.u32 2147483647, %v9129_v9  ;;  %v2354_v12 = vand.u32 2147483647, %v9130_v18 }
 0x79f   :  { %3075 = vrot.lane.b32.xlu1 %v2349_v47, %s4742_s3  ;;  %3077 = vrot.lane.b32.xlu0 %v2350_v35, %s4742_s3  ;;  %v2355_v47 = vand.u32 2147483647, %v9131_v32  ;;  %v2356_v35 = vand.u32 2147483647, %v9132_v62 }
 0x7a3   :  { %3079 = vrot.lane.b32.xlu1 %v2351_v1, %s4742_s3  ;;  %3081 = vrot.lane.b32.xlu0 %v2352_v16, %s4742_s3  ;;  %v2357_v1 = vand.u32 2147483647, %v9133_v41  ;;  %v2358_v16 = vand.u32 2147483647, %v9134_v7 }
 0x7a7   :  { %3083 = vrot.lane.b32.xlu1 %v2353_v0, %s4742_s3  ;;  %3085 = vrot.lane.b32.xlu0 %v2354_v12, %s4742_s3  ;;  %v2359_v0 = vmax.f32 %v9119_v52, 0.0  ;;  %v2360_v12 = vmax.f32 %v9120_v50, 0.0 }
 0x7a9   :  { %v3127_v14 = vmul.f32 %v2359_v0, %v9135_v57  ;;  %v3128_v42 = vmul.f32 %v2360_v12, %v9135_v57  ;;  %v2363_v0 = vmax.f32 %v9123_v19, 0.0  ;;  %v2364_v12 = vmax.f32 %v9124_v15, 0.0 }
 0x7ab   :  { %3087 = vrot.lane.b32.xlu1 %v2355_v47, %s4742_s3  ;;  %3089 = vrot.lane.b32.xlu0 %v2356_v35, %s4742_s3  ;;  %v2361_v47 = vmax.f32 %v9121_v24, 0.0  ;;  %v2362_v35 = vmax.f32 %v9122_v60, 0.0 }
 0x7af   :  { %3091 = vrot.lane.b32.xlu1 %v2357_v1, %s4742_s3  ;;  %3093 = vrot.lane.b32.xlu0 %v2358_v16, %s4742_s3  ;;  %v3129_v1 = vmul.f32 %v2361_v47, %v9135_v57  ;;  %v3130_v16 = vmul.f32 %v2362_v35, %v9135_v57  ;;  %v2365_v47 = vmax.f32 %v9125_v46, 0.0 }
 0x7b1   :  { %v3133_v35 = vmul.f32 %v2365_v47, %v9135_v57 }
 0x7b3   :  { %3159 = vrot.lane.b32.xlu1 %v3127_v14, %s4743_s24  ;;  %3161 = vrot.lane.b32.xlu0 %v3128_v42, %s4743_s24  ;;  %v3131_v14 = vmul.f32 %v2363_v0, %v9135_v57  ;;  %v3132_v42 = vmul.f32 %v2364_v12, %v9135_v57  ;;  %v2368_v0 = vmax.f32 %v9128_v44, 0.0 }
 0x7b7   :  { %3163 = vrot.lane.b32.xlu1 %v3129_v1, %s4743_s24  ;;  %3165 = vrot.lane.b32.xlu0 %v3130_v16, %s4743_s24  ;;  %v3134_v1 = vmul.f32 %v2366_v63, %v9135_v57  ;;  %v2367_v16 = vmax.f32 %v9127_v29, 0.0  ;;  %v2370_v63 = vmax.f32 %v9130_v18, 0.0  ;;  %v2374_v18 = vmax.f32 %v9134_v7, 0.0 }
 0x7b9   :  { %v3135_v12 = vmul.f32 %v2367_v16, %v9135_v57  ;;  %v2371_v16 = vmax.f32 %v9131_v32, 0.0 }
 0x7bb   :  { %3167 = vrot.lane.b32.xlu1 %v3131_v14, %s4743_s24  ;;  %3169 = vrot.lane.b32.xlu0 %v3132_v42, %s4743_s24  ;;  %v3136_v14 = vmul.f32 %v2368_v0, %v9135_v57  ;;  %v2369_v42 = vmax.f32 %v9129_v9, 0.0  ;;  %v2372_v0 = vmax.f32 %v9132_v62, 0.0 }
 0x7bd   :  { %v3137_v47 = vmul.f32 %v2369_v42, %v9135_v57  ;;  %v2373_v42 = vmax.f32 %v9133_v41, 0.0 }
 0x7bf   :  { %3171 = vrot.lane.b32.xlu1 %v3133_v35, %s4743_s24  ;;  %3173 = vrot.lane.b32.xlu0 %v3134_v1, %s4743_s24  ;;  %v3138_v35 = vmul.f32 %v2370_v63, %v9135_v57  ;;  %v4753_v1 = vmov 12   ;;  %v3141_v63 = vmul.f32 %v2373_v42, %v9135_v57 }
 0x7c0   :  { %4528 = vset.pattern.permute.xlu1 %v4753_v1  ;;  %4527 = vset.pattern.permute.xlu0 %v4753_v1 }
 0x7c3   :  { %3175 = vrot.lane.b32.xlu1 %v3135_v12, %s4743_s24  ;;  %3177 = vrot.lane.b32.xlu0 %v3136_v14, %s4743_s24  ;;  %v3139_v12 = vmul.f32 %v2371_v16, %v9135_v57  ;;  %v3140_v14 = vmul.f32 %v2372_v0, %v9135_v57 }
 0x7c7   :  { %3179 = vrot.lane.b32.xlu1 %v3137_v47, %s4743_s24  ;;  %3181 = vrot.lane.b32.xlu0 %v3138_v35, %s4743_s24  ;;  %v3142_v47 = vmul.f32 %v2374_v18, %v9135_v57  ;;  %v2440_v57 = vmul.f32 %v7216_v61, %v7254_v33  ;;  %v2443_v33 = vmul.f32 %v7226_v40, %v7267_v5 }
 0x7c8   :  { %v2447_v40 = vmul.f32 %v7224_v28, %v7287_v25  ;;  %v2448_v28 = vmul.f32 %v7244_v45, %v7290_v23  ;;  %v2450_v23 = vmul.f32 %v7247_v43, %v7300_v30 }
 0x7cb   :  { %3183 = vrot.lane.b32.xlu1 %v3139_v12, %s4743_s24  ;;  %3185 = vrot.lane.b32.xlu0 %v3140_v14, %s4743_s24 }
 0x7cf   :  { %3187 = vrot.lane.b32.xlu1 %v3141_v63, %s4743_s24  ;;  %3189 = vrot.lane.b32.xlu0 %v3142_v47, %s4743_s24  ;;  %v2439_v47 = vmul.f32 %v7220_v31, %v7239_v39 }
 0x7e1   :  { %v2888_v35 = vpop.permute.xlu1 %2887 }
 0x7e5   :  { %v2890_v1 = vpop.permute.xlu0 %2889 }
 0x7e9   :  { %v2892_v16 = vpop.permute.xlu1 %2891  ;;  %v2894_v0 = vpop.permute.xlu0 %2893 }
 0x7ed   :  { %v2896_v62 = vpop.permute.xlu1 %2895  ;;  %v7568_v7 = vpop.permute.xlu0 %2897 }
 0x7ee   :  { %9136 = vst [vmem:[#allocation89_spill] sm:$0xff] %v7568_v7 }
 0x7f1   :  { %v7570_v12 = vpop.permute.xlu1 %2899  ;;  %v7572_v14 = vpop.permute.xlu0 %2901 }
 0x7f2   :  { %9137 = vst [vmem:[#allocation132_spill] sm:$0xff] %v7572_v14  ;;  %v2441_v14 = vmul.f32 %v7218_v26, %v7258_v3 }
 0x7f4   :  { %v2457_v26 = vadd.f32 %v2441_v14, %v9121_v24  ;;  %v9145_v14 = vld [vmem:[#allocation78_spill] sm:$0xff] }
 0x7f5   :  { %v7574_v41 = vpop.permute.xlu1 %2903  ;;  %v7576_v42 = vpop.permute.xlu0 %2905 }
 0x7f6   :  { %9138 = vst [vmem:[#allocation123_spill] sm:$0xff] %v7574_v41  ;;  %9139 = vst [vmem:[#allocation23_spill] sm:$0xff] %v7576_v42  ;;  %v2455_v41 = vadd.f32 %v2439_v47, %v9119_v52 }
 0x7f8   :  { %v2615_v42 = vadd.f32 %v7346_v6, %v2455_v41 }
 0x7f9   :  { %v7578_v18 = vpop.permute.xlu1 %2907  ;;  %v7580_v63 = vpop.permute.xlu0 %2909 }
 0x7fa   :  { %9140 = vst [vmem:[#allocation33_spill] sm:$0xff] %v7578_v18  ;;  %9141 = vst [vmem:[#allocation46_spill] sm:$0xff] %v7580_v63  ;;  %v2442_v18 = vmul.f32 %v7222_v34, %v7261_v21  ;;  %v2456_v63 = vadd.f32 %v2440_v57, %v9120_v50  ;;  %v2775_v3 = vadd.f32 %v7424_v2, %v2615_v42 }
 0x7fb   :  { %v2444_v34 = vmul.f32 %v7230_v20, %v7270_v56  ;;  %v2617_v57 = vadd.f32 %v7348_v51, %v2457_v26  ;;  %v2449_v56 = vmul.f32 %v7228_v36, %v7297_v49  ;;  %v2445_v20 = vmul.f32 %v7234_v17, %v7277_v37  ;;  %v9149_v26 = vld [vmem:[#allocation7_spill] sm:$0xff] }
 0x7fc   :  { %v2616_v61 = vadd.f32 %v7344_v8, %v2456_v63  ;;  %v2458_v21 = vadd.f32 %v2442_v18, %v9122_v60  ;;  %v7611_v41 = vadd.f32 %v2888_v35, %v2775_v3  ;;  %v2459_v51 = vadd.f32 %v2443_v33, %v9123_v19  ;;  %v9146_v18 = vld [vmem:[#allocation117_spill] sm:$0xff]  ;;  %v9147_v63 = vld [vmem:[#allocation56_spill] sm:$0xff] }
 0x7fd   :  { %v7586_v32 = vpop.permute.xlu1 %2911  ;;  %v7588_v7 = vpop.permute.xlu0 %2913  ;;  %v2446_v50 = vmul.f32 %v7241_v58, %v7280_v53  ;;  %v2460_v25 = vadd.f32 %v2444_v34, %v9124_v15  ;;  %v2461_v45 = vadd.f32 %v2445_v20, %v9125_v46  ;;  %v2464_v19 = vadd.f32 %v2448_v28, %v9128_v44  ;;  %v9142_v46 = vld [vmem:[#allocation89_spill] sm:$0xff]  ;;  %v9153_v28 = vld [vmem:[#allocation62_spill] sm:$0xff] }
 0x7fe   :  { %v2776_v6 = vadd.f32 %v7426_v22, %v2616_v61  ;;  %v2618_v5 = vadd.f32 %v7350_v54, %v2458_v21  ;;  %v2777_v22 = vadd.f32 %v7428_v59, %v2617_v57  ;;  %v2619_v24 = vadd.f32 %v7352_v13, %v2459_v51  ;;  %v9148_v61 = vld [vmem:[#allocation12_spill] sm:$0xff] }
 0x7ff   :  { %v2967_v36 = vmin.f32 %v7611_v41, 0.0  ;;  %v2620_v59 = vadd.f32 %v7354_v38, %v2460_v25  ;;  %v2463_v13 = vadd.f32 %v2447_v40, %v9127_v29  ;;  %v2462_v60 = vadd.f32 %v2446_v50, %v9126_v55  ;;  %v9151_v51 = vld [vmem:[#allocation132_spill] sm:$0xff]  ;;  %v9152_v50 = vld [vmem:[#allocation27_spill] sm:$0xff] }
 0x800   :  { %v7620_v2 = vadd.f32 %v2890_v1, %v2776_v6  ;;  %v2778_v54 = vadd.f32 %v7430_v11, %v2618_v5  ;;  %v7636_v49 = vadd.f32 %v2892_v16, %v2777_v22  ;;  %v2779_v11 = vadd.f32 %v7432_v48, %v2619_v24 }
 0x801   :  { %v7597_v31 = vpop.permute.xlu1 %2915  ;;  %v7599_v39 = vpop.permute.xlu0 %2917  ;;  %v2465_v15 = vadd.f32 %v2449_v56, %v9129_v9  ;;  %v2780_v38 = vadd.f32 %v7434_v27, %v2620_v59  ;;  %v2621_v35 = vadd.f32 %v7356_v4, %v2461_v45  ;;  %v2983_v1 = vmul.f32 1.442695, %v2967_v36  ;;  %v9143_v27 = vld [vmem:[#allocation73_spill] sm:$0xff]  ;;  %v9155_v36 = vld [vmem:[#allocation94_spill] sm:$0xff] }
 0x802   :  { %v2968_v53 = vmin.f32 %v7620_v2, 0.0  ;;  %v7644_v58 = vadd.f32 %v2894_v0, %v2778_v54  ;;  %v2969_v16 = vmin.f32 %v7636_v49, 0.0  ;;  %v7657_v30 = vadd.f32 %v2896_v62, %v2779_v11  ;;  %v9144_v0 = vld [vmem:[#allocation8_spill] sm:$0xff]  ;;  %v9158_v45 = vld [vmem:[#allocation90_spill] sm:$0xff] }
 0x803   :  { %v2622_v48 = vadd.f32 %v7358_v10, %v2462_v60  ;;  %v7666_v9 = vadd.f32 %v9142_v46, %v2780_v38  ;;  %v2451_v4 = vmul.f32 %v9144_v0, %v9143_v27  ;;  %v2466_v42 = vadd.f32 %v2450_v23, %v9145_v14  ;;  %v9150_v10 = vld [vmem:[#allocation98_spill] sm:$0xff]  ;;  %v9154_v54 = vld [vmem:[#allocation92_spill] sm:$0xff]  ;;  %v9162_v27 = vld [vmem:[#allocation23_spill] sm:$0xff] }
 0x804   :  { %v2985_v55 = vmul.f32 1.442695, %v2968_v53  ;;  %v2970_v44 = vmin.f32 %v7644_v58, 0.0  ;;  %v2781_v62 = vadd.f32 %v9146_v18, %v2621_v35  ;;  %v2623_v47 = vadd.f32 %v9147_v63, %v2463_v13  ;;  %v9157_v53 = vld [vmem:[#allocation9_spill] sm:$0xff]  ;;  %v9159_v11 = vld [vmem:[#allocation36_spill] sm:$0xff]  ;;  %v9166_v63 = vld [vmem:[#allocation43_spill] sm:$0xff] }
 0x805   :  { %v7613_v52 = vpop.permute.xlu1 %3063  ;;  %v7615_v8 = vpop.permute.xlu0 %3065  ;;  %v2624_v33 = vadd.f32 %v9148_v61, %v2464_v19  ;;  %v2625_v3 = vadd.f32 %v9149_v26, %v2465_v15  ;;  %v2782_v34 = vadd.f32 %v9150_v10, %v2622_v48  ;;  %4600 = vpow2.f32 %v2983_v1  ;;  %v9160_v19 = vld [vmem:[#allocation15_spill] sm:$0xff]  ;;  %v9167_v61 = vld [vmem:[#allocation70_spill] sm:$0xff]  ;;  %v9168_v26 = vld [vmem:[#allocation105_spill] sm:$0xff] }
 0x806   :  { %v2987_v21 = vmul.f32 1.442695, %v2969_v16  ;;  %v2971_v6 = vmin.f32 %v7657_v30, 0.0  ;;  %v7678_v57 = vadd.f32 %v7570_v12, %v2781_v62  ;;  %4602 = vpow2.f32 %v2985_v55  ;;  %v9156_v12 = vld [vmem:[#allocation14_spill] sm:$0xff]  ;;  %v9161_v1 = vld [vmem:[#allocation123_spill] sm:$0xff]  ;;  %v9169_v10 = vld [vmem:[#allocation33_spill] sm:$0xff] }
 0x807   :  { %v2989_v56 = vmul.f32 1.442695, %v2970_v44  ;;  %v2972_v20 = vmin.f32 %v7666_v9, 0.0  ;;  %v7686_v22 = vadd.f32 %v9151_v51, %v2782_v34  ;;  %v2453_v25 = vmul.f32 %v9153_v28, %v9152_v50  ;;  %v9165_v62 = vld [vmem:[#allocation91_spill] sm:$0xff] }
 0x808   :  { %v2467_v24 = vadd.f32 %v2451_v4, %v9154_v54  ;;  %v2783_v59 = vadd.f32 %v9155_v36, %v2623_v47  ;;  %v2452_v23 = vmul.f32 %v9157_v53, %v9156_v12  ;;  %v2626_v13 = vadd.f32 %v9158_v45, %v2466_v42  ;;  %v9163_v4 = vld [vmem:[#allocation118_spill] sm:$0xff]  ;;  %v9164_v42 = vld [vmem:[#allocation104_spill] sm:$0xff]  ;;  %v9171_v28 = vld [vmem:[#allocation83_spill] sm:$0xff] }
 0x809   :  { %v7638_v17 = vpop.permute.xlu1 %3067  ;;  %v7640_v37 = vpop.permute.xlu0 %3069  ;;  %v2784_v60 = vadd.f32 %v9159_v11, %v2624_v33  ;;  %v2785_v15 = vadd.f32 %v9160_v19, %v2625_v3  ;;  %4604 = vpow2.f32 %v2987_v21  ;;  %v2991_v38 = vmul.f32 1.442695, %v2971_v6 }
 0x80a   :  { %v2973_v35 = vmin.f32 %v7678_v57, 0.0  ;;  %v7699_v16 = vadd.f32 %v9161_v1, %v2783_v59  ;;  %4606 = vpow2.f32 %v2989_v56  ;;  %v2993_v44 = vmul.f32 1.442695, %v2972_v20  ;;  %v9170_v56 = vld [vmem:[#allocation46_spill] sm:$0xff]  ;;  %v9172_v59 = vld [vmem:[#allocation113_spill] sm:$0xff] }
 0x80b   :  { %v2974_v46 = vmin.f32 %v7686_v22, 0.0  ;;  %v7707_v0 = vadd.f32 %v9162_v27, %v2784_v60  ;;  %v2469_v14 = vadd.f32 %v2453_v25, %v9163_v4  ;;  %v2786_v18 = vadd.f32 %v9164_v42, %v2626_v13  ;;  %v9174_v13 = vld [vmem:[#allocation133_spill] sm:$0xff]  ;;  %v9175_v60 = vld [vmem:[#allocation126_spill] sm:$0xff] }
 0x80c   :  { %v2454_v47 = vmul.f32 %v9166_v63, %v9165_v62  ;;  %v2627_v33 = vadd.f32 %v9167_v61, %v2467_v24  ;;  %v2468_v3 = vadd.f32 %v2452_v23, %v9168_v26  ;;  %v7716_v34 = vadd.f32 %v9169_v10, %v2785_v15  ;;  %v9173_v23 = vld [vmem:[#allocation86_spill] sm:$0xff]  ;;  %v9176_v27 = vld [vmem:[#allocation101_spill] sm:$0xff] }
 0x80d   :  { %v7659_v43 = vpop.permute.xlu1 %3071  ;;  %v7661_v29 = vpop.permute.xlu0 %3073  ;;  %4608 = vpow2.f32 %v2991_v38  ;;  %v2995_v21 = vmul.f32 1.442695, %v2973_v35  ;;  %v2975_v6 = vmin.f32 %v7699_v16, 0.0  ;;  %v7720_v20 = vadd.f32 %v9170_v56, %v2786_v18  ;;  %v9177_v62 = vld [vmem:[#allocation13_spill] sm:$0xff]  ;;  %v9178_v26 = vld [vmem:[#allocation110_spill] sm:$0xff] }
 0x80e   :  { %v2628_v25 = vadd.f32 %v9171_v28, %v2468_v3  ;;  %4610 = vpow2.f32 %v2993_v44  ;;  %v2997_v54 = vmul.f32 1.442695, %v2974_v46  ;;  %v2976_v24 = vmin.f32 %v7707_v0, 0.0 }
 0x80f   :  { %v4601_v36 = vpop.eup %4600  ;;  %v2787_v12 = vadd.f32 %v9172_v59, %v2627_v33  ;;  %v2629_v45 = vadd.f32 %v9173_v23, %v2469_v14  ;;  %v2470_v11 = vadd.f32 %v2454_v47, %v9174_v13  ;;  %v2977_v15 = vmin.f32 %v7716_v34, 0.0 }
 0x810   :  { %v4603_v53 = vpop.eup %4602  ;;  %v2788_v19 = vadd.f32 %v9175_v60, %v2628_v25  ;;  %4612 = vpow2.f32 %v2995_v21  ;;  %v2999_v38 = vmul.f32 1.442695, %v2975_v6  ;;  %v2978_v35 = vmin.f32 %v7720_v20, 0.0 }
 0x811   :  { %v7680_v40 = vpop.permute.xlu1 %3075  ;;  %v7682_v5 = vpop.permute.xlu0 %3077  ;;  %v7735_v1 = vadd.f32 %v7586_v32, %v2787_v12  ;;  %v2630_v4 = vadd.f32 %v9176_v27, %v2470_v11  ;;  %4614 = vpow2.f32 %v2997_v54  ;;  %v3001_v14 = vmul.f32 1.442695, %v2976_v24 }
 0x812   :  { %v7743_v42 = vadd.f32 %v7588_v7, %v2788_v19  ;;  %v2789_v63 = vadd.f32 %v9177_v62, %v2629_v45  ;;  %v4439_v47 = vadd.f32 -1.0, %v4601_v36  ;;  %v4440_v61 = vadd.f32 -1.0, %v4603_v53 }
 0x813   :  { %v4605_v18 = vpop.eup %4604  ;;  %v2790_v32 = vadd.f32 %v9178_v26, %v2630_v4  ;;  %v3003_v3 = vmul.f32 1.442695, %v2977_v15  ;;  %vm2951_vm7 = vcmp.gt.f32.partialorder %v7611_v41, 0.0  ;;  %4616 = vpow2.f32 %v2999_v38 }
 0x814   :  { %v4607_v33 = vpop.eup %4606  ;;  %v3005_v10 = vmul.f32 1.442695, %v2978_v35  ;;  %v2979_v21 = vmin.f32 %v7735_v1, 0.0  ;;  %v7750_v6 = vadd.f32 %v7597_v31, %v2789_v63  ;;  %4618 = vpow2.f32 %v3001_v14 }
 0x815   :  { %v7701_v48 = vpop.permute.xlu1 %3079  ;;  %v7703_v55 = vpop.permute.xlu0 %3081  ;;  %v2980_v28 = vmin.f32 %v7743_v42, 0.0  ;;  %v7758_v25 = vadd.f32 %v7599_v39, %v2790_v32  ;;  %vm2952_vm8 = vcmp.gt.f32.partialorder %v7620_v2, 0.0  ;;  %v3031_v24 = vsel %vm2951_vm7, %v7611_v41, %v4439_v47 }
 0x816   :  { %v3032_v36 = vsel %vm2952_vm8, %v7620_v2, %v4440_v61  ;;  %v4441_v59 = vadd.f32 -1.0, %v4605_v18  ;;  %v4442_v31 = vadd.f32 -1.0, %v4607_v33  ;;  %4620 = vpow2.f32 %v3003_v3 }
 0x817   :  { %v4609_v54 = vpop.eup %4608  ;;  %v3111_v53 = vmul.f32 %v7613_v52, %v3031_v24  ;;  %v3112_v23 = vmul.f32 %v7615_v8, %v3032_v36  ;;  %vm2953_vm9 = vcmp.gt.f32.partialorder %v7636_v49, 0.0  ;;  %4622 = vpow2.f32 %v3005_v10 }
 0x818   :  { %v4611_v12 = vpop.eup %4610  ;;  %v3007_v39 = vmul.f32 1.442695, %v2979_v21  ;;  %v2981_v45 = vmin.f32 %v7750_v6, 0.0  ;;  %vm2954_vm10 = vcmp.gt.f32.partialorder %v7644_v58, 0.0  ;;  %v3009_v11 = vmul.f32 1.442695, %v2980_v28 }
 0x819   :  { %v7722_v51 = vpop.permute.xlu1 %3083  ;;  %v7724_v50 = vpop.permute.xlu0 %3085  ;;  %v2982_v2 = vmin.f32 %v7758_v25, 0.0  ;;  %v3033_v52 = vsel %vm2953_vm9, %v7636_v49, %v4441_v59  ;;  %v3034_v8 = vsel %vm2954_vm10, %v7644_v58, %v4442_v31  ;;  %v4443_v38 = vadd.f32 -1.0, %v4609_v54 }
 0x81a   :  { %v4613_v15 = vpop.eup %4612  ;;  %v4444_v35 = vadd.f32 -1.0, %v4611_v12  ;;  %v3113_v4 = vmul.f32 %v7638_v17, %v3033_v52  ;;  %v3114_v14 = vmul.f32 %v7640_v37, %v3034_v8  ;;  %4624 = vpow2.f32 %v3007_v39 }
 0x81b   :  { %v4615_v27 = vpop.eup %4614  ;;  %v3011_v63 = vmul.f32 1.442695, %v2981_v45  ;;  %vm2955_vm11 = vcmp.gt.f32.partialorder %v7657_v30, 0.0  ;;  %vm2956_vm12 = vcmp.gt.f32.partialorder %v7666_v9, 0.0  ;;  %4626 = vpow2.f32 %v3009_v11 }
 0x81c   :  { %v3013_v47 = vmul.f32 1.442695, %v2982_v2  ;;  %v3035_v37 = vsel %vm2955_vm11, %v7657_v30, %v4443_v38  ;;  %v3036_v26 = vsel %vm2956_vm12, %v7666_v9, %v4444_v35  ;;  %v4445_v32 = vadd.f32 -1.0, %v4613_v15 }
 0x81d   :  { %v7737_v44 = vpop.permute.xlu1 %3087  ;;  %v7739_v46 = vpop.permute.xlu0 %3089  ;;  %v4446_v3 = vadd.f32 -1.0, %v4615_v27  ;;  %v3115_v21 = vmul.f32 %v7659_v43, %v3035_v37  ;;  %v3116_v28 = vmul.f32 %v7661_v29, %v3036_v26  ;;  %4628 = vpow2.f32 %v3011_v63 }
 0x81e   :  { %v4617_v33 = vpop.eup %4616  ;;  %vm2957_vm13 = vcmp.gt.f32.partialorder %v7678_v57, 0.0  ;;  %4630 = vpow2.f32 %v3013_v47  ;;  %vm2958_vm14 = vcmp.gt.f32.partialorder %v7686_v22, 0.0  ;;  %vm2959_vm15 = vcmp.gt.f32.partialorder %v7699_v16, 0.0 }
 0x81f   :  { %v4619_v10 = vpop.eup %4618  ;;  %v3037_v29 = vsel %vm2957_vm13, %v7678_v57, %v4445_v32  ;;  %v3038_v12 = vsel %vm2958_vm14, %v7686_v22, %v4446_v3  ;;  %vm2960_vm0 = vcmp.gt.f32.partialorder %v7707_v0, 0.0  ;;  %vm2961_vm1 = vcmp.gt.f32.partialorder %v7716_v34, 0.0 }
 0x820   :  { %v4621_v59 = vpop.eup %4620  ;;  %v3117_v39 = vmul.f32 %v7680_v40, %v3037_v29  ;;  %v3118_v45 = vmul.f32 %v7682_v5, %v3038_v12  ;;  %vm2962_vm2 = vcmp.gt.f32.partialorder %v7720_v20, 0.0  ;;  %vm2963_vm3 = vcmp.gt.f32.partialorder %v7735_v1, 0.0 }
 0x821   :  { %v7752_v7 = vpop.permute.xlu1 %3091  ;;  %v7754_v56 = vpop.permute.xlu0 %3093  ;;  %v4449_v5 = vadd.f32 -1.0, %v4621_v59  ;;  %vm2964_vm4 = vcmp.gt.f32.partialorder %v7743_v42, 0.0  ;;  %vm2965_vm6 = vcmp.gt.f32.partialorder %v7750_v6, 0.0  ;;  %vm2966_vm7 = vcmp.gt.f32.partialorder %v7758_v25, 0.0 }
 0x822   :  { %v4623_v43 = vpop.eup %4622  ;;  %vm4260_vm8 = vcmask 7168   ;;  %vm4277_vm9 = vcmask 15360  }
 0x823   :  { %v4450_v15 = vadd.f32 -1.0, %v4623_v43 }
 0x825   :  { %v3160_v13 = vpop.permute.xlu1 %3159  ;;  %v3162_v41 = vpop.permute.xlu0 %3161 }
 0x826   :  { %v3207_v60 = vadd.f32 %v3160_v13, %v3111_v53  ;;  %v3208_v19 = vadd.f32 %v3162_v41, %v3112_v23  ;;  %v4447_v53 = vadd.f32 -1.0, %v4617_v33  ;;  %v4448_v23 = vadd.f32 -1.0, %v4619_v10 }
 0x828   :  { %v3223_v18 = vsel %vm1244_vm5, %v3207_v60, 0.0  ;;  %v3226_v62 = vsel %vm1244_vm5, %v3208_v19, 0.0  ;;  %v4625_v60 = vpop.eup %4624  ;;  %v3039_v19 = vsel %vm2959_vm15, %v7699_v16, %v4447_v53  ;;  %v3040_v40 = vsel %vm2960_vm0, %v7707_v0, %v4448_v23  ;;  %v7846_v23 = vld [vmem:[%s8650_s0 + $0x18] sm:$0xff] }
 0x829   :  { %3224 = vadd.xlane.f32.xlu1 %v3223_v18  ;;  %v3164_v49 = vpop.permute.xlu1 %3163  ;;  %3227 = vadd.xlane.f32.xlu0 %v3226_v62  ;;  %v3166_v58 = vpop.permute.xlu0 %3165  ;;  %v3119_v8 = vmul.f32 %v7701_v48, %v3039_v19  ;;  %v3120_v38 = vmul.f32 %v7703_v55, %v3040_v40  ;;  %v3041_v62 = vsel %vm2961_vm1, %v7716_v34, %v4449_v5  ;;  %v4451_v55 = vadd.f32 -1.0, %v4625_v60  ;;  %v7901_v19 = vld [vmem:[%s8650_s0 + $0x40] sm:$0xff]  ;;  %v7908_v40 = vld [vmem:[%s8650_s0 + $0x50] sm:$0xff] }
 0x82a   :  { %v3209_v61 = vadd.f32 %v3164_v49, %v3113_v4  ;;  %v3210_v17 = vadd.f32 %v3166_v58, %v3114_v14  ;;  %v4627_v52 = vpop.eup %4626  ;;  %v3042_v48 = vsel %vm2962_vm2, %v7720_v20, %v4450_v15  ;;  %v3121_v58 = vmul.f32 %v7722_v51, %v3041_v62  ;;  %v7915_v5 = vld [vmem:[%s8650_s0 + $0x60] sm:$0xff]  ;;  %v7922_v15 = vld [vmem:[%s8650_s0 + $0x70] sm:$0xff] }
 0x82b   :  { %v4629_v18 = vpop.eup %4628  ;;  %v4452_v63 = vadd.f32 -1.0, %v4627_v52  ;;  %v3122_v47 = vmul.f32 %v7724_v50, %v3042_v48  ;;  %v3043_v26 = vsel %vm2963_vm3, %v7735_v1, %v4451_v55  ;;  %v4754_v60 = vmov 13  }
 0x82c   :  { %v3229_v54 = vsel %vm1244_vm5, %v3209_v61, 0.0  ;;  %v3232_v24 = vsel %vm1244_vm5, %v3210_v17, 0.0  ;;  %v4631_v49 = vpop.eup %4630  ;;  %v4453_v32 = vadd.f32 -1.0, %v4629_v18  ;;  %v3123_v3 = vmul.f32 %v7737_v44, %v3043_v26  ;;  %v9198_v26 = vld [vmem:[#allocation10_spill] sm:$0xff] }
 0x82d   :  { %v3168_v36 = vpop.permute.xlu1 %3167  ;;  %3230 = vadd.xlane.f32.xlu0 %v3229_v54  ;;  %3233 = vadd.xlane.f32.xlu1 %v3232_v24  ;;  %v3170_v30 = vpop.permute.xlu0 %3169  ;;  %v3044_v51 = vsel %vm2964_vm4, %v7743_v42, %v4452_v63  ;;  %v4454_v50 = vadd.f32 -1.0, %v4631_v49  ;;  %v4755_v52 = vmov 14   ;;  %v9191_v63 = vld [vmem:[#allocation16_spill] sm:$0xff]  ;;  %v9192_v49 = vld [vmem:[#allocation21_spill] sm:$0xff] }
 0x82e   :  { %v3211_v9 = vadd.f32 %v3168_v36, %v3115_v21  ;;  %v3212_v31 = vadd.f32 %v3170_v30, %v3116_v28  ;;  %v3124_v10 = vmul.f32 %v7739_v46, %v3044_v51  ;;  %v3045_v36 = vsel %vm2965_vm6, %v7750_v6, %v4453_v32 }
 0x82f   :  { %v3046_v44 = vsel %vm2966_vm7, %v7758_v25, %v4454_v50  ;;  %v3125_v46 = vmul.f32 %v7752_v7, %v3045_v36  ;;  %v7828_v7 = vld [vmem:[%s8650_s0 + $0x8] sm:$0xff]  ;;  %v7840_v25 = vld [vmem:[%s8650_s0] sm:$0xff] }
 0x830   :  { %v3235_v13 = vsel %vm1244_vm5, %v3211_v9, 0.0  ;;  %v3238_v41 = vsel %vm1244_vm5, %v3212_v31, 0.0  ;;  %v3126_v30 = vmul.f32 %v7754_v56, %v3046_v44  ;;  %v7834_v56 = vld [vmem:[%s8650_s0 + $0x10] sm:$0xff] }
 0x831   :  { %v3172_v11 = vpop.permute.xlu1 %3171  ;;  %3236 = vadd.xlane.f32.xlu0 %v3235_v13  ;;  %3239 = vadd.xlane.f32.xlu1 %v3238_v41  ;;  %v3174_v2 = vpop.permute.xlu0 %3173  ;;  %v7864_v13 = vld [vmem:[%s8650_s0 + $0x58] sm:$0xff]  ;;  %v7870_v41 = vld [vmem:[%s8650_s0 + $0x28] sm:$0xff] }
 0x832   :  { %v3213_v57 = vadd.f32 %v3172_v11, %v3117_v39  ;;  %v3214_v22 = vadd.f32 %v3174_v2, %v3118_v45  ;;  %v7852_v39 = vld [vmem:[%s8650_s0 + $0x48] sm:$0xff]  ;;  %v7858_v45 = vld [vmem:[%s8650_s0 + $0x20] sm:$0xff]  ;;  %v7882_v2 = vld [vmem:[%s8650_s0 + $0x30] sm:$0xff] }
 0x833   :  { %v7876_v11 = vld [vmem:[%s8650_s0 + $0x68] sm:$0xff] }
 0x834   :  { %v3241_v35 = vsel %vm1244_vm5, %v3213_v57, 0.0  ;;  %v3244_v27 = vsel %vm1244_vm5, %v3214_v22, 0.0  ;;  %v7888_v57 = vld [vmem:[%s8650_s0 + $0x78] sm:$0xff] }
 0x835   :  { %v3176_v4 = vpop.permute.xlu1 %3175  ;;  %3242 = vadd.xlane.f32.xlu0 %v3241_v35  ;;  %3245 = vadd.xlane.f32.xlu1 %v3244_v27  ;;  %v3178_v14 = vpop.permute.xlu0 %3177  ;;  %v7894_v22 = vld [vmem:[%s8650_s0 + $0x38] sm:$0xff]  ;;  %s4757_s0 = smov [#allocation3]  }
 0x836   :  { %v3215_v16 = vadd.f32 %v3176_v4, %v3119_v8  ;;  %v3216_v0 = vadd.f32 %v3178_v14, %v3120_v38 }
 0x838   :  { %v3247_v61 = vsel %vm1244_vm5, %v3215_v16, 0.0  ;;  %v3250_v17 = vsel %vm1244_vm5, %v3216_v0, 0.0 }
 0x839   :  { %v3180_v33 = vpop.permute.xlu1 %3179  ;;  %3248 = vadd.xlane.f32.xlu0 %v3247_v61  ;;  %3251 = vadd.xlane.f32.xlu1 %v3250_v17  ;;  %v3182_v37 = vpop.permute.xlu0 %3181 }
 0x83a   :  { %v3217_v34 = vadd.f32 %v3180_v33, %v3121_v58  ;;  %v3218_v20 = vadd.f32 %v3182_v37, %v3122_v47  ;;  %v4274_v58 = vsel %vm4260_vm8, %v9192_v49, %v9191_v63  ;;  %v9195_v33 = vld [vmem:[#allocation77_spill] sm:$0xff]  ;;  %v9196_v37 = vld [vmem:[#allocation11_spill] sm:$0xff]  ;;  %v9207_v49 = vld [vmem:[#allocation32_spill] sm:$0xff] }
 0x83c   :  { %v3253_v21 = vsel %vm1244_vm5, %v3217_v34, 0.0  ;;  %v3256_v28 = vsel %vm1244_vm5, %v3218_v20, 0.0  ;;  %v4276_v34 = vsel %vm4260_vm8, %v9196_v37, %v9195_v33  ;;  %v9197_v20 = vld [vmem:[#allocation30_spill] sm:$0xff] }
 0x83d   :  { %v3184_v54 = vpop.permute.xlu1 %3183  ;;  %3254 = vadd.xlane.f32.xlu0 %v3253_v21  ;;  %3257 = vadd.xlane.f32.xlu1 %v3256_v28  ;;  %v3186_v24 = vpop.permute.xlu0 %3185  ;;  %v4275_v51 = vsel %vm4260_vm8, %v9198_v26, %v9197_v20 }
 0x83e   :  { %v3219_v1 = vadd.f32 %v3184_v54, %v3123_v3  ;;  %v3220_v42 = vadd.f32 %v3186_v24, %v3124_v10 }
 0x840   :  { %v3259_v59 = vsel %vm1244_vm5, %v3219_v1, 0.0  ;;  %v3262_v9 = vsel %vm1244_vm5, %v3220_v42, 0.0 }
 0x841   :  { %v3188_v31 = vpop.permute.xlu1 %3187  ;;  %3260 = vadd.xlane.f32.xlu0 %v3259_v59  ;;  %3263 = vadd.xlane.f32.xlu1 %v3262_v9  ;;  %v3190_v43 = vpop.permute.xlu0 %3189  ;;  %v9204_v9 = vld [vmem:[#allocation45_spill] sm:$0xff] }
 0x842   :  { %v3221_v29 = vadd.f32 %v3188_v31, %v3125_v46  ;;  %v3222_v12 = vadd.f32 %v3190_v43, %v3126_v30  ;;  %v8004_v31 = vand.u32 2147483647, %v9204_v9  ;;  %v9210_v9 = vld [vmem:[#allocation85_spill] sm:$0xff] }
 0x844   :  { %v3265_v53 = vsel %vm1244_vm5, %v3221_v29, 0.0  ;;  %v3268_v6 = vsel %vm1244_vm5, %v3222_v12, 0.0 }
 0x845   :  { %3266 = vadd.xlane.f32.xlu0 %v3265_v53  ;;  %3269 = vadd.xlane.f32.xlu1 %v3268_v6 }
 0x856   :  { %3369 = vperm.xlu1 %4528, %v7828_v7  }
 0x85a   :  { %3373 = vperm.xlu1 %4528, %v7834_v56  }
 0x85b   :  { %3365 = vperm.xlu0 %4527, %v7840_v25  }
 0x85e   :  { %3377 = vperm.xlu1 %4528, %v7846_v23  }
 0x85f   :  { %3401 = vperm.xlu0 %4527, %v7852_v39  }
 0x862   :  { %3381 = vperm.xlu1 %4528, %v7858_v45  }
 0x863   :  { %3409 = vperm.xlu0 %4527, %v7864_v13  }
 0x866   :  { %3385 = vperm.xlu1 %4528, %v7870_v41  }
 0x867   :  { %3417 = vperm.xlu0 %4527, %v7876_v11  }
 0x86a   :  { %3389 = vperm.xlu1 %4528, %v7882_v2  }
 0x86b   :  { %3425 = vperm.xlu0 %4527, %v7888_v57  }
 0x86e   :  { %3393 = vperm.xlu1 %4528, %v7894_v22  }
 0x86f   :  { %4530 = vset.pattern.permute.xlu0 %v4754_v60 }
 0x870   :  { %3465 = vperm.xlu0 %4530, %v7828_v7  }
 0x872   :  { %3397 = vperm.xlu1 %4528, %v7901_v19  }
 0x874   :  { %3477 = vperm.xlu0 %4530, %v7858_v45  }
 0x876   :  { %3405 = vperm.xlu1 %4528, %v7908_v40  }
 0x878   :  { %3485 = vperm.xlu0 %4530, %v7882_v2  }
 0x87a   :  { %3413 = vperm.xlu1 %4528, %v7915_v5  }
 0x87c   :  { %3493 = vperm.xlu0 %4530, %v7901_v19  }
 0x87e   :  { %3421 = vperm.xlu1 %4528, %v7922_v15  }
 0x880   :  { %3501 = vperm.xlu0 %4530, %v7908_v40  }
 0x882   :  { %4529 = vset.pattern.permute.xlu1 %v4754_v60 }
 0x883   :  { %3461 = vperm.xlu1 %4529, %v7840_v25  }
 0x884   :  { %3509 = vperm.xlu0 %4530, %v7915_v5  }
 0x887   :  { %3469 = vperm.xlu1 %4529, %v7834_v56  }
 0x888   :  { %3517 = vperm.xlu0 %4530, %v7922_v15  }
 0x88b   :  { %3473 = vperm.xlu1 %4529, %v7846_v23  }
 0x88c   :  { %4531 = vset.pattern.permute.xlu0 %v4755_v52 }
 0x88f   :  { %3481 = vperm.xlu1 %4529, %v7870_v41  }
 0x893   :  { %3489 = vperm.xlu1 %4529, %v7894_v22  }
 0x897   :  { %3497 = vperm.xlu1 %4529, %v7852_v39  }
 0x89b   :  { %3505 = vperm.xlu1 %4529, %v7864_v13  }
 0x89f   :  { %3513 = vperm.xlu1 %4529, %v7876_v11  }
 0x8a3   :  { %3521 = vperm.xlu1 %4529, %v7888_v57  }
 0x8a7   :  { %4532 = vset.pattern.permute.xlu1 %v4755_v52 }
 0x8b6   :  { %v7937_v8 = vpop.xlane.xlu1 %3224  ;;  %v7939_v38 = vpop.xlane.xlu0 %3227 }
 0x8b7   :  { %9179 = vst [vmem:[#allocation31_spill] sm:$0xff] %v7937_v8  ;;  %9180 = vst [vmem:[#allocation44_spill] sm:$0xff] %v7939_v38 }
 0x8ba   :  { %v7941_v35 = vpop.xlane.xlu1 %3233  ;;  %v7943_v27 = vpop.xlane.xlu0 %3230 }
 0x8bb   :  { %9181 = vst [vmem:[#allocation57_spill] sm:$0xff] %v7941_v35  ;;  %9182 = vst [vmem:[#allocation71_spill] sm:$0xff] %v7943_v27 }
 0x8be   :  { %v7945_v4 = vpop.xlane.xlu1 %3239  ;;  %v7947_v14 = vpop.xlane.xlu0 %3236 }
 0x8bf   :  { %9183 = vst [vmem:[#allocation84_spill] sm:$0xff] %v7945_v4  ;;  %9184 = vst [vmem:[#allocation99_spill] sm:$0xff] %v7947_v14 }
 0x8c2   :  { %v7949_v16 = vpop.xlane.xlu1 %3245  ;;  %v7951_v0 = vpop.xlane.xlu0 %3242 }
 0x8c3   :  { %9185 = vst [vmem:[#allocation111_spill] sm:$0xff] %v7949_v16  ;;  %9186 = vst [vmem:[#allocation124_spill] sm:$0xff] %v7951_v0  ;;  %v9220_v16 = vld [vmem:[#allocation103_spill] sm:$0xff] }
 0x8c6   :  { %v7953_v18 = vpop.xlane.xlu1 %3251  ;;  %v7955_v62 = vpop.xlane.xlu0 %3248 }
 0x8c7   :  { %9187 = vst [vmem:[#allocation34_spill] sm:$0xff] %v7953_v18  ;;  %9188 = vst [vmem:[#allocation47_spill] sm:$0xff] %v7955_v62  ;;  %v9217_v18 = vld [vmem:[#allocation75_spill] sm:$0xff] }
 0x8ca   :  { %v7957_v48 = vpop.xlane.xlu1 %3257  ;;  %v7959_v55 = vpop.xlane.xlu0 %3254 }
 0x8cb   :  { %9189 = vst [vmem:[#allocation60_spill] sm:$0xff] %v7957_v48  ;;  %9190 = vst [vmem:[#allocation74_spill] sm:$0xff] %v7959_v55 }
 0x8ce   :  { %v3264_v47 = vpop.xlane.xlu1 %3263  ;;  %v7964_v61 = vpop.xlane.xlu0 %3260 }
 0x8cf   :  { %9193 = vst [vmem:[#allocation87_spill] sm:$0xff] %v7964_v61  ;;  %v7967_v17 = vsel %vm4277_vm9, %v4274_v58, %v3264_v47  ;;  %v8019_v58 = vand.u32 2147483647, %v9207_v49  ;;  %v9213_v61 = vld [vmem:[#allocation35_spill] sm:$0xff] }
 0x8d0   :  { %9194 = vst [vmem:[#allocation102_spill] sm:$0xff] %v7967_v17 }
 0x8d2   :  { %v3270_v32 = vpop.xlane.xlu1 %3269  ;;  %v3267_v50 = vpop.xlane.xlu0 %3266 }
 0x8d3   :  { %v7976_v3 = vsel %vm4277_vm9, %v4276_v34, %v3270_v32  ;;  %v7979_v10 = vsel %vm4277_vm9, %v4275_v51, %v3267_v50  ;;  %v9208_v34 = vld [vmem:[#allocation58_spill] sm:$0xff]  ;;  %v9209_v32 = vld [vmem:[#allocation72_spill] sm:$0xff] }
 0x8d4   :  { %9199 = vst [vmem:[#allocation115_spill] sm:$0xff] %v7976_v3  ;;  %9200 = vst [vmem:[#allocation127_spill] sm:$0xff] %v7979_v10  ;;  %v8023_v20 = vand.u32 2147483647, %v9208_v34  ;;  %v8028_v50 = vand.u32 2147483647, %v9209_v32 }
 0x8d5   :  { %v9211_v3 = vld [vmem:[#allocation100_spill] sm:$0xff] }
 0x8d6   :  { %v7981_v21 = vpop.permute.xlu1 %3369  ;;  %v8037_v10 = vand.u32 2147483647, %v9211_v3 }
 0x8da   :  { %v7983_v28 = vpop.permute.xlu1 %3373  ;;  %v7985_v54 = vpop.permute.xlu0 %3365 }
 0x8de   :  { %v7987_v24 = vpop.permute.xlu1 %3377  ;;  %v7989_v1 = vpop.permute.xlu0 %3401 }
 0x8e2   :  { %v7991_v42 = vpop.permute.xlu1 %3381  ;;  %v7993_v36 = vpop.permute.xlu0 %3409 }
 0x8e3   :  { %9201 = vst [vmem:[#allocation38_spill] sm:$0xff] %v7993_v36 }
 0x8e6   :  { %v7995_v44 = vpop.permute.xlu1 %3385  ;;  %v7997_v46 = vpop.permute.xlu0 %3417 }
 0x8e7   :  { %9202 = vst [vmem:[#allocation54_spill] sm:$0xff] %v7997_v46 }
 0x8ea   :  { %v7999_v30 = vpop.permute.xlu1 %3389  ;;  %v8001_v59 = vpop.permute.xlu0 %3425 }
 0x8eb   :  { %9203 = vst [vmem:[#allocation68_spill] sm:$0xff] %v8001_v59 }
 0x8ee   :  { %v8006_v43 = vpop.permute.xlu1 %3393 }
 0x8ef   :  { %v3466_v29 = vpop.permute.xlu0 %3465 }
 0x8f0   :  { %v3525_v12 = vmul.f32 %v3466_v29, %v8004_v31  ;;  %v8031_v29 = vand.u32 2147483647, %v9210_v9 }
 0x8f2   :  { %v8009_v53 = vpop.permute.xlu1 %3397  ;;  %3558 = vrot.lane.b32.xlu1 %v3525_v12, %s4742_s3 }
 0x8f3   :  { %v3478_v52 = vpop.permute.xlu0 %3477 }
 0x8f6   :  { %v8012_v6 = vpop.permute.xlu1 %3405 }
 0x8f7   :  { %v3486_v37 = vpop.permute.xlu0 %3485 }
 0x8fa   :  { %v8014_v60 = vpop.permute.xlu1 %3413 }
 0x8fb   :  { %9205 = vst [vmem:[#allocation81_spill] sm:$0xff] %v8014_v60  ;;  %v3494_v12 = vpop.permute.xlu0 %3493 }
 0x8fe   :  { %v8016_v63 = vpop.permute.xlu1 %3421 }
 0x8ff   :  { %9206 = vst [vmem:[#allocation96_spill] sm:$0xff] %v8016_v63  ;;  %v3502_v9 = vpop.permute.xlu0 %3501 }
 0x902   :  { %v3462_v47 = vpop.permute.xlu1 %3461 }
 0x903   :  { %v3524_v33 = vmul.f32 %v3462_v47, %v8019_v58  ;;  %v3528_v47 = vmul.f32 %v3478_v52, %v8031_v29  ;;  %v8047_v52 = vand.u32 2147483647, %v9213_v61  ;;  %v3510_v61 = vpop.permute.xlu0 %3509 }
 0x905   :  { %3556 = vrot.lane.b32.xlu0 %v3524_v33, %s4742_s3  ;;  %v9212_v33 = vld [vmem:[#allocation112_spill] sm:$0xff] }
 0x906   :  { %v3470_v26 = vpop.permute.xlu1 %3469  ;;  %v8040_v17 = vand.u32 2147483647, %v9212_v33  ;;  %v9215_v33 = vld [vmem:[#allocation48_spill] sm:$0xff] }
 0x907   :  { %v3526_v51 = vmul.f32 %v3470_v26, %v8023_v20 }
 0x908   :  { %v3530_v32 = vmul.f32 %v3486_v37, %v8040_v17  ;;  %v8057_v37 = vand.u32 2147483647, %v9215_v33 }
 0x909   :  { %3560 = vrot.lane.b32.xlu0 %v3526_v51, %s4742_s3 }
 0x90a   :  { %v3474_v49 = vpop.permute.xlu1 %3473 }
 0x90b   :  { %v3527_v34 = vmul.f32 %v3474_v49, %v8028_v50  ;;  %v9214_v49 = vld [vmem:[#allocation125_spill] sm:$0xff] }
 0x90c   :  { %v8050_v48 = vand.u32 2147483647, %v9214_v49 }
 0x90d   :  { %3562 = vrot.lane.b32.xlu1 %v3527_v34, %s4742_s3  ;;  %3564 = vrot.lane.b32.xlu0 %v3528_v47, %s4742_s3  ;;  %v3532_v34 = vmul.f32 %v3494_v12, %v8047_v52  ;;  %v8067_v12 = vand.u32 2147483647, %v9217_v18 }
 0x90e   :  { %v3482_v26 = vpop.permute.xlu1 %3481 }
 0x90f   :  { %v3529_v51 = vmul.f32 %v3482_v26, %v8037_v10  ;;  %v9216_v26 = vld [vmem:[#allocation61_spill] sm:$0xff] }
 0x910   :  { %v8060_v55 = vand.u32 2147483647, %v9216_v26  ;;  %v3518_v26 = vpop.permute.xlu0 %3517 }
 0x911   :  { %3566 = vrot.lane.b32.xlu1 %v3529_v51, %s4742_s3  ;;  %3568 = vrot.lane.b32.xlu0 %v3530_v32, %s4742_s3 }
 0x912   :  { %v3490_v3 = vpop.permute.xlu1 %3489  ;;  %v3534_v51 = vmul.f32 %v3502_v9, %v8060_v55  ;;  %v8077_v9 = vand.u32 2147483647, %v9220_v16 }
 0x913   :  { %v3531_v47 = vmul.f32 %v3490_v3, %v8050_v48  ;;  %v9218_v3 = vld [vmem:[#allocation88_spill] sm:$0xff] }
 0x914   :  { %v8070_v62 = vand.u32 2147483647, %v9218_v3  ;;  %9221 = vst [vmem:[#allocation121_spill] sm:$0xff] %v8077_v9  ;;  %v9224_v3 = vld [vmem:[#allocation128_spill] sm:$0xff] }
 0x915   :  { %3570 = vrot.lane.b32.xlu1 %v3531_v47, %s4742_s3  ;;  %3572 = vrot.lane.b32.xlu0 %v3532_v34, %s4742_s3 }
 0x916   :  { %v3498_v49 = vpop.permute.xlu1 %3497  ;;  %9219 = vst [vmem:[#allocation108_spill] sm:$0xff] %v8070_v62  ;;  %v3536_v47 = vmul.f32 %v3510_v61, %v8070_v62  ;;  %v8087_v61 = vand.u32 2147483647, %v9224_v3 }
 0x917   :  { %v3533_v32 = vmul.f32 %v3498_v49, %v8057_v37  ;;  %v9222_v49 = vld [vmem:[#allocation116_spill] sm:$0xff] }
 0x918   :  { %v8080_v0 = vand.u32 2147483647, %v9222_v49  ;;  %9225 = vst [vmem:[#allocation41_spill] sm:$0xff] %v8087_v61 }
 0x919   :  { %3574 = vrot.lane.b32.xlu1 %v3533_v32, %s4742_s3  ;;  %3576 = vrot.lane.b32.xlu0 %v3534_v51, %s4742_s3 }
 0x91a   :  { %v3506_v33 = vpop.permute.xlu1 %3505  ;;  %9223 = vst [vmem:[#allocation130_spill] sm:$0xff] %v8080_v0  ;;  %v3538_v32 = vmul.f32 %v3518_v26, %v8080_v0 }
 0x91b   :  { %v3535_v34 = vmul.f32 %v3506_v33, %v8067_v12 }
 0x91d   :  { %3578 = vrot.lane.b32.xlu1 %v3535_v34, %s4742_s3  ;;  %3580 = vrot.lane.b32.xlu0 %v3536_v47, %s4742_s3  ;;  %v4756_v47 = vmov 15  }
 0x91e   :  { %v3514_v18 = vpop.permute.xlu1 %3513 }
 0x91f   :  { %v3537_v51 = vmul.f32 %v3514_v18, %v8077_v9 }
 0x921   :  { %3582 = vrot.lane.b32.xlu1 %v3537_v51, %s4742_s3  ;;  %3584 = vrot.lane.b32.xlu0 %v3538_v32, %s4742_s3 }
 0x922   :  { %v3522_v16 = vpop.permute.xlu1 %3521 }
 0x923   :  { %v3539_v33 = vmul.f32 %v3522_v16, %v8087_v61 }
 0x925   :  { %3586 = vrot.lane.b32.xlu1 %v3539_v33, %s4742_s3  ;;  %3621 = vperm.xlu0 %4531, %v7840_v25  }
 0x929   :  { %3625 = vperm.xlu1 %4532, %v7828_v7   ;;  %3633 = vperm.xlu0 %4531, %v7846_v23  }
 0x92d   :  { %3629 = vperm.xlu1 %4532, %v7834_v56   ;;  %3641 = vperm.xlu0 %4531, %v7870_v41  }
 0x931   :  { %3637 = vperm.xlu1 %4532, %v7858_v45   ;;  %3649 = vperm.xlu0 %4531, %v7894_v22  }
 0x935   :  { %3645 = vperm.xlu1 %4532, %v7882_v2   ;;  %3657 = vperm.xlu0 %4531, %v7852_v39  }
 0x939   :  { %3653 = vperm.xlu1 %4532, %v7901_v19   ;;  %3665 = vperm.xlu0 %4531, %v7864_v13  }
 0x93d   :  { %3661 = vperm.xlu1 %4532, %v7908_v40   ;;  %3673 = vperm.xlu0 %4531, %v7876_v11  }
 0x941   :  { %3669 = vperm.xlu1 %4532, %v7915_v5   ;;  %3681 = vperm.xlu0 %4531, %v7888_v57  }
 0x945   :  { %3677 = vperm.xlu1 %4532, %v7922_v15   ;;  %4534 = vset.pattern.permute.xlu0 %v4756_v47 }
 0x949   :  { %4533 = vset.pattern.permute.xlu1 %v4756_v47 }
 0x964   :  { %v8111_v26 = vpop.permute.xlu1 %3558 }
 0x977   :  { %v8109_v34 = vpop.permute.xlu0 %3556 }
 0x97b   :  { %v8113_v49 = vpop.permute.xlu0 %3560 }
 0x97f   :  { %v8115_v18 = vpop.permute.xlu1 %3562  ;;  %v8117_v32 = vpop.permute.xlu0 %3564 }
 0x983   :  { %v8119_v51 = vpop.permute.xlu1 %3566  ;;  %v8121_v3 = vpop.permute.xlu0 %3568 }
 0x987   :  { %v8123_v16 = vpop.permute.xlu1 %3570  ;;  %v8125_v33 = vpop.permute.xlu0 %3572 }
 0x98b   :  { %v8127_v4 = vpop.permute.xlu1 %3574  ;;  %v8129_v47 = vpop.permute.xlu0 %3576 }
 0x98c   :  { %9226 = vst [vmem:[#allocation51_spill] sm:$0xff] %v8129_v47 }
 0x98f   :  { %v8131_v14 = vpop.permute.xlu1 %3578  ;;  %v8133_v35 = vpop.permute.xlu0 %3580 }
 0x990   :  { %9227 = vst [vmem:[#allocation65_spill] sm:$0xff] %v8131_v14  ;;  %9228 = vst [vmem:[#allocation89_spill] sm:$0xff] %v8133_v35 }
 0x993   :  { %v8135_v27 = vpop.permute.xlu1 %3582  ;;  %v8137_v38 = vpop.permute.xlu0 %3584 }
 0x994   :  { %9229 = vst [vmem:[#allocation73_spill] sm:$0xff] %v8135_v27  ;;  %9230 = vst [vmem:[#allocation8_spill] sm:$0xff] %v8137_v38 }
 0x997   :  { %v8139_v8 = vpop.permute.xlu1 %3586 }
 0x998   :  { %9231 = vst [vmem:[#allocation78_spill] sm:$0xff] %v8139_v8 }
 0x9a4   :  { %v3622_v59 = vpop.permute.xlu0 %3621 }
 0x9a5   :  { %v3684_v63 = vmul.f32 %v3622_v59, %v8019_v58 }
 0x9a7   :  { %3716 = vrot.lane.b32.xlu1 %v3684_v63, %s4743_s24 }
 0x9a8   :  { %v3626_v46 = vpop.permute.xlu1 %3625  ;;  %v3634_v60 = vpop.permute.xlu0 %3633 }
 0x9a9   :  { %v3685_v36 = vmul.f32 %v3626_v46, %v8004_v31  ;;  %v3687_v35 = vmul.f32 %v3634_v60, %v8028_v50 }
 0x9ab   :  { %3718 = vrot.lane.b32.xlu0 %v3685_v36, %s4743_s24 }
 0x9ac   :  { %v3630_v14 = vpop.permute.xlu1 %3629  ;;  %v3642_v47 = vpop.permute.xlu0 %3641 }
 0x9ad   :  { %v3686_v27 = vmul.f32 %v3630_v14, %v8023_v20  ;;  %v3689_v63 = vmul.f32 %v3642_v47, %v8037_v10 }
 0x9af   :  { %3720 = vrot.lane.b32.xlu1 %v3686_v27, %s4743_s24  ;;  %3722 = vrot.lane.b32.xlu0 %v3687_v35, %s4743_s24 }
 0x9b0   :  { %v3638_v8 = vpop.permute.xlu1 %3637  ;;  %v3650_v59 = vpop.permute.xlu0 %3649 }
 0x9b1   :  { %v3688_v38 = vmul.f32 %v3638_v8, %v8031_v29  ;;  %v3691_v46 = vmul.f32 %v3650_v59, %v8050_v48 }
 0x9b3   :  { %3724 = vrot.lane.b32.xlu1 %v3688_v38, %s4743_s24  ;;  %3726 = vrot.lane.b32.xlu0 %v3689_v63, %s4743_s24 }
 0x9b4   :  { %v3646_v36 = vpop.permute.xlu1 %3645  ;;  %v3658_v14 = vpop.permute.xlu0 %3657 }
 0x9b5   :  { %v3690_v60 = vmul.f32 %v3646_v36, %v8040_v17  ;;  %v3693_v27 = vmul.f32 %v3658_v14, %v8057_v37 }
 0x9b7   :  { %3728 = vrot.lane.b32.xlu1 %v3690_v60, %s4743_s24  ;;  %3730 = vrot.lane.b32.xlu0 %v3691_v46, %s4743_s24 }
 0x9b8   :  { %v3654_v35 = vpop.permute.xlu1 %3653 }
 0x9b9   :  { %v3692_v47 = vmul.f32 %v3654_v35, %v8047_v52 }
 0x9bb   :  { %3732 = vrot.lane.b32.xlu1 %v3692_v47, %s4743_s24  ;;  %3734 = vrot.lane.b32.xlu0 %v3693_v27, %s4743_s24 }
 0x9bf   :  { %3781 = vperm.xlu1 %4533, %v7840_v25   ;;  %3785 = vperm.xlu0 %4534, %v7828_v7   ;;  %v3662_v7 = vpop.permute.xlu1 %3661  ;;  %v9232_v25 = vmov 0  }
 0x9c3   :  { %3789 = vperm.xlu1 %4533, %v7834_v56   ;;  %3797 = vperm.xlu0 %4534, %v7858_v45   ;;  %v3694_v56 = vmul.f32 %v3662_v7, %v8060_v55 }
 0x9c7   :  { %3793 = vperm.xlu1 %4533, %v7846_v23   ;;  %3805 = vperm.xlu0 %4534, %v7882_v2   ;;  %v3666_v23 = vpop.permute.xlu0 %3665 }
 0x9cb   :  { %3801 = vperm.xlu1 %4533, %v7870_v41   ;;  %3813 = vperm.xlu0 %4534, %v7901_v19   ;;  %v3674_v45 = vpop.permute.xlu0 %3673  ;;  %v3670_v41 = vpop.permute.xlu1 %3669 }
 0x9cf   :  { %3809 = vperm.xlu1 %4533, %v7894_v22   ;;  %3821 = vperm.xlu0 %4534, %v7908_v40   ;;  %v8184_v2 = vpop.permute.xlu1 %3677 }
 0x9d3   :  { %3817 = vperm.xlu1 %4533, %v7852_v39   ;;  %3829 = vperm.xlu0 %4534, %v7915_v5   ;;  %v3695_v39 = vmul.f32 %v3666_v23, %v8067_v12 }
 0x9d7   :  { %3825 = vperm.xlu1 %4533, %v7864_v13   ;;  %3837 = vperm.xlu0 %4534, %v7922_v15   ;;  %v8182_v13 = vpop.permute.xlu0 %3681 }
 0x9db   :  { %3833 = vperm.xlu1 %4533, %v7876_v11   ;;  %3736 = vrot.lane.b32.xlu0 %v3694_v56, %s4743_s24 }
 0x9dc   :  { %4535 = vset.pattern.permute.xlu0 %v9232_v25 }
 0x9df   :  { %3841 = vperm.xlu1 %4533, %v7888_v57  }
 0x9e3   :  { %3738 = vrot.lane.b32.xlu1 %v3695_v39, %s4743_s24 }
 0xa19   :  { %v8188_v11 = vpop.permute.xlu1 %3716 }
 0xa1d   :  { %v8186_v22 = vpop.permute.xlu0 %3718 }
 0xa21   :  { %v8190_v19 = vpop.permute.xlu1 %3720  ;;  %v8192_v40 = vpop.permute.xlu0 %3722 }
 0xa25   :  { %v8194_v5 = vpop.permute.xlu1 %3724  ;;  %v8196_v57 = vpop.permute.xlu0 %3726 }
 0xa29   :  { %v8198_v15 = vpop.permute.xlu1 %3728  ;;  %v8200_v8 = vpop.permute.xlu0 %3730 }
 0xa2d   :  { %v8202_v38 = vpop.permute.xlu1 %3732  ;;  %v8204_v59 = vpop.permute.xlu0 %3734 }
 0xa2e   :  { %9233 = vst [vmem:[#allocation117_spill] sm:$0xff] %v8204_v59 }
 0xa3e   :  { %v3782_v63 = vpop.permute.xlu1 %3781  ;;  %v3786_v36 = vpop.permute.xlu0 %3785 }
 0xa3f   :  { %v3844_v46 = vmul.f32 %v3782_v63, %v8019_v58  ;;  %v3845_v60 = vmul.f32 %v3786_v36, %v8004_v31 }
 0xa41   :  { %3876 = vrot.lane.b32.xlu0 %v3844_v46, %s4744_s25  ;;  %3878 = vrot.lane.b32.xlu1 %v3845_v60, %s4744_s25 }
 0xa42   :  { %v3790_v14 = vpop.permute.xlu1 %3789  ;;  %v3798_v35 = vpop.permute.xlu0 %3797 }
 0xa43   :  { %v3846_v27 = vmul.f32 %v3790_v14, %v8023_v20  ;;  %v3848_v56 = vmul.f32 %v3798_v35, %v8031_v29 }
 0xa45   :  { %3880 = vrot.lane.b32.xlu0 %v3846_v27, %s4744_s25 }
 0xa46   :  { %v3794_v47 = vpop.permute.xlu1 %3793  ;;  %v3806_v7 = vpop.permute.xlu0 %3805 }
 0xa47   :  { %v3847_v25 = vmul.f32 %v3794_v47, %v8028_v50  ;;  %v3850_v63 = vmul.f32 %v3806_v7, %v8040_v17 }
 0xa49   :  { %3882 = vrot.lane.b32.xlu1 %v3847_v25, %s4744_s25  ;;  %3884 = vrot.lane.b32.xlu0 %v3848_v56, %s4744_s25  ;;  %v3696_v56 = vmul.f32 %v3670_v41, %v8070_v62  ;;  %v9234_v25 = vld [vmem:[#allocation39_spill] sm:$0xff]  ;;  %v9236_v41 = vld [vmem:[#allocation20_spill] sm:$0xff] }
 0xa4a   :  { %v3802_v23 = vpop.permute.xlu1 %3801  ;;  %v3814_v39 = vpop.permute.xlu0 %3813 }
 0xa4b   :  { %v3849_v36 = vmul.f32 %v3802_v23, %v8037_v10  ;;  %v3852_v60 = vmul.f32 %v3814_v39, %v8047_v52  ;;  %v3332_v23 = vand.u32 2147483647, %v9234_v25 }
 0xa4d   :  { %3886 = vrot.lane.b32.xlu1 %v3849_v36, %s4744_s25  ;;  %3888 = vrot.lane.b32.xlu0 %v3850_v63, %s4744_s25  ;;  %v9235_v36 = vld [vmem:[#allocation55_spill] sm:$0xff] }
 0xa4e   :  { %v3810_v46 = vpop.permute.xlu1 %3809  ;;  %v3822_v35 = vpop.permute.xlu0 %3821 }
 0xa4f   :  { %v3851_v14 = vmul.f32 %v3810_v46, %v8050_v48  ;;  %v3854_v47 = vmul.f32 %v3822_v35, %v8060_v55  ;;  %v3333_v46 = vand.u32 2147483647, %v9235_v36 }
 0xa51   :  { %3890 = vrot.lane.b32.xlu1 %v3851_v14, %s4744_s25  ;;  %3892 = vrot.lane.b32.xlu0 %v3852_v60, %s4744_s25  ;;  %v3348_v60 = vmax.f32 %v9234_v25, 0.0  ;;  %v3697_v14 = vmul.f32 %v3674_v45, %v8077_v9  ;;  %v3698_v45 = vmul.f32 %v8184_v2, %v8080_v0  ;;  %v3699_v2 = vmul.f32 %v8182_v13, %v8087_v61 }
 0xa52   :  { %v3818_v27 = vpop.permute.xlu1 %3817 }
 0xa53   :  { %v3853_v7 = vmul.f32 %v3818_v27, %v8057_v37  ;;  %v4116_v35 = vmul.f32 %v3348_v60, %v9236_v41  ;;  %v3830_v27 = vpop.permute.xlu0 %3829  ;;  %v9238_v60 = vld [vmem:[#allocation82_spill] sm:$0xff] }
 0xa55   :  { %3894 = vrot.lane.b32.xlu1 %v3853_v7, %s4744_s25  ;;  %3896 = vrot.lane.b32.xlu0 %v3854_v47, %s4744_s25  ;;  %v3856_v47 = vmul.f32 %v3830_v27, %v8070_v62  ;;  %v9237_v7 = vld [vmem:[#allocation69_spill] sm:$0xff] }
 0xa56   :  { %v3826_v39 = vpop.permute.xlu1 %3825 }
 0xa57   :  { %v3855_v63 = vmul.f32 %v3826_v39, %v8067_v12 }
 0xa59   :  { %4052 = vrot.lane.b32.xlu1 %v3332_v23, %s4742_s3  ;;  %3740 = vrot.lane.b32.xlu0 %v3696_v56, %s4743_s24  ;;  %v3334_v56 = vand.u32 2147483647, %v9237_v7  ;;  %v3349_v23 = vmax.f32 %v9235_v36, 0.0 }
 0xa5b   :  { %v4117_v39 = vmul.f32 %v3349_v23, %v9236_v41  ;;  %v9239_v23 = vld [vmem:[#allocation97_spill] sm:$0xff] }
 0xa5d   :  { %3898 = vrot.lane.b32.xlu1 %v3855_v63, %s4744_s25  ;;  %4054 = vrot.lane.b32.xlu0 %v3333_v46, %s4742_s3  ;;  %v3834_v63 = vpop.permute.xlu1 %3833 }
 0xa5e   :  { %v3857_v46 = vmul.f32 %v3834_v63, %v8077_v9  ;;  %v3351_v63 = vmax.f32 %v9238_v60, 0.0 }
 0xa61   :  { %4148 = vrot.lane.b32.xlu1 %v4116_v35, %s4743_s24  ;;  %3742 = vrot.lane.b32.xlu0 %v3697_v14, %s4743_s24  ;;  %v3335_v14 = vand.u32 2147483647, %v9238_v60  ;;  %v3350_v35 = vmax.f32 %v9237_v7, 0.0 }
 0xa63   :  { %v4118_v27 = vmul.f32 %v3350_v35, %v9236_v41 }
 0xa65   :  { %4056 = vrot.lane.b32.xlu0 %v3334_v56, %s4742_s3  ;;  %3900 = vrot.lane.b32.xlu1 %v3856_v47, %s4744_s25  ;;  %v3838_v47 = vpop.permute.xlu0 %3837 }
 0xa66   :  { %v3858_v56 = vmul.f32 %v3838_v47, %v8080_v0 }
 0xa69   :  { %3744 = vrot.lane.b32.xlu0 %v3698_v45, %s4743_s24  ;;  %4150 = vrot.lane.b32.xlu1 %v4117_v39, %s4743_s24  ;;  %v3336_v45 = vand.u32 2147483647, %v9239_v23  ;;  %v3842_v39 = vpop.permute.xlu1 %3841 }
 0xa6a   :  { %v3859_v13 = vmul.f32 %v3842_v39, %v8087_v61 }
 0xa6d   :  { %4058 = vrot.lane.b32.xlu0 %v3335_v14, %s4742_s3  ;;  %3902 = vrot.lane.b32.xlu1 %v3857_v46, %s4744_s25  ;;  %v4119_v46 = vmul.f32 %v3351_v63, %v9236_v41  ;;  %v3352_v14 = vmax.f32 %v9239_v23, 0.0 }
 0xa6f   :  { %v4120_v35 = vmul.f32 %v3352_v14, %v9236_v41 }
 0xa71   :  { %3746 = vrot.lane.b32.xlu0 %v3699_v2, %s4743_s24  ;;  %4152 = vrot.lane.b32.xlu1 %v4118_v27, %s4743_s24  ;;  %v9240_v2 = vld [vmem:[#allocation109_spill] sm:$0xff] }
 0xa72   :  { %v3337_v27 = vand.u32 2147483647, %v9240_v2  ;;  %v3353_v47 = vmax.f32 %v9240_v2, 0.0 }
 0xa75   :  { %4060 = vrot.lane.b32.xlu0 %v3336_v45, %s4742_s3  ;;  %3904 = vrot.lane.b32.xlu1 %v3858_v56, %s4744_s25  ;;  %v4121_v56 = vmul.f32 %v3353_v47, %v9236_v41  ;;  %v9241_v45 = vld [vmem:[#allocation122_spill] sm:$0xff] }
 0xa76   :  { %v3338_v39 = vand.u32 2147483647, %v9241_v45  ;;  %v3354_v63 = vmax.f32 %v9241_v45, 0.0  ;;  %v9243_v47 = vld [vmem:[#allocation42_spill] sm:$0xff] }
 0xa77   :  { %v3340_v61 = vand.u32 2147483647, %v9243_v47 }
 0xa79   :  { %3906 = vrot.lane.b32.xlu0 %v3859_v13, %s4744_s25  ;;  %4154 = vrot.lane.b32.xlu1 %v4119_v46, %s4743_s24  ;;  %v4122_v13 = vmul.f32 %v3354_v63, %v9236_v41  ;;  %v9242_v46 = vld [vmem:[#allocation131_spill] sm:$0xff]  ;;  %v9244_v63 = vld [vmem:[#allocation52_spill] sm:$0xff] }
 0xa7a   :  { %v3339_v14 = vand.u32 2147483647, %v9242_v46  ;;  %v3341_v0 = vand.u32 2147483647, %v9244_v63 }
 0xa7d   :  { %4156 = vrot.lane.b32.xlu0 %v4120_v35, %s4743_s24  ;;  %4062 = vrot.lane.b32.xlu1 %v3337_v27, %s4742_s3  ;;  %v3355_v35 = vmax.f32 %v9242_v46, 0.0 }
 0xa7f   :  { %v4123_v27 = vmul.f32 %v3355_v35, %v9236_v41  ;;  %v9245_v35 = vld [vmem:[#allocation66_spill] sm:$0xff] }
 0xa80   :  { %v3342_v9 = vand.u32 2147483647, %v9245_v35 }
 0xa81   :  { %4158 = vrot.lane.b32.xlu0 %v4121_v56, %s4743_s24  ;;  %4064 = vrot.lane.b32.xlu1 %v3338_v39, %s4742_s3  ;;  %v3356_v56 = vmax.f32 %v9243_v47, 0.0 }
 0xa83   :  { %v4124_v39 = vmul.f32 %v3356_v56, %v9236_v41  ;;  %v9246_v56 = vld [vmem:[#allocation79_spill] sm:$0xff] }
 0xa84   :  { %v3343_v62 = vand.u32 2147483647, %v9246_v56 }
 0xa85   :  { %4160 = vrot.lane.b32.xlu0 %v4122_v13, %s4743_s24  ;;  %4066 = vrot.lane.b32.xlu1 %v3339_v14, %s4742_s3  ;;  %v3357_v13 = vmax.f32 %v9244_v63, 0.0 }
 0xa87   :  { %v4125_v14 = vmul.f32 %v3357_v13, %v9236_v41  ;;  %v9247_v13 = vld [vmem:[#allocation93_spill] sm:$0xff] }
 0xa88   :  { %v3344_v59 = vand.u32 2147483647, %v9247_v13 }
 0xa89   :  { %4162 = vrot.lane.b32.xlu0 %v4123_v27, %s4743_s24  ;;  %4068 = vrot.lane.b32.xlu1 %v3340_v61, %s4742_s3  ;;  %v3358_v61 = vmax.f32 %v9245_v35, 0.0 }
 0xa8b   :  { %v4126_v27 = vmul.f32 %v3358_v61, %v9236_v41  ;;  %v9248_v61 = vld [vmem:[#allocation106_spill] sm:$0xff] }
 0xa8c   :  { %v3345_v35 = vand.u32 2147483647, %v9248_v61 }
 0xa8d   :  { %4164 = vrot.lane.b32.xlu0 %v4124_v39, %s4743_s24  ;;  %4070 = vrot.lane.b32.xlu1 %v3341_v0, %s4742_s3  ;;  %v3359_v0 = vmax.f32 %v9246_v56, 0.0 }
 0xa8f   :  { %v4127_v39 = vmul.f32 %v3359_v0, %v9236_v41  ;;  %v9249_v0 = vld [vmem:[#allocation119_spill] sm:$0xff] }
 0xa90   :  { %v3346_v56 = vand.u32 2147483647, %v9249_v0 }
 0xa91   :  { %4166 = vrot.lane.b32.xlu0 %v4125_v14, %s4743_s24  ;;  %4072 = vrot.lane.b32.xlu1 %v3342_v9, %s4742_s3  ;;  %v3360_v9 = vmax.f32 %v9247_v13, 0.0 }
 0xa93   :  { %v4128_v14 = vmul.f32 %v3360_v9, %v9236_v41  ;;  %v9250_v9 = vld [vmem:[#allocation134_spill] sm:$0xff] }
 0xa94   :  { %v3347_v13 = vand.u32 2147483647, %v9250_v9 }
 0xa95   :  { %4168 = vrot.lane.b32.xlu0 %v4126_v27, %s4743_s24  ;;  %4074 = vrot.lane.b32.xlu1 %v3343_v62, %s4742_s3  ;;  %v3361_v62 = vmax.f32 %v9248_v61, 0.0 }
 0xa97   :  { %v4129_v27 = vmul.f32 %v3361_v62, %v9236_v41  ;;  %v3428_v62 = vmul.f32 %v7985_v54, %v8019_v58 }
 0xa99   :  { %4170 = vrot.lane.b32.xlu0 %v4127_v39, %s4743_s24  ;;  %4076 = vrot.lane.b32.xlu1 %v3344_v59, %s4742_s3  ;;  %v3362_v59 = vmax.f32 %v9249_v0, 0.0  ;;  %v8337_v0 = vpop.permute.xlu1 %3738 }
 0xa9b   :  { %v4130_v39 = vmul.f32 %v3362_v59, %v9236_v41 }
 0xa9d   :  { %4172 = vrot.lane.b32.xlu0 %v4128_v14, %s4743_s24  ;;  %4078 = vrot.lane.b32.xlu1 %v3345_v35, %s4742_s3  ;;  %v3363_v14 = vmax.f32 %v9250_v9, 0.0  ;;  %v3429_v9 = vmul.f32 %v7981_v21, %v8004_v31 }
 0xa9f   :  { %v4131_v35 = vmul.f32 %v3363_v14, %v9236_v41  ;;  %v3445_v14 = vadd.f32 %v3429_v9, %v9235_v36 }
 0xaa1   :  { %4174 = vrot.lane.b32.xlu0 %v4129_v27, %s4743_s24  ;;  %4080 = vrot.lane.b32.xlu1 %v3346_v56, %s4742_s3  ;;  %v3444_v56 = vadd.f32 %v3428_v62, %v9234_v25  ;;  %v8331_v27 = vpop.permute.xlu0 %3736  ;;  %v3605_v54 = vadd.f32 %v8111_v26, %v3445_v14  ;;  %v3430_v25 = vmul.f32 %v7983_v28, %v8023_v20 }
 0xaa2   :  { %v3431_v26 = vmul.f32 %v7987_v24, %v8028_v50 }
 0xaa3   :  { %v3604_v59 = vadd.f32 %v8109_v34, %v3444_v56  ;;  %v3765_v34 = vadd.f32 %v8186_v22, %v3605_v54  ;;  %v3446_v56 = vadd.f32 %v3430_v25, %v9237_v7  ;;  %v3432_v7 = vmul.f32 %v7991_v42, %v8031_v29 }
 0xaa5   :  { %4176 = vrot.lane.b32.xlu0 %v4130_v39, %s4743_s24  ;;  %4082 = vrot.lane.b32.xlu1 %v3347_v13, %s4742_s3  ;;  %v3764_v39 = vadd.f32 %v8188_v11, %v3604_v59  ;;  %v3606_v36 = vadd.f32 %v8113_v49, %v3446_v56  ;;  %v3447_v49 = vadd.f32 %v3431_v26, %v9238_v60  ;;  %s4378_s3 = sshll.u32 %s4757_s0, 4  ;;  %s4379_s3 = int_to_ptr.vmem [resolvable:$true] %s4378_s3 }
 0xaa6   :  { %p4717_p1 = scmp.lt.s32.totalorder %s4379_s3, %s4379_s3 }
 0xaa7   :  { %v3766_v28 = vadd.f32 %v8190_v19, %v3606_v36  ;;  %v3607_v24 = vadd.f32 %v8115_v18, %v3447_v49  ;;  %v3433_v19 = vmul.f32 %v7995_v44, %v8037_v10  ;;  %v3434_v18 = vmul.f32 %v7999_v30, %v8040_v17 }
 0xaa9   :  { %4178 = vrot.lane.b32.xlu1 %v4131_v35, %s4743_s24  ;;  %v3767_v25 = vadd.f32 %v8192_v40, %v3607_v24  ;;  %v3449_v56 = vadd.f32 %v3433_v19, %v9240_v2  ;;  %v3450_v17 = vadd.f32 %v3434_v18, %v9241_v45  ;;  %s4712_s24 = scalar_lea.vmem %s4379_s3, 64 }
 0xaaa   :  { %p4713_p0 = scmp.ne.s32.totalorder %s4379_s3, %s4712_s24  ;;  %p4718_p2 = scmp.lt.s32.totalorder %s4712_s24, %s4712_s24 }
 0xaab   :  { %v3609_v44 = vadd.f32 %v8119_v51, %v3449_v56  ;;  %v3610_v51 = vadd.f32 %v8121_v3, %v3450_v17 }
 0xaac   :  { %p4719_p3 = por %p4718_p2, %p4717_p1 }
 0xaad   :  { %v3770_v45 = vadd.f32 %v8198_v15, %v3610_v51 }
 0xaae   :  { %p4720_p4 = pnand %p4719_p3, %p4713_p0 }
 0xab3   :  { %v3877_v13 = vpop.permute.xlu0 %3876  ;;  %v3879_v35 = vpop.permute.xlu1 %3878 }
 0xab4   :  { %v3924_v41 = vadd.f32 %v3877_v13, %v3764_v39  ;;  %v8344_v31 = vadd.f32 %v3879_v35, %v3765_v34 }
 0xab6   :  { %v3956_v58 = vmin.f32 %v3924_v41, 0.0  ;;  %v3957_v9 = vmin.f32 %v8344_v31, 0.0  ;;  %vm3940_vm10 = vcmp.gt.f32.partialorder %v3924_v41, 0.0  ;;  %vm3941_vm11 = vcmp.gt.f32.partialorder %v8344_v31, 0.0 }
 0xab7   :  { %v3881_v61 = vpop.permute.xlu0 %3880 }
 0xab8   :  { %v3972_v11 = vmul.f32 1.442695, %v3956_v58  ;;  %v3974_v13 = vmul.f32 1.442695, %v3957_v9  ;;  %v8356_v14 = vadd.f32 %v3881_v61, %v3766_v28  ;;  %v3448_v61 = vadd.f32 %v3432_v7, %v9239_v23 }
 0xaba   :  { %4632 = vpow2.f32 %v3972_v11  ;;  %v3958_v50 = vmin.f32 %v8356_v14, 0.0  ;;  %v3608_v60 = vadd.f32 %v8117_v32, %v3448_v61  ;;  %vm3942_vm12 = vcmp.gt.f32.partialorder %v8356_v14, 0.0 }
 0xabb   :  { %v3883_v62 = vpop.permute.xlu1 %3882  ;;  %v3885_v21 = vpop.permute.xlu0 %3884  ;;  %4634 = vpow2.f32 %v3974_v13 }
 0xabc   :  { %v3976_v34 = vmul.f32 1.442695, %v3958_v50  ;;  %v8374_v11 = vadd.f32 %v3883_v62, %v3767_v25  ;;  %v3768_v10 = vadd.f32 %v8194_v5, %v3608_v60  ;;  %v3435_v62 = vmul.f32 %v8006_v43, %v8050_v48 }
 0xabd   :  { %v3769_v5 = vadd.f32 %v8196_v57, %v3609_v44  ;;  %v3436_v48 = vmul.f32 %v8009_v53, %v8047_v52  ;;  %v3437_v53 = vmul.f32 %v7989_v1, %v8057_v37  ;;  %v3438_v37 = vmul.f32 %v8012_v6, %v8060_v55  ;;  %v9251_v6 = vld [vmem:[#allocation38_spill] sm:$0xff] }
 0xabe   :  { %4636 = vpow2.f32 %v3976_v34  ;;  %v3959_v9 = vmin.f32 %v8374_v11, 0.0  ;;  %v8384_v32 = vadd.f32 %v3885_v21, %v3768_v10  ;;  %v3451_v43 = vadd.f32 %v3435_v62, %v9242_v46 }
 0xabf   :  { %v3887_v59 = vpop.permute.xlu1 %3886  ;;  %v3889_v39 = vpop.permute.xlu0 %3888  ;;  %v3452_v52 = vadd.f32 %v3436_v48, %v9243_v47  ;;  %v3453_v47 = vadd.f32 %v3437_v53, %v9244_v63  ;;  %v9252_v63 = vld [vmem:[#allocation66_spill] sm:$0xff]  ;;  %v9256_v48 = vld [vmem:[#allocation81_spill] sm:$0xff]  ;;  %vm3943_vm13 = vcmp.gt.f32.partialorder %v8374_v11, 0.0 }
 0xac0   :  { %v3978_v7 = vmul.f32 1.442695, %v3959_v9  ;;  %v3960_v21 = vmin.f32 %v8384_v32, 0.0  ;;  %v8394_v49 = vadd.f32 %v3887_v59, %v3769_v5  ;;  %v3611_v3 = vadd.f32 %v8123_v16, %v3451_v43  ;;  %v9257_v43 = vld [vmem:[#allocation79_spill] sm:$0xff] }
 0xac1   :  { %v8402_v50 = vadd.f32 %v3889_v39, %v3770_v45  ;;  %v3612_v25 = vadd.f32 %v8125_v33, %v3452_v52  ;;  %v3454_v9 = vadd.f32 %v3438_v37, %v9252_v63  ;;  %v9260_v52 = vld [vmem:[#allocation65_spill] sm:$0xff]  ;;  %vm3944_vm14 = vcmp.gt.f32.partialorder %v8384_v32, 0.0  ;;  %v9264_v63 = vld [vmem:[#allocation130_spill] sm:$0xff] }
 0xac2   :  { %4638 = vpow2.f32 %v3978_v7  ;;  %v3961_v61 = vmin.f32 %v8394_v49, 0.0  ;;  %v3771_v46 = vadd.f32 %v8200_v8, %v3611_v3  ;;  %vm3945_vm15 = vcmp.gt.f32.partialorder %v8394_v49, 0.0 }
 0xac3   :  { %v8352_v20 = vpop.permute.xlu1 %3890  ;;  %v8354_v22 = vpop.permute.xlu0 %3892  ;;  %v3772_v8 = vadd.f32 %v8202_v38, %v3612_v25  ;;  %v3439_v38 = vmul.f32 %v9251_v6, %v8067_v12  ;;  %v9261_v25 = vld [vmem:[#allocation93_spill] sm:$0xff]  ;;  %vm3946_vm0 = vcmp.gt.f32.partialorder %v8402_v50, 0.0 }
 0xac4   :  { %v4633_v58 = vpop.eup %4632  ;;  %v3982_v18 = vmul.f32 1.442695, %v3961_v61  ;;  %v8418_v56 = vadd.f32 %v8352_v20, %v3771_v46  ;;  %v9259_v61 = vld [vmem:[#allocation54_spill] sm:$0xff] }
 0xac5   :  { %v4456_v36 = vadd.f32 -1.0, %v4633_v58  ;;  %v4635_v2 = vpop.eup %4634  ;;  %v3980_v58 = vmul.f32 1.442695, %v3960_v21  ;;  %v8427_v10 = vadd.f32 %v8354_v22, %v3772_v8  ;;  %v9253_v22 = vld [vmem:[#allocation117_spill] sm:$0xff]  ;;  %v3455_v45 = vadd.f32 %v3439_v38, %v9257_v43 }
 0xac6   :  { %v4457_v57 = vadd.f32 -1.0, %v4635_v2  ;;  %v3963_v55 = vmin.f32 %v8418_v56, 0.0  ;;  %v9254_v2 = vld [vmem:[#allocation51_spill] sm:$0xff]  ;;  %vm3947_vm1 = vcmp.gt.f32.partialorder %v8418_v56, 0.0 }
 0xac7   :  { %v8361_v35 = vpop.permute.xlu1 %3894  ;;  %v8363_v54 = vpop.permute.xlu0 %3896  ;;  %v4020_v30 = vsel %vm3940_vm10, %v3924_v41, %v4456_v36  ;;  %4640 = vpow2.f32 %v3980_v58  ;;  %v3613_v36 = vadd.f32 %v8127_v4, %v3453_v47  ;;  %v3614_v5 = vadd.f32 %v9254_v2, %v3454_v9  ;;  %v9258_v58 = vld [vmem:[#allocation121_spill] sm:$0xff] }
 0xac8   :  { %v4021_v15 = vsel %vm3941_vm11, %v8344_v31, %v4457_v57  ;;  %v4637_v16 = vpop.eup %4636  ;;  %4642 = vpow2.f32 %v3982_v18  ;;  %v3986_v7 = vmul.f32 1.442695, %v3963_v55  ;;  %v3441_v53 = vmul.f32 %v9259_v61, %v9258_v58  ;;  %v9262_v47 = vld [vmem:[#allocation89_spill] sm:$0xff]  ;;  %v9270_v58 = vld [vmem:[#allocation8_spill] sm:$0xff] }
 0xac9   :  { %v4458_v31 = vadd.f32 -1.0, %v4637_v16  ;;  %v3773_v17 = vadd.f32 %v9253_v22, %v3613_v36  ;;  %v3774_v57 = vadd.f32 %v8331_v27, %v3614_v5  ;;  %v9266_v2 = vld [vmem:[#allocation73_spill] sm:$0xff]  ;;  %vm3948_vm2 = vcmp.gt.f32.partialorder %v8427_v10, 0.0 }
 0xacb   :  { %v4053_v42 = vpop.permute.xlu1 %4052  ;;  %v8371_v29 = vpop.permute.xlu0 %3740  ;;  %v4022_v4 = vsel %vm3942_vm12, %v8356_v14, %v4458_v31  ;;  %v8443_v21 = vadd.f32 %v8361_v35, %v3773_v17  ;;  %v8454_v35 = vadd.f32 %v8363_v54, %v3774_v57  ;;  %v9263_v31 = vld [vmem:[#allocation106_spill] sm:$0xff] }
 0xacc   :  { %v4100_v26 = vmul.f32 %v4053_v42, %v4020_v30  ;;  %v3962_v42 = vmin.f32 %v8402_v50, 0.0  ;;  %v4639_v62 = vpop.eup %4638 }
 0xacd   :  { %v3965_v27 = vmin.f32 %v8443_v21, 0.0  ;;  %v3966_v36 = vmin.f32 %v8454_v35, 0.0  ;;  %vm3949_vm3 = vcmp.gt.f32.partialorder %v8443_v21, 0.0  ;;  %vm3950_vm4 = vcmp.gt.f32.partialorder %v8454_v35, 0.0 }
 0xacf   :  { %v8381_v23 = vpop.permute.xlu1 %3898  ;;  %v4055_v40 = vpop.permute.xlu0 %4054  ;;  %v3990_v6 = vmul.f32 1.442695, %v3965_v27  ;;  %v9271_v27 = vld [vmem:[#allocation134_spill] sm:$0xff] }
 0xad0   :  { %v4101_v39 = vmul.f32 %v4055_v40, %v4021_v15  ;;  %v3984_v40 = vmul.f32 1.442695, %v3962_v42  ;;  %v3615_v15 = vadd.f32 %v9260_v52, %v3455_v45 }
 0xad1   :  { %v4641_v3 = vpop.eup %4640 }
 0xad2   :  { %4644 = vpow2.f32 %v3984_v40  ;;  %v4460_v18 = vadd.f32 -1.0, %v4641_v3  ;;  %v3775_v37 = vadd.f32 %v8337_v0, %v3615_v15  ;;  %v9265_v0 = vld [vmem:[#allocation96_spill] sm:$0xff] }
 0xad3   :  { %v4149_v28 = vpop.permute.xlu1 %4148  ;;  %v8391_v13 = vpop.permute.xlu0 %3742  ;;  %4646 = vpow2.f32 %v3986_v7  ;;  %v3992_v7 = vmul.f32 1.442695, %v3966_v36 }
 0xad4   :  { %v4196_v24 = vadd.f32 %v4149_v28, %v4100_v26  ;;  %v3964_v26 = vmin.f32 %v8427_v10, 0.0 }
 0xad6   :  { %v4212_v41 = vsel %vm1244_vm5, %v4196_v24, 0.0  ;;  %v9255_v24 = vld [vmem:[#allocation108_spill] sm:$0xff] }
 0xad7   :  { %v8404_v19 = vpop.permute.xlu1 %3900  ;;  %4213 = vadd.xlane.f32.xlu0 %v4212_v41  ;;  %v4057_v59 = vpop.permute.xlu0 %4056  ;;  %v3440_v14 = vmul.f32 %v9256_v48, %v9255_v24  ;;  %v4459_v41 = vadd.f32 -1.0, %v4639_v62  ;;  %v9268_v24 = vld [vmem:[#allocation68_spill] sm:$0xff] }
 0xad8   :  { %v4102_v30 = vmul.f32 %v4057_v59, %v4022_v4  ;;  %v4024_v4 = vsel %vm3944_vm14, %v8384_v32, %v4460_v18  ;;  %vm4311_vm14 = vcmask 31744  }
 0xad9   :  { %v3456_v42 = vadd.f32 %v3440_v14, %v9261_v25  ;;  %v9269_v14 = vld [vmem:[#allocation119_spill] sm:$0xff] }
 0xadb   :  { %v4151_v60 = vpop.permute.xlu1 %4150  ;;  %v8415_v34 = vpop.permute.xlu0 %3744  ;;  %v3616_v8 = vadd.f32 %v9262_v47, %v3456_v42 }
 0xadc   :  { %v4197_v1 = vadd.f32 %v4151_v60, %v4101_v39  ;;  %v3988_v39 = vmul.f32 1.442695, %v3964_v26  ;;  %v4023_v60 = vsel %vm3943_vm13, %v8374_v11, %v4459_v41  ;;  %v8470_v11 = vadd.f32 %v8381_v23, %v3775_v37 }
 0xadd   :  { %v3776_v9 = vadd.f32 %v8371_v29, %v3616_v8  ;;  %vm4294_vm13 = vcmask 23552  }
 0xade   :  { %v4215_v33 = vsel %vm1244_vm5, %v4197_v1, 0.0  ;;  %v4643_v1 = vpop.eup %4642  ;;  %4648 = vpow2.f32 %v3988_v39  ;;  %v3967_v29 = vmin.f32 %v8470_v11, 0.0  ;;  %vm3951_vm6 = vcmp.gt.f32.partialorder %v8470_v11, 0.0 }
 0xadf   :  { %v8429_v44 = vpop.permute.xlu1 %3902  ;;  %4216 = vadd.xlane.f32.xlu1 %v4215_v33  ;;  %v4059_v20 = vpop.permute.xlu0 %4058  ;;  %v3457_v33 = vadd.f32 %v3441_v53, %v9263_v31  ;;  %v4461_v62 = vadd.f32 -1.0, %v4643_v1  ;;  %v8479_v26 = vadd.f32 %v8404_v19, %v3776_v9  ;;  %4650 = vpow2.f32 %v3990_v6 }
 0xae0   :  { %v4103_v54 = vmul.f32 %v4059_v20, %v4023_v60  ;;  %v3442_v20 = vmul.f32 %v9265_v0, %v9264_v63  ;;  %v4645_v22 = vpop.eup %4644  ;;  %4652 = vpow2.f32 %v3992_v7 }
 0xae1   :  { %v3617_v5 = vadd.f32 %v9266_v2, %v3457_v33  ;;  %v4025_v45 = vsel %vm3945_vm15, %v8394_v49, %v4461_v62  ;;  %v4462_v57 = vadd.f32 -1.0, %v4645_v22  ;;  %v4647_v19 = vpop.eup %4646  ;;  %v3968_v53 = vmin.f32 %v8479_v26, 0.0 }
 0xae2   :  { %v3458_v43 = vadd.f32 %v3442_v20, %v9269_v14  ;;  %v4463_v42 = vadd.f32 -1.0, %v4647_v19  ;;  %vm3952_vm7 = vcmp.gt.f32.partialorder %v8479_v26, 0.0 }
 0xae3   :  { %v4153_v51 = vpop.permute.xlu1 %4152  ;;  %v8440_v28 = vpop.permute.xlu0 %3746  ;;  %v3777_v41 = vadd.f32 %v8391_v13, %v3617_v5  ;;  %v4026_v25 = vsel %vm3946_vm0, %v8402_v50, %v4462_v57  ;;  %v3996_v8 = vmul.f32 1.442695, %v3968_v53 }
 0xae4   :  { %v4198_v12 = vadd.f32 %v4153_v51, %v4102_v30  ;;  %v3618_v61 = vadd.f32 %v9270_v58, %v3458_v43 }
 0xae5   :  { %v8493_v49 = vadd.f32 %v8429_v44, %v3777_v41 }
 0xae6   :  { %v4218_v59 = vsel %vm1244_vm5, %v4198_v12, 0.0  ;;  %v9267_v12 = vld [vmem:[#allocation41_spill] sm:$0xff]  ;;  %v3778_v18 = vadd.f32 %v8415_v34, %v3618_v61  ;;  %v4027_v34 = vsel %vm3947_vm1, %v8418_v56, %v4463_v42 }
 0xae7   :  { %v8456_v16 = vpop.permute.xlu1 %3904  ;;  %4219 = vadd.xlane.f32.xlu0 %v4218_v59  ;;  %v4061_v46 = vpop.permute.xlu0 %4060  ;;  %v3443_v48 = vmul.f32 %v9268_v24, %v9267_v12  ;;  %v3969_v33 = vmin.f32 %v8493_v49, 0.0  ;;  %vm3953_vm10 = vcmp.gt.f32.partialorder %v8493_v49, 0.0 }
 0xae8   :  { %v4104_v17 = vmul.f32 %v4061_v46, %v4024_v4  ;;  %v3994_v46 = vmul.f32 1.442695, %v3967_v29  ;;  %v4649_v60 = vpop.eup %4648  ;;  %v8503_v50 = vadd.f32 %v8456_v16, %v3778_v18 }
 0xae9   :  { %v3459_v13 = vadd.f32 %v3443_v48, %v9271_v27  ;;  %v4651_v6 = vpop.eup %4650  ;;  %v3998_v4 = vmul.f32 1.442695, %v3969_v33 }
 0xaea   :  { %4654 = vpow2.f32 %v3994_v46  ;;  %v3970_v16 = vmin.f32 %v8503_v50, 0.0  ;;  %vm3954_vm11 = vcmp.gt.f32.partialorder %v8503_v50, 0.0 }
 0xaeb   :  { %v4155_v40 = vpop.permute.xlu1 %4154  ;;  %v8467_v55 = vpop.permute.xlu0 %3906  ;;  %4656 = vpow2.f32 %v3996_v8 }
 0xaec   :  { %v4199_v38 = vadd.f32 %v4155_v40, %v4103_v54  ;;  %v9272_v54 = vld [vmem:[#allocation78_spill] sm:$0xff]  ;;  %v4464_v40 = vadd.f32 -1.0, %v4649_v60  ;;  %4658 = vpow2.f32 %v3998_v4 }
 0xaed   :  { %v3619_v47 = vadd.f32 %v9272_v54, %v3459_v13 }
 0xaee   :  { %v4221_v30 = vsel %vm1244_vm5, %v4199_v38, 0.0  ;;  %v4028_v22 = vsel %vm3948_vm2, %v8427_v10, %v4464_v40 }
 0xaef   :  { %v4063_v23 = vpop.permute.xlu1 %4062  ;;  %4222 = vadd.xlane.f32.xlu0 %v4221_v30  ;;  %v4157_v51 = vpop.permute.xlu0 %4156  ;;  %v3779_v38 = vadd.f32 %v8440_v28, %v3619_v47 }
 0xaf0   :  { %v4200_v32 = vadd.f32 %v4157_v51, %v4104_v17  ;;  %v4105_v3 = vmul.f32 %v4063_v23, %v4025_v45  ;;  %v4465_v17 = vadd.f32 -1.0, %v4651_v6  ;;  %v4653_v28 = vpop.eup %4652  ;;  %v4000_v51 = vmul.f32 1.442695, %v3970_v16 }
 0xaf1   :  { %v8511_v62 = vadd.f32 %v8467_v55, %v3779_v38 }
 0xaf2   :  { %v4224_v59 = vsel %vm1244_vm5, %v4200_v32, 0.0  ;;  %v4029_v55 = vsel %vm3949_vm3, %v8443_v21, %v4465_v17  ;;  %v4466_v32 = vadd.f32 -1.0, %v4653_v28  ;;  %4660 = vpow2.f32 %v4000_v51  ;;  %v4472_v17 = vld [vmem:[#allocation2] ss:$0 sm:$0xff] }
 0xaf3   :  { %v4065_v52 = vpop.permute.xlu1 %4064  ;;  %4225 = vadd.xlane.f32.xlu1 %v4224_v59  ;;  %v4159_v15 = vpop.permute.xlu0 %4158  ;;  %v3971_v7 = vmin.f32 %v8511_v62, 0.0  ;;  %vm3955_vm12 = vcmp.gt.f32.partialorder %v8511_v62, 0.0  ;;  %v9273_v28 = vld [vmem:[#allocation37_spill] sm:$0xff] }
 0xaf4   :  { %v4201_v39 = vadd.f32 %v4159_v15, %v4105_v3  ;;  %v4106_v1 = vmul.f32 %v4065_v52, %v4026_v25  ;;  %v4655_v12 = vpop.eup %4654  ;;  %v4030_v19 = vsel %vm3950_vm4, %v8454_v35, %v4466_v32 }
 0xaf5   :  { %v4002_v43 = vmul.f32 1.442695, %v3971_v7  ;;  %v4657_v57 = vpop.eup %4656  ;;  %v4467_v41 = vadd.f32 -1.0, %v4655_v12  ;;  %v9278_v12 = vld [vmem:[#allocation44_spill] sm:$0xff] }
 0xaf6   :  { %v4227_v37 = vsel %vm1244_vm5, %v4201_v39, 0.0  ;;  %v4468_v52 = vadd.f32 -1.0, %v4657_v57  ;;  %v4659_v15 = vpop.eup %4658 }
 0xaf7   :  { %v4067_v31 = vpop.permute.xlu1 %4066  ;;  %4228 = vadd.xlane.f32.xlu0 %v4227_v37  ;;  %v4161_v44 = vpop.permute.xlu0 %4160  ;;  %4662 = vpow2.f32 %v4002_v43  ;;  %v4031_v53 = vsel %vm3951_vm6, %v8470_v11, %v4467_v41  ;;  %v4469_v42 = vadd.f32 -1.0, %v4659_v15  ;;  %v9279_v43 = vld [vmem:[#allocation80_spill] sm:$0xff] }
 0xaf8   :  { %v4202_v36 = vadd.f32 %v4161_v44, %v4106_v1  ;;  %v4107_v63 = vmul.f32 %v4067_v31, %v4027_v34  ;;  %v4032_v25 = vsel %vm3952_vm7, %v8479_v26, %v4468_v52  ;;  %v9284_v52 = vld [vmem:[#allocation57_spill] sm:$0xff] }
 0xaf9   :  { %v4033_v47 = vsel %vm3953_vm10, %v8493_v49, %v4469_v42  ;;  %v9287_v42 = vld [vmem:[#allocation99_spill] sm:$0xff] }
 0xafa   :  { %v4230_v0 = vsel %vm1244_vm5, %v4202_v36, 0.0 }
 0xafb   :  { %v4069_v20 = vpop.permute.xlu1 %4068  ;;  %4231 = vadd.xlane.f32.xlu1 %v4230_v0  ;;  %v4163_v9 = vpop.permute.xlu0 %4162 }
 0xafc   :  { %v4203_v56 = vadd.f32 %v4163_v9, %v4107_v63  ;;  %v4108_v30 = vmul.f32 %v4069_v20, %v4028_v22  ;;  %v4661_v60 = vpop.eup %4660 }
 0xafd   :  { %v4470_v8 = vadd.f32 -1.0, %v4661_v60 }
 0xafe   :  { %v4233_v2 = vsel %vm1244_vm5, %v4203_v56, 0.0 }
 0xaff   :  { %v4071_v5 = vpop.permute.xlu1 %4070  ;;  %4234 = vadd.xlane.f32.xlu0 %v4233_v2  ;;  %v4165_v23 = vpop.permute.xlu0 %4164  ;;  %v4034_v40 = vsel %vm3954_vm11, %v8503_v50, %v4470_v8  ;;  %v9290_v8 = vld [vmem:[#allocation84_spill] sm:$0xff] }
 0xb00   :  { %v4204_v29 = vadd.f32 %v4165_v23, %v4108_v30  ;;  %v4109_v10 = vmul.f32 %v4071_v5, %v4029_v55  ;;  %v9274_v30 = vld [vmem:[#allocation29_spill] sm:$0xff]  ;;  %v9275_v5 = vld [vmem:[#allocation31_spill] sm:$0xff] }
 0xb01   :  { %v4663_v31 = vpop.eup %4662  ;;  %v4261_v2 = vsel %vm4260_vm8, %v9274_v30, %v9273_v28  ;;  %v9277_v55 = vld [vmem:[#allocation49_spill] sm:$0xff]  ;;  %v9297_v28 = vld [vmem:[#allocation50_spill] sm:$0xff] }
 0xb02   :  { %v4236_v24 = vsel %vm1244_vm5, %v4204_v29, 0.0  ;;  %v4471_v6 = vadd.f32 -1.0, %v4663_v31  ;;  %v9276_v29 = vld [vmem:[#allocation53_spill] sm:$0xff]  ;;  %v9298_v30 = vld [vmem:[#allocation26_spill] sm:$0xff] }
 0xb03   :  { %v4073_v48 = vpop.permute.xlu1 %4072  ;;  %4237 = vadd.xlane.f32.xlu1 %v4236_v24  ;;  %v4167_v14 = vpop.permute.xlu0 %4166  ;;  %v4262_v32 = vsel %vm4260_vm8, %v9277_v55, %v9276_v29  ;;  %v9300_v29 = vld [vmem:[#allocation40_spill] sm:$0xff] }
 0xb04   :  { %v4205_v45 = vadd.f32 %v4167_v14, %v4109_v10  ;;  %v4110_v3 = vmul.f32 %v4073_v48, %v4030_v19  ;;  %v4035_v9 = vsel %vm3955_vm12, %v8511_v62, %v4471_v6  ;;  %v4278_v62 = vsel %vm4277_vm9, %v4261_v2, %v9275_v5  ;;  %v9281_v19 = vld [vmem:[#allocation71_spill] sm:$0xff]  ;;  %v9293_v6 = vld [vmem:[#allocation124_spill] sm:$0xff] }
 0xb05   :  { %v4279_v10 = vsel %vm4277_vm9, %v4262_v32, %v9278_v12  ;;  %v4269_v2 = vsel %vm4260_vm8, %v9298_v30, %v9297_v28  ;;  %v9299_v5 = vld [vmem:[#allocation47_spill] sm:$0xff]  ;;  %v9301_v55 = vld [vmem:[#allocation76_spill] sm:$0xff]  ;;  %v9302_v12 = vld [vmem:[#allocation34_spill] sm:$0xff] }
 0xb06   :  { %v4239_v21 = vsel %vm1244_vm5, %v4205_v45, 0.0  ;;  %v9280_v45 = vld [vmem:[#allocation18_spill] sm:$0xff]  ;;  %v4270_v32 = vsel %vm4260_vm8, %v9301_v55, %v9300_v29 }
 0xb07   :  { %v4075_v59 = vpop.permute.xlu1 %4074  ;;  %4240 = vadd.xlane.f32.xlu0 %v4239_v21  ;;  %v4169_v58 = vpop.permute.xlu0 %4168  ;;  %v4263_v57 = vsel %vm4260_vm8, %v9280_v45, %v9279_v43  ;;  %v9303_v43 = vld [vmem:[#allocation59_spill] sm:$0xff]  ;;  %v9304_v45 = vld [vmem:[#allocation17_spill] sm:$0xff] }
 0xb08   :  { %v4206_v61 = vadd.f32 %v4169_v58, %v4110_v3  ;;  %v4111_v46 = vmul.f32 %v4075_v59, %v4031_v53  ;;  %v4280_v41 = vsel %vm4277_vm9, %v4263_v57, %v9281_v19  ;;  %v9282_v58 = vld [vmem:[#allocation67_spill] sm:$0xff]  ;;  %v4271_v57 = vsel %vm4260_vm8, %v9304_v45, %v9303_v43  ;;  %v9305_v19 = vld [vmem:[#allocation74_spill] sm:$0xff] }
 0xb0a   :  { %v4242_v39 = vsel %vm1244_vm5, %v4206_v61, 0.0  ;;  %v9283_v61 = vld [vmem:[#allocation24_spill] sm:$0xff] }
 0xb0b   :  { %v4077_v27 = vpop.permute.xlu1 %4076  ;;  %4243 = vadd.xlane.f32.xlu1 %v4242_v39  ;;  %v4171_v35 = vpop.permute.xlu0 %4170  ;;  %v4264_v53 = vsel %vm4260_vm8, %v9283_v61, %v9282_v58  ;;  %v9306_v58 = vld [vmem:[#allocation64_spill] sm:$0xff]  ;;  %v9307_v61 = vld [vmem:[#allocation114_spill] sm:$0xff] }
 0xb0c   :  { %v4207_v13 = vadd.f32 %v4171_v35, %v4111_v46  ;;  %v4112_v18 = vmul.f32 %v4077_v27, %v4032_v25  ;;  %v4281_v15 = vsel %vm4277_vm9, %v4264_v53, %v9284_v52  ;;  %v9285_v35 = vld [vmem:[#allocation107_spill] sm:$0xff]  ;;  %v4272_v53 = vsel %vm4260_vm8, %v9307_v61, %v9306_v58  ;;  %v9308_v52 = vld [vmem:[#allocation60_spill] sm:$0xff] }
 0xb0e   :  { %v4245_v1 = vsel %vm1244_vm5, %v4207_v13, 0.0  ;;  %v9286_v13 = vld [vmem:[#allocation22_spill] sm:$0xff] }
 0xb0f   :  { %v4079_v37 = vpop.permute.xlu1 %4078  ;;  %4246 = vadd.xlane.f32.xlu0 %v4245_v1  ;;  %v4173_v11 = vpop.permute.xlu0 %4172  ;;  %v4265_v25 = vsel %vm4260_vm8, %v9286_v13, %v9285_v35  ;;  %v9309_v35 = vld [vmem:[#allocation6_spill] sm:$0xff]  ;;  %v9310_v13 = vld [vmem:[#allocation28_spill] sm:$0xff] }
 0xb10   :  { %v4208_v54 = vadd.f32 %v4173_v11, %v4112_v18  ;;  %v4113_v44 = vmul.f32 %v4079_v37, %v4033_v47  ;;  %v4282_v60 = vsel %vm4277_vm9, %v4265_v25, %v9287_v42  ;;  %v9288_v11 = vld [vmem:[#allocation95_spill] sm:$0xff]  ;;  %v4273_v25 = vsel %vm4260_vm8, %v9310_v13, %v9309_v35 }
 0xb11   :  { %v9311_v42 = vld [vmem:[#allocation87_spill] sm:$0xff] }
 0xb12   :  { %v4248_v33 = vsel %vm1244_vm5, %v4208_v54, 0.0  ;;  %v9289_v54 = vld [vmem:[#allocation63_spill] sm:$0xff] }
 0xb13   :  { %v4081_v36 = vpop.permute.xlu1 %4080  ;;  %4249 = vadd.xlane.f32.xlu1 %v4248_v33  ;;  %v4175_v26 = vpop.permute.xlu0 %4174  ;;  %v4266_v47 = vsel %vm4260_vm8, %v9289_v54, %v9288_v11  ;;  %v9312_v54 = vld [vmem:[#allocation102_spill] sm:$0xff] }
 0xb14   :  { %v4209_v34 = vadd.f32 %v4175_v26, %v4113_v44  ;;  %v4114_v38 = vmul.f32 %v4081_v36, %v4034_v40  ;;  %v4283_v31 = vsel %vm4277_vm9, %v4266_v47, %v9290_v8  ;;  %v9291_v26 = vld [vmem:[#allocation129_spill] sm:$0xff] }
 0xb16   :  { %v4251_v63 = vsel %vm1244_vm5, %v4209_v34, 0.0  ;;  %v9292_v34 = vld [vmem:[#allocation19_spill] sm:$0xff] }
 0xb17   :  { %v4083_v0 = vpop.permute.xlu1 %4082  ;;  %4252 = vadd.xlane.f32.xlu0 %v4251_v63  ;;  %v4177_v49 = vpop.permute.xlu0 %4176  ;;  %v4267_v40 = vsel %vm4260_vm8, %v9292_v34, %v9291_v26  ;;  %v9314_v34 = vld [vmem:[#allocation115_spill] sm:$0xff] }
 0xb18   :  { %v4210_v20 = vadd.f32 %v4177_v49, %v4114_v38  ;;  %v4115_v4 = vmul.f32 %v4083_v0, %v4035_v9  ;;  %v4284_v38 = vsel %vm4277_vm9, %v4267_v40, %v9293_v6  ;;  %v9295_v9 = vld [vmem:[#allocation25_spill] sm:$0xff] }
 0xb1a   :  { %v4254_v16 = vsel %vm1244_vm5, %v4210_v20, 0.0  ;;  %v9294_v20 = vld [vmem:[#allocation120_spill] sm:$0xff] }
 0xb1b   :  { %v4179_v56 = vpop.permute.xlu1 %4178  ;;  %4255 = vadd.xlane.f32.xlu1 %v4254_v16  ;;  %v9296_v16 = vld [vmem:[#allocation111_spill] sm:$0xff] }
 0xb1c   :  { %v4211_v22 = vadd.f32 %v4179_v56, %v4115_v4  ;;  %v4268_v4 = vsel %vm4260_vm8, %v9295_v9, %v9294_v20 }
 0xb1d   :  { %v4285_v56 = vsel %vm4277_vm9, %v4268_v4, %v9296_v16 }
 0xb1e   :  { %v4257_v50 = vsel %vm1244_vm5, %v4211_v22, 0.0 }
 0xb1f   :  { %4258 = vadd.xlane.f32.xlu0 %v4257_v50 }
 0xb35   :  { %4367 = vperm.xlu0 %4535, %v4472_v17  }
 0xb64   :  { %v4214_v23 = vpop.xlane.xlu0 %4213 }
 0xb65   :  { %v4295_v51 = vsel %vm4294_vm13, %v4278_v62, %v4214_v23  ;;  %v4286_v62 = vsel %vm4277_vm9, %v4269_v2, %v9299_v5 }
 0xb66   :  { %v4312_v7 = vsel %vm4311_vm14, %v4295_v51, 0.0 }
 0xb67   :  { %4328 = vxpose.xlu1.b32.start [1/16] (narrow) %v4312_v7, 8 }
 0xb6c   :  { %v4217_v24 = vpop.xlane.xlu1 %4216 }
 0xb6d   :  { %v4296_v48 = vsel %vm4294_vm13, %v4279_v10, %v4217_v24  ;;  %v4287_v10 = vsel %vm4277_vm9, %v4270_v32, %v9302_v12 }
 0xb6e   :  { %v4313_v14 = vsel %vm4311_vm14, %v4296_v48, 0.0 }
 0xb6f   :  { %4329 = vxpose.xlu1.b32.cont [2/16] (narrow) %v4313_v14, 8 }
 0xb74   :  { %v4220_v3 = vpop.xlane.xlu0 %4219 }
 0xb75   :  { %v4297_v21 = vsel %vm4294_vm13, %v4280_v41, %v4220_v3  ;;  %v4288_v41 = vsel %vm4277_vm9, %v4271_v57, %v9305_v19 }
 0xb76   :  { %v4314_v59 = vsel %vm4311_vm14, %v4297_v21, 0.0 }
 0xb77   :  { %4330 = vxpose.xlu1.b32.cont [3/16] (narrow) %v4314_v59, 8 }
 0xb7c   :  { %v4223_v46 = vpop.xlane.xlu0 %4222 }
 0xb7d   :  { %v4298_v39 = vsel %vm4294_vm13, %v4281_v15, %v4223_v46  ;;  %v4289_v15 = vsel %vm4277_vm9, %v4272_v53, %v9308_v52 }
 0xb7e   :  { %v4315_v27 = vsel %vm4311_vm14, %v4298_v39, 0.0 }
 0xb7f   :  { %4331 = vxpose.xlu1.b32.cont [4/16] (narrow) %v4315_v27, 8 }
 0xb80   :  { %v4226_v18 = vpop.xlane.xlu1 %4225 }
 0xb81   :  { %v4299_v1 = vsel %vm4294_vm13, %v4282_v60, %v4226_v18  ;;  %v4290_v60 = vsel %vm4277_vm9, %v4273_v25, %v9311_v42 }
 0xb82   :  { %v4316_v37 = vsel %vm4311_vm14, %v4299_v1, 0.0 }
 0xb83   :  { %4332 = vxpose.xlu1.b32.cont [5/16] (narrow) %v4316_v37, 8 }
 0xb84   :  { %v4229_v44 = vpop.xlane.xlu0 %4228 }
 0xb85   :  { %v4300_v33 = vsel %vm4294_vm13, %v4283_v31, %v4229_v44  ;;  %v9313_v44 = vld [vmem:[#allocation127_spill] sm:$0xff] }
 0xb86   :  { %v4317_v36 = vsel %vm4311_vm14, %v4300_v33, 0.0 }
 0xb87   :  { %4333 = vxpose.xlu1.b32.cont [6/16] (narrow) %v4317_v36, 8 }
 0xb88   :  { %v4232_v63 = vpop.xlane.xlu1 %4231 }
 0xb89   :  { %v4301_v0 = vsel %vm4294_vm13, %v4284_v38, %v4232_v63 }
 0xb8a   :  { %v4318_v49 = vsel %vm4311_vm14, %v4301_v0, 0.0 }
 0xb8b   :  { %4334 = vxpose.xlu1.b32.cont [7/16] (narrow) %v4318_v49, 8 }
 0xb8c   :  { %v4235_v22 = vpop.xlane.xlu0 %4234 }
 0xb8d   :  { %v4302_v50 = vsel %vm4294_vm13, %v4285_v56, %v4235_v22 }
 0xb8e   :  { %v4319_v17 = vsel %vm4311_vm14, %v4302_v50, 0.0 }
 0xb8f   :  { %4335 = vxpose.xlu1.b32.cont [8/16] (narrow) %v4319_v17, 8 }
 0xb90   :  { %v4238_v23 = vpop.xlane.xlu1 %4237 }
 0xb91   :  { %v4303_v51 = vsel %vm4294_vm13, %v4286_v62, %v4238_v23 }
 0xb92   :  { %v4320_v7 = vsel %vm4311_vm14, %v4303_v51, 0.0 }
 0xb93   :  { %4336 = vxpose.xlu1.b32.cont [9/16] (narrow) %v4320_v7, 8 }
 0xb94   :  { %v4241_v24 = vpop.xlane.xlu0 %4240 }
 0xb95   :  { %v4304_v48 = vsel %vm4294_vm13, %v4287_v10, %v4241_v24 }
 0xb96   :  { %v4321_v14 = vsel %vm4311_vm14, %v4304_v48, 0.0 }
 0xb97   :  { %4337 = vxpose.xlu1.b32.cont [10/16] (narrow) %v4321_v14, 8 }
 0xb98   :  { %v4244_v3 = vpop.xlane.xlu1 %4243 }
 0xb99   :  { %v4305_v21 = vsel %vm4294_vm13, %v4288_v41, %v4244_v3 }
 0xb9a   :  { %v4322_v59 = vsel %vm4311_vm14, %v4305_v21, 0.0 }
 0xb9b   :  { %4338 = vxpose.xlu1.b32.cont [11/16] (narrow) %v4322_v59, 8 }
 0xb9c   :  { %v4247_v46 = vpop.xlane.xlu0 %4246 }
 0xb9d   :  { %v4306_v39 = vsel %vm4294_vm13, %v4289_v15, %v4247_v46 }
 0xb9e   :  { %v4323_v27 = vsel %vm4311_vm14, %v4306_v39, 0.0 }
 0xb9f   :  { %4339 = vxpose.xlu1.b32.cont [12/16] (narrow) %v4323_v27, 8 }
 0xba0   :  { %v4250_v18 = vpop.xlane.xlu1 %4249 }
 0xba1   :  { %v4307_v1 = vsel %vm4294_vm13, %v4290_v60, %v4250_v18 }
 0xba2   :  { %v4324_v37 = vsel %vm4311_vm14, %v4307_v1, 0.0 }
 0xba3   :  { %4340 = vxpose.xlu1.b32.cont [13/16] (narrow) %v4324_v37, 8 }
 0xba4   :  { %v4253_v11 = vpop.xlane.xlu0 %4252 }
 0xba5   :  { %v4308_v47 = vsel %vm4294_vm13, %v9312_v54, %v4253_v11 }
 0xba6   :  { %v4325_v8 = vsel %vm4311_vm14, %v4308_v47, 0.0 }
 0xba7   :  { %4341 = vxpose.xlu1.b32.cont [14/16] (narrow) %v4325_v8, 8 }
 0xba8   :  { %v4256_v31 = vpop.xlane.xlu1 %4255 }
 0xba9   :  { %v4309_v33 = vsel %vm4294_vm13, %v9313_v44, %v4256_v31 }
 0xbaa   :  { %v4326_v36 = vsel %vm4311_vm14, %v4309_v33, 0.0 }
 0xbab   :  { %4342 = vxpose.xlu1.b32.cont [15/16] (narrow) %v4326_v36, 8 }
 0xbac   :  { %v4259_v26 = vpop.xlane.xlu0 %4258 }
 0xbad   :  { %v4310_v40 = vsel %vm4294_vm13, %v9314_v34, %v4259_v26 }
 0xbae   :  { %v4327_v6 = vsel %vm4311_vm14, %v4310_v40, 0.0 }
 0xbaf   :  { %4343 = vxpose.xlu1.b32.end [16/16] (narrow) %v4327_v6, 8 }
 0xbb4   :  { %v4368_v38 = vpop.permute.xlu0 %4367 }
 0xbf3   :  { %v4344_v63 = vpop.trf.xlu1 }
 0xbf4   :  { %v4370_v0 = vadd.f32 %v4368_v38, %v4344_v63 }
 0xbf6   :  { %4371 = vst [vmem:[#allocation3] sm:$0xf] %v4370_v0 }
 0xbf7   :  { %4723 = shalt.err (!%p4720_p4)
}
 0xbf8   :  { %s4724_s19 = scalar_lea.hbm %s8656_s6, 64 }
 0xbf9   :  { %p4725_p5 = scmp.ne.s32.totalorder %s8656_s6, %s4724_s19  ;;  %p4728_p6 = scmp.lt.u32.totalorder %s4724_s19, %s8656_s6 }
 0xbfb   :  { %p4730_p7 = pnand %p4728_p6, %p4725_p5 }
 0xbfd   :  { %4733 = shalt.err (!%p4730_p7)
}
 0xbfe   :  { %4381 = dma.vmem_to_hbm [thread:$0]  %s4379_s3, 64, %s8656_s6, [#allocation4]  }
 0xbff   :  { %4734 = dma.done.wait [#allocation4], 64  }
 0xc00   :  { %4735 = vsyncadd [#allocation4], 4294967232 }
 0xc01   :  { %4385 = vsyncpa [#allocation4], 1 }

</bundles_post_ra>
